<compile_context>
chip_gen: v7x
topology: tpu7x:2x2x1
jax: 0.10.0
libtpu: 0.0.40
codegen_flags: <defaults>
</compile_context>

<pallas_src>
import functools
import math

import jax
import jax.numpy as jnp
from jax import lax
from jax.experimental import pallas as pl
from jax.experimental.pallas import tpu as pltpu

_NEG = -1e30                       # large-negative for masked scores (finite; safe pre-max)
_MM_DTYPE = jnp.bfloat16
_VMEM_LIMIT = 48 * 1024 * 1024     # fits v7x 64 MiB physical; raise toward 128 MiB on v5e/v6e


def _mm(a, b):
    """a @ b with bf16 operands and f32 accumulation (MXU-friendly)."""
    return jnp.dot(a.astype(_MM_DTYPE), b.astype(_MM_DTYPE),
                   preferred_element_type=jnp.float32)


def _dot_t(a, b):
    """a @ b.T without materializing the transpose (contract last dims of both)."""
    return lax.dot_general(a.astype(_MM_DTYPE), b.astype(_MM_DTYPE),
                           (((1,), (1,)), ((), ())),
                           preferred_element_type=jnp.float32)


def _dot_ta(a, b):
    """a.T @ b without materializing the transpose (contract first dims of both)."""
    return lax.dot_general(a.astype(_MM_DTYPE), b.astype(_MM_DTYPE),
                           (((0,), (0,)), ((), ())),
                           preferred_element_type=jnp.float32)


def _layernorm(x, g, b, eps=1e-5):
    mu = jnp.mean(x, axis=-1, keepdims=True)
    var = jnp.mean((x - mu) ** 2, axis=-1, keepdims=True)
    return (x - mu) * lax.rsqrt(var + eps) * g + b


def _softmax_rows(s, key_mask_row):
    """s: [Q, K]; key_mask_row: [1, K] (1=valid, 0=pad). Softmax over last (key) axis."""
    s = jnp.where(key_mask_row > 0.0, s, _NEG)
    s = s - jnp.max(s, axis=-1, keepdims=True)
    p = jnp.exp(s)
    return p * pl.reciprocal(jnp.sum(p, axis=-1, keepdims=True), approx=True)


def _softmax_cols(s, key_mask_col):
    """s: [K, Q]; key_mask_col: [K, 1]. Softmax over first (key) axis.
    Equals softmax_rows(s.T, mask).T without materializing s.T."""
    s = jnp.where(key_mask_col > 0.0, s, _NEG)
    s = s - jnp.max(s, axis=0, keepdims=True)
    p = jnp.exp(s)
    return p * pl.reciprocal(jnp.sum(p, axis=0, keepdims=True), approx=True)


# --------------------- fused transformer-encoder layer ----------------------

def _encoder_layer_kernel(*refs, heads, with_proj):
    if with_proj:
        (x_ref, m_ref, wi_ref, wqkv_ref, wo_ref, w1_ref, w2_ref, pb_ref, o_ref) = refs
    else:
        (x_ref, m_ref, wqkv_ref, wo_ref, w1_ref, w2_ref, pb_ref, o_ref) = refs

    d_model = wo_ref.shape[1]
    d_inner = w1_ref.shape[1]
    dh = d_model // heads
    scale = 1.0 / math.sqrt(dh)

    x = x_ref[0]                        # [T, d_in] (f32 or bf16)
    m = m_ref[0]                        # [1, T] key mask (1 valid / 0 pad)

    # Packed small parameters (one DMA): biases + LN gains/offsets.
    pb = pb_ref[...]                    # [9, Wmax] f32
    bqkv = pb[0:1, :3 * d_model]
    bo   = pb[1:2, :d_model]
    b1   = pb[2:3, :d_inner]
    b2   = pb[3:4, :d_model]
    ln1g = pb[4:5, :d_model]
    ln1b = pb[5:6, :d_model]
    ln2g = pb[6:7, :d_model]
    ln2b = pb[7:8, :d_model]

    if with_proj:
        h = _mm(x, wi_ref[...]) + pb[8:9, :d_model]          # [T, d_model] f32
    else:
        h = x.astype(jnp.float32)

    # Fused QKV projection (bf16 MXU, f32 accumulation).
    qkv = _mm(h, wqkv_ref[...]) + bqkv                       # [T, 3*d_model] f32
    wo = wo_ref[...]                                         # bf16 [d_model, d_model]

    # Per-head attention; each head's context is folded straight into the O-projection
    # accumulator (no [T, d_model] concat).  q@k^T uses trans-B dot_general (no k.T).
    # TODO(synk): dh-wide lane slices still relayout when dh < 128; at production sizes
    #             keep d_model / dh multiples of 128 (or switch to a head-batched einsum).
    o = bo
    for i in range(heads):
        q = qkv[:, i * dh:(i + 1) * dh]
        k = qkv[:, d_model + i * dh:d_model + (i + 1) * dh]
        v = qkv[:, 2 * d_model + i * dh:2 * d_model + (i + 1) * dh]
        s = _dot_t(q, k) * scale                             # [T, T]
        p = _softmax_rows(s, m)
        ctx = _mm(p, v)                                      # [T, dh]
        o = o + _mm(ctx, wo[i * dh:(i + 1) * dh, :])         # accumulate O-projection
    h = _layernorm(h + o, ln1g, ln1b)

    # FFN; the [T, d_inner] intermediate never leaves VMEM.
    f = _mm(jnp.maximum(_mm(h, w1_ref[...]) + b1, 0.0), w2_ref[...]) + b2
    o_ref[0] = _layernorm(h + f, ln2g, ln2b).astype(o_ref.dtype)


def encoder_layer(x, mask_rows, lp, heads, wi=None, out_dtype=jnp.bfloat16):
    """x: [B, T, d_in]; mask_rows: [B, 1, T] f32. Returns [B, T, d_model] (out_dtype)."""
    B, T, d_in = x.shape
    d_model = lp["Wo"].shape[1]
    with_proj = wi is not None

    ins = [x, mask_rows]
    in_specs = [pl.BlockSpec((1, T, d_in), lambda i: (i, 0, 0)),
                pl.BlockSpec((1, 1, T), lambda i: (i, 0, 0))]
    weights = ([wi] if with_proj else []) + [lp["Wqkv"], lp["Wo"], lp["W1"],
                                             lp["W2"], lp["pbias"]]
    for w in weights:
        ins.append(w)
        in_specs.append(pl.BlockSpec(w.shape, lambda i, _n=w.ndim: (0,) * _n))

    kern = functools.partial(_encoder_layer_kernel, heads=heads, with_proj=with_proj)
    return pl.pallas_call(
        kern,
        grid=(B,),
        in_specs=in_specs,
        out_specs=pl.BlockSpec((1, T, d_model), lambda i: (i, 0, 0)),
        out_shape=jax.ShapeDtypeStruct((B, T, d_model), out_dtype),
        compiler_params=pltpu.CompilerParams(
            dimension_semantics=("parallel",),
            vmem_limit_bytes=_VMEM_LIMIT),
    )(*ins)


def transformer_encoder(params, x, mask_rows, heads, out_dtype=jnp.bfloat16):
    """x: [B, T, d_in]; mask_rows: [B, 1, T] f32. Intermediate layers emit bf16."""
    h = x
    n_layers = len(params["layers"])
    for li, lp in enumerate(params["layers"]):
        wi = params["Wi"] if li == 0 else None
        dt = out_dtype if li == n_layers - 1 else jnp.bfloat16
        h = encoder_layer(h, mask_rows, lp, heads, wi=wi, out_dtype=dt)
    return h


# -------------- fused tri-dual-attention (+ 9*d_model segments) -------------

def _tri_dual_kernel(ep_ref, eq_ref, ea_ref,
                     mp_r_ref, mq_r_ref, ma_r_ref,
                     mp_c_ref, mq_c_ref, ma_c_ref,
                     wpq_ref, wpa_ref, wqa_ref,
                     gp_ref, gq_ref, ga_ref):
    d = ep_ref.shape[2]
    scale = 1.0 / math.sqrt(d)

    ep, eq, ea = ep_ref[0], eq_ref[0], ea_ref[0]            # bf16 [L,d],[J,d],[N,d]
    epf, eqf, eaf = (ep.astype(jnp.float32), eq.astype(jnp.float32),
                     ea.astype(jnp.float32))
    mpr, mqr, mar = mp_r_ref[0], mq_r_ref[0], ma_r_ref[0]   # [1,L],[1,J],[1,N]
    mpc, mqc, mac = mp_c_ref[0], mq_c_ref[0], ma_c_ref[0]   # [L,1],[J,1],[N,1]

    def pair(e1, e2, m1_col, m2_row, w):
        # Affinity e1 @ W @ e2^T built with no explicit transpose; both softmax
        # directions come from the SAME score matrix (rows vs columns).
        s = _dot_t(_mm(e1, w), e2) * scale                  # [L1, L2]
        p12 = _softmax_rows(s, m2_row)                      # e1 queries over e2 keys
        p21 = _softmax_cols(s, m1_col)                      # e2 queries over e1 keys
        a2 = _mm(p12, e2)                                   # [L1, d]
        a1 = _dot_ta(p21, e1)                               # [L2, d] == softmax(s.T) @ e1
        c2 = _mm(p12, a1)                                   # [L1, d]
        c1 = _dot_ta(p21, a2)                               # [L2, d]
        return a2, c2, a1, c1

    aq,   cq,   ap_q, cp_q = pair(ep, eq, mpc, mqr, wpq_ref[...])   # p <-> q
    aa_p, ca_p, ap_a, cp_a = pair(ep, ea, mpc, mar, wpa_ref[...])   # p <-> a
    aa_q, ca_q, aq_a, cq_a = pair(eq, ea, mqc, mar, wqa_ref[...])   # q <-> a

    def store9(ref, segs):
        # Segmented stores into the 9*d-wide output; no concat intermediate.
        for idx, seg in enumerate(segs):
            ref[0, :, idx * d:(idx + 1) * d] = seg.astype(ref.dtype)

    # Gp = cat([Gpq, Gpa[:, d:]]), Gq = cat([Gqp, Gqa[:, d:]]), Ga = cat([Gap, Gaq[:, d:]]).
    store9(gp_ref, (epf, aq, cq, epf * aq, epf * cq,
                    aa_p, ca_p, epf * aa_p, epf * ca_p))
    store9(gq_ref, (eqf, ap_q, cp_q, eqf * ap_q, eqf * cp_q,
                    aa_q, ca_q, eqf * aa_q, eqf * ca_q))
    store9(ga_ref, (eaf, ap_a, cp_a, eaf * ap_a, eaf * cp_a,
                    aq_a, cq_a, eaf * aq_a, eaf * cq_a))


def tri_dual_attention(wpq, wpa, wqa, Ep, Eq, Ea,
                       mp_rows, mq_rows, ma_rows, mp_cols, mq_cols, ma_cols):
    bs, L, d = Ep.shape
    J, N = Eq.shape[1], Ea.shape[1]

    def bspec(shape2):
        return pl.BlockSpec((1,) + shape2, lambda i: (i, 0, 0))

    Gp, Gq, Ga = pl.pallas_call(
        _tri_dual_kernel,
        grid=(bs,),
        in_specs=[
            bspec((L, d)), bspec((J, d)), bspec((N, d)),
            bspec((1, L)), bspec((1, J)), bspec((1, N)),
            bspec((L, 1)), bspec((J, 1)), bspec((N, 1)),
            pl.BlockSpec((d, d), lambda i: (0, 0)),
            pl.BlockSpec((d, d), lambda i: (0, 0)),
            pl.BlockSpec((d, d), lambda i: (0, 0)),
        ],
        out_specs=[bspec((L, 9 * d)), bspec((J, 9 * d)), bspec((N, 9 * d))],
        out_shape=(
            jax.ShapeDtypeStruct((bs, L, 9 * d), jnp.bfloat16),
            jax.ShapeDtypeStruct((bs, J, 9 * d), jnp.bfloat16),
            jax.ShapeDtypeStruct((bs, N, 9 * d), jnp.bfloat16),
        ),
        compiler_params=pltpu.CompilerParams(
            dimension_semantics=("parallel",),
            vmem_limit_bytes=_VMEM_LIMIT),
    )(Ep, Eq, Ea, mp_rows, mq_rows, ma_rows, mp_cols, mq_cols, ma_cols,
      wpq, wpa, wqa)
    return Gp, Gq, Ga


# ------------------------------ params / init -------------------------------

def _init_linear(key, d_in, d_out):
    w = jax.random.normal(key, (d_in, d_out), jnp.float32) / math.sqrt(d_in)
    b = jnp.zeros((d_out,), jnp.float32)
    return w, b


def init_encoder(key, num_layers, d_in, d_inner, d_model):
    keys = jax.random.split(key, num_layers + 1)
    Wi, bi = _init_linear(keys[0], d_in, d_model)
    wmax = max(3 * d_model, d_inner)

    def row(v):
        return jnp.pad(v, (0, wmax - v.shape[0]))[None, :]

    layers = []
    for l in range(num_layers):
        ks = jax.random.split(keys[l + 1], 4)
        Wqkv, bqkv = _init_linear(ks[0], d_model, 3 * d_model)   # fused Q|K|V
        Wo, bo = _init_linear(ks[1], d_model, d_model)
        W1, b1 = _init_linear(ks[2], d_model, d_inner)
        W2, b2 = _init_linear(ks[3], d_inner, d_model)
        ones = jnp.ones((d_model,), jnp.float32)
        zeros = jnp.zeros((d_model,), jnp.float32)
        # Pack all the small f32 params of the layer into one array -> one DMA per step.
        # rows: bqkv, bo, b1, b2, ln1_g, ln1_b, ln2_g, ln2_b, bi (input-proj bias, layer 0).
        pbias = jnp.concatenate(
            [row(v) for v in (bqkv, bo, b1, b2, ones, zeros, ones, zeros,
                              bi if l == 0 else zeros)], axis=0)
        layers.append(dict(
            Wqkv=Wqkv.astype(_MM_DTYPE), Wo=Wo.astype(_MM_DTYPE),
            W1=W1.astype(_MM_DTYPE), W2=W2.astype(_MM_DTYPE), pbias=pbias))
    return dict(Wi=Wi.astype(_MM_DTYPE), layers=layers)


def init_streader(key, d_emb, d_model, d_inner, num_layers=1):
    # NOTE: Stage-1 parameters (dual_attn_*/passage/question/qa_transformer) exist in the
    # PyTorch module but their forward outputs are dead (overwritten by stage 2), so they
    # are neither created nor computed here; returned Mp/Mq/Ma are identical.
    d_after_dual = 9 * d_model
    ks = jax.random.split(key, 7)

    def bilinear(k):
        w = jax.random.normal(k, (d_model, d_model), jnp.float32) / math.sqrt(d_model)
        return w.astype(_MM_DTYPE)

    return dict(
        shared=init_encoder(ks[0], num_layers, d_emb, d_inner, d_model),
        w_pq2=bilinear(ks[1]), w_pa2=bilinear(ks[2]), w_qa2=bilinear(ks[3]),
        p_enc2=init_encoder(ks[4], num_layers, d_after_dual, d_inner, d_model),
        q_enc2=init_encoder(ks[5], num_layers, d_after_dual, d_inner, d_model),
        a_enc2=init_encoder(ks[6], num_layers, d_after_dual, d_inner, d_model),
    )


# --------------------------------- forward ----------------------------------

def streader_forward(params, p_emb, q_emb, a_emb, mask_p, mask_q, mask_a,
                     *, heads, d_model, pad_idx):
    del d_model  # derived from the weights
    bs, L, _ = mask_p.shape
    J = mask_q.shape[1]
    N = mask_a.shape[1]
    max_len = max(L, J, N)

    # _forward_concat: pad each sequence to max_len, run the shared encoder on the
    # [3*bs, max_len, d_emb] concat, split and narrow back.
    def pad_to(x, m, T):
        if T < max_len:
            x = jnp.pad(x, ((0, 0), (0, max_len - T), (0, 0)),
                        constant_values=float(pad_idx))
            m = jnp.pad(m, ((0, 0), (0, max_len - T), (0, 0)), constant_values=False)
        return x, m

    p_pad, mp_pad = pad_to(p_emb, mask_p, L)
    q_pad, mq_pad = pad_to(q_emb, mask_q, J)
    a_pad, ma_pad = pad_to(a_emb, mask_a, N)

    pqa = jnp.concatenate([p_pad, q_pad, a_pad], axis=0)
    mask_pqa_rows = (jnp.concatenate([mp_pad, mq_pad, ma_pad], axis=0)
                     .astype(jnp.float32).transpose(0, 2, 1))        # [3bs, 1, max_len]
    Epqa = transformer_encoder(params["shared"], pqa, mask_pqa_rows, heads)   # bf16
    Ep = Epqa[:bs, :L]
    Eq = Epqa[bs:2 * bs, :J]
    Ea = Epqa[2 * bs:, :N]

    mp_cols = mask_p.astype(jnp.float32)                              # [bs, L, 1]
    mq_cols = mask_q.astype(jnp.float32)
    ma_cols = mask_a.astype(jnp.float32)
    mp_rows = mp_cols.transpose(0, 2, 1)                              # [bs, 1, L]
    mq_rows = mq_cols.transpose(0, 2, 1)
    ma_rows = ma_cols.transpose(0, 2, 1)

    # Stage 1 of the reference is dead code (its Mp/Mq/Ma are overwritten) -> skipped.
    Gp, Gq, Ga = tri_dual_attention(params["w_pq2"], params["w_pa2"], params["w_qa2"],
                                    Ep, Eq, Ea, mp_rows, mq_rows, ma_rows,
                                    mp_cols, mq_cols, ma_cols)
    Mp = transformer_encoder(params["p_enc2"], Gp, mp_rows, heads, out_dtype=jnp.float32)
    Mq = transformer_encoder(params["q_enc2"], Gq, mq_rows, heads, out_dtype=jnp.float32)
    Ma = transformer_encoder(params["a_enc2"], Ga, ma_rows, heads, out_dtype=jnp.float32)
    return Mp, Mq, Ma


# --------------------------------- driver ----------------------------------

if __name__ == "__main__":
    bs, L, J, N = 2, 16, 8, 8
    d_emb, d_model, d_inner, heads = 32, 32, 64, 4
    pad_idx = 0

    key = jax.random.PRNGKey(0)
    k_p, k_q, k_a, k_params = jax.random.split(key, 4)
    p_emb = jax.random.normal(k_p, (bs, L, d_emb), jnp.float32)
    q_emb = jax.random.normal(k_q, (bs, J, d_emb), jnp.float32)
    a_emb = jax.random.normal(k_a, (bs, N, d_emb), jnp.float32)

    len_p = jnp.array([L, 12])
    len_q = jnp.array([J, 6])
    len_a = jnp.array([N, 5])
    mask_p = (jnp.arange(L)[None, :] < len_p[:, None])[:, :, None]
    mask_q = (jnp.arange(J)[None, :] < len_q[:, None])[:, :, None]
    mask_a = (jnp.arange(N)[None, :] < len_a[:, None])[:, :, None]

    params = init_streader(k_params, d_emb, d_model, d_inner, num_layers=1)

    fwd = jax.jit(functools.partial(streader_forward, heads=heads,
                                    d_model=d_model, pad_idx=pad_idx))
    Mp, Mq, Ma = fwd(params, p_emb, q_emb, a_emb, mask_p, mask_q, mask_a)
    jax.block_until_ready((Mp, Mq, Ma))

    assert Mp.shape == (bs, L, d_model)
    assert Mq.shape == (bs, J, d_model)
    assert Ma.shape == (bs, N, d_model)
    assert jnp.all(jnp.isfinite(Mp)) and jnp.all(jnp.isfinite(Mq)) and jnp.all(jnp.isfinite(Ma))
    print("KERNEL_OK")
</pallas_src>

<mosaic_0001>
module attributes {stable_mosaic.version = 11 : i64} {
  func.func @_encoder_layer_kernel(%arg0: i32, %arg1: memref<1x16x32xf32, #tpu.memory_space<vmem>>, %arg2: memref<1x1x16xf32, #tpu.memory_space<vmem>>, %arg3: memref<32x32xbf16, #tpu.memory_space<vmem>>, %arg4: memref<32x96xbf16, #tpu.memory_space<vmem>>, %arg5: memref<32x32xbf16, #tpu.memory_space<vmem>>, %arg6: memref<32x64xbf16, #tpu.memory_space<vmem>>, %arg7: memref<64x32xbf16, #tpu.memory_space<vmem>>, %arg8: memref<9x96xf32, #tpu.memory_space<vmem>>, %arg9: memref<1x16x32xbf16, #tpu.memory_space<vmem>>) attributes {dimension_semantics = [#tpu.dimension_semantics<parallel>], iteration_bounds = array<i64: 6>, scalar_prefetch = 0 : i64, scratch_operands = 0 : i64, tpu.core_type = #tpu.core_type<tc>, window_params = [{transform_indices = @transform_0, window_bounds = array<i64: 1, 16, 32>}, {transform_indices = @transform_1, window_bounds = array<i64: 1, 1, 16>}, {pipeline_mode = #tpu.pipeline_mode<synchronous>, transform_indices = @transform_2, window_bounds = array<i64: 32, 32>}, {pipeline_mode = #tpu.pipeline_mode<synchronous>, transform_indices = @transform_3, window_bounds = array<i64: 32, 96>}, {pipeline_mode = #tpu.pipeline_mode<synchronous>, transform_indices = @transform_4, window_bounds = array<i64: 32, 32>}, {pipeline_mode = #tpu.pipeline_mode<synchronous>, transform_indices = @transform_5, window_bounds = array<i64: 32, 64>}, {pipeline_mode = #tpu.pipeline_mode<synchronous>, transform_indices = @transform_6, window_bounds = array<i64: 64, 32>}, {pipeline_mode = #tpu.pipeline_mode<synchronous>, transform_indices = @transform_7, window_bounds = array<i64: 9, 96>}, {transform_indices = @transform_8, window_bounds = array<i64: 1, 16, 32>}]} {
    %c0 = arith.constant 0 : index
    %c0_0 = arith.constant 0 : index
    %c0_1 = arith.constant 0 : index
    %0 = vector.load %arg1[%c0, %c0_0, %c0_1] : memref<1x16x32xf32, #tpu.memory_space<vmem>>, vector<1x16x32xf32>
    %1 = vector.shape_cast %0 : vector<1x16x32xf32> to vector<16x32xf32>
    %c0_2 = arith.constant 0 : index
    %c0_3 = arith.constant 0 : index
    %c0_4 = arith.constant 0 : index
    %2 = vector.load %arg2[%c0_2, %c0_3, %c0_4] : memref<1x1x16xf32, #tpu.memory_space<vmem>>, vector<1x1x16xf32>
    %3 = vector.shape_cast %2 : vector<1x1x16xf32> to vector<1x16xf32>
    %c0_5 = arith.constant 0 : index
    %c0_6 = arith.constant 0 : index
    %4 = vector.load %arg8[%c0_5, %c0_6] : memref<9x96xf32, #tpu.memory_space<vmem>>, vector<9x96xf32>
    %5 = vector.extract_strided_slice %4 {offsets = [0, 0], sizes = [1, 96], strides = [1, 1]} : vector<9x96xf32> to vector<1x96xf32>
    %6 = vector.extract_strided_slice %4 {offsets = [1, 0], sizes = [1, 32], strides = [1, 1]} : vector<9x96xf32> to vector<1x32xf32>
    %7 = vector.extract_strided_slice %4 {offsets = [2, 0], sizes = [1, 64], strides = [1, 1]} : vector<9x96xf32> to vector<1x64xf32>
    %8 = vector.extract_strided_slice %4 {offsets = [3, 0], sizes = [1, 32], strides = [1, 1]} : vector<9x96xf32> to vector<1x32xf32>
    %9 = vector.extract_strided_slice %4 {offsets = [4, 0], sizes = [1, 32], strides = [1, 1]} : vector<9x96xf32> to vector<1x32xf32>
    %10 = vector.extract_strided_slice %4 {offsets = [5, 0], sizes = [1, 32], strides = [1, 1]} : vector<9x96xf32> to vector<1x32xf32>
    %11 = vector.extract_strided_slice %4 {offsets = [6, 0], sizes = [1, 32], strides = [1, 1]} : vector<9x96xf32> to vector<1x32xf32>
    %12 = vector.extract_strided_slice %4 {offsets = [7, 0], sizes = [1, 32], strides = [1, 1]} : vector<9x96xf32> to vector<1x32xf32>
    %c0_7 = arith.constant 0 : index
    %c0_8 = arith.constant 0 : index
    %13 = vector.load %arg3[%c0_7, %c0_8] : memref<32x32xbf16, #tpu.memory_space<vmem>>, vector<32x32xbf16>
    %14 = arith.truncf %1 : vector<16x32xf32> to vector<16x32xbf16>
    %cst = arith.constant dense<0.000000e+00> : vector<16x32xf32>
    %15 = tpu.matmul %14, %13, %cst {dimension_numbers = #tpu.dot_dimension_numbers<[1], [0], [0], [1], [0, 0, 1, 1], [], []>} : vector<16x32xbf16>, vector<32x32xbf16>, vector<16x32xf32> -> vector<16x32xf32>
    %16 = vector.extract_strided_slice %4 {offsets = [8, 0], sizes = [1, 32], strides = [1, 1]} : vector<9x96xf32> to vector<1x32xf32>
    %17 = vector.broadcast %16 : vector<1x32xf32> to vector<16x32xf32>
    %18 = arith.addf %15, %17 : vector<16x32xf32>
    %c0_9 = arith.constant 0 : index
    %c0_10 = arith.constant 0 : index
    %19 = vector.load %arg4[%c0_9, %c0_10] : memref<32x96xbf16, #tpu.memory_space<vmem>>, vector<32x96xbf16>
    %20 = arith.truncf %18 : vector<16x32xf32> to vector<16x32xbf16>
    %cst_11 = arith.constant dense<0.000000e+00> : vector<16x96xf32>
    %21 = tpu.matmul %20, %19, %cst_11 {dimension_numbers = #tpu.dot_dimension_numbers<[1], [0], [0], [1], [0, 0, 1, 1], [], []>} : vector<16x32xbf16>, vector<32x96xbf16>, vector<16x96xf32> -> vector<16x96xf32>
    %22 = vector.broadcast %5 : vector<1x96xf32> to vector<16x96xf32>
    %23 = arith.addf %21, %22 : vector<16x96xf32>
    %c0_12 = arith.constant 0 : index
    %c0_13 = arith.constant 0 : index
    %24 = vector.load %arg5[%c0_12, %c0_13] : memref<32x32xbf16, #tpu.memory_space<vmem>>, vector<32x32xbf16>
    %25 = vector.extract_strided_slice %23 {offsets = [0, 0], sizes = [16, 8], strides = [1, 1]} : vector<16x96xf32> to vector<16x8xf32>
    %26 = vector.extract_strided_slice %23 {offsets = [0, 32], sizes = [16, 8], strides = [1, 1]} : vector<16x96xf32> to vector<16x8xf32>
    %27 = vector.extract_strided_slice %23 {offsets = [0, 64], sizes = [16, 8], strides = [1, 1]} : vector<16x96xf32> to vector<16x8xf32>
    %28 = arith.truncf %25 : vector<16x8xf32> to vector<16x8xbf16>
    %29 = arith.truncf %26 : vector<16x8xf32> to vector<16x8xbf16>
    %cst_14 = arith.constant dense<0.000000e+00> : vector<16x16xf32>
    %30 = tpu.matmul %28, %29, %cst_14 {dimension_numbers = #tpu.dot_dimension_numbers<[1], [1], [0], [0], [0, 0, 1, 0], [], []>} : vector<16x8xbf16>, vector<16x8xbf16>, vector<16x16xf32> -> vector<16x16xf32>
    %cst_15 = arith.constant 0.353553385 : f32
    %31 = vector.broadcast %cst_15 : f32 to vector<16x16xf32>
    %32 = arith.mulf %30, %31 : vector<16x16xf32>
    %cst_16 = arith.constant 0.000000e+00 : f32
    %33 = vector.broadcast %cst_16 : f32 to vector<1x16xf32>
    %34 = arith.cmpf ogt, %3, %33 : vector<1x16xf32>
    %cst_17 = arith.constant -1.000000e+30 : f32
    %35 = vector.shape_cast %34 : vector<1x16xi1> to vector<1x16xi1>
    %36 = vector.broadcast %35 : vector<1x16xi1> to vector<16x16xi1>
    %37 = vector.broadcast %cst_17 : f32 to vector<16x16xf32>
    %38 = arith.select %36, %32, %37 : vector<16x16xi1>, vector<16x16xf32>
    %cst_18 = arith.constant dense<0xFF800000> : vector<16xf32>
    %39 = vector.multi_reduction <maximumf>, %38, %cst_18 [1] : vector<16x16xf32> to vector<16xf32>
    %40 = vector.shape_cast %39 : vector<16xf32> to vector<16x1xf32>
    %41 = vector.broadcast %40 : vector<16x1xf32> to vector<16x16xf32>
    %42 = arith.subf %38, %41 : vector<16x16xf32>
    %43 = math.exp %42 : vector<16x16xf32>
    %cst_19 = arith.constant dense<0.000000e+00> : vector<16xf32>
    %44 = vector.multi_reduction <add>, %43, %cst_19 [1] : vector<16x16xf32> to vector<16xf32>
    %45 = vector.shape_cast %44 : vector<16xf32> to vector<16x1xf32>
    %46 = tpu.reciprocal %45 {approx = true} : vector<16x1xf32> -> vector<16x1xf32>
    %47 = vector.broadcast %46 : vector<16x1xf32> to vector<16x16xf32>
    %48 = arith.mulf %43, %47 : vector<16x16xf32>
    %49 = arith.truncf %48 : vector<16x16xf32> to vector<16x16xbf16>
    %50 = arith.truncf %27 : vector<16x8xf32> to vector<16x8xbf16>
    %cst_20 = arith.constant dense<0.000000e+00> : vector<16x8xf32>
    %51 = tpu.matmul %49, %50, %cst_20 {dimension_numbers = #tpu.dot_dimension_numbers<[1], [0], [0], [1], [0, 0, 1, 1], [], []>} : vector<16x16xbf16>, vector<16x8xbf16>, vector<16x8xf32> -> vector<16x8xf32>
    %52 = vector.extract_strided_slice %24 {offsets = [0, 0], sizes = [8, 32], strides = [1, 1]} : vector<32x32xbf16> to vector<8x32xbf16>
    %53 = arith.truncf %51 : vector<16x8xf32> to vector<16x8xbf16>
    %cst_21 = arith.constant dense<0.000000e+00> : vector<16x32xf32>
    %54 = tpu.matmul %53, %52, %cst_21 {dimension_numbers = #tpu.dot_dimension_numbers<[1], [0], [0], [1], [0, 0, 1, 1], [], []>} : vector<16x8xbf16>, vector<8x32xbf16>, vector<16x32xf32> -> vector<16x32xf32>
    %55 = vector.broadcast %6 : vector<1x32xf32> to vector<16x32xf32>
    %56 = arith.addf %55, %54 : vector<16x32xf32>
    %57 = vector.extract_strided_slice %23 {offsets = [0, 8], sizes = [16, 8], strides = [1, 1]} : vector<16x96xf32> to vector<16x8xf32>
    %58 = vector.extract_strided_slice %23 {offsets = [0, 40], sizes = [16, 8], strides = [1, 1]} : vector<16x96xf32> to vector<16x8xf32>
    %59 = vector.extract_strided_slice %23 {offsets = [0, 72], sizes = [16, 8], strides = [1, 1]} : vector<16x96xf32> to vector<16x8xf32>
    %60 = arith.truncf %57 : vector<16x8xf32> to vector<16x8xbf16>
    %61 = arith.truncf %58 : vector<16x8xf32> to vector<16x8xbf16>
    %cst_22 = arith.constant dense<0.000000e+00> : vector<16x16xf32>
    %62 = tpu.matmul %60, %61, %cst_22 {dimension_numbers = #tpu.dot_dimension_numbers<[1], [1], [0], [0], [0, 0, 1, 0], [], []>} : vector<16x8xbf16>, vector<16x8xbf16>, vector<16x16xf32> -> vector<16x16xf32>
    %cst_23 = arith.constant 0.353553385 : f32
    %63 = vector.broadcast %cst_23 : f32 to vector<16x16xf32>
    %64 = arith.mulf %62, %63 : vector<16x16xf32>
    %cst_24 = arith.constant 0.000000e+00 : f32
    %65 = vector.broadcast %cst_24 : f32 to vector<1x16xf32>
    %66 = arith.cmpf ogt, %3, %65 : vector<1x16xf32>
    %cst_25 = arith.constant -1.000000e+30 : f32
    %67 = vector.shape_cast %66 : vector<1x16xi1> to vector<1x16xi1>
    %68 = vector.broadcast %67 : vector<1x16xi1> to vector<16x16xi1>
    %69 = vector.broadcast %cst_25 : f32 to vector<16x16xf32>
    %70 = arith.select %68, %64, %69 : vector<16x16xi1>, vector<16x16xf32>
    %cst_26 = arith.constant dense<0xFF800000> : vector<16xf32>
    %71 = vector.multi_reduction <maximumf>, %70, %cst_26 [1] : vector<16x16xf32> to vector<16xf32>
    %72 = vector.shape_cast %71 : vector<16xf32> to vector<16x1xf32>
    %73 = vector.broadcast %72 : vector<16x1xf32> to vector<16x16xf32>
    %74 = arith.subf %70, %73 : vector<16x16xf32>
    %75 = math.exp %74 : vector<16x16xf32>
    %cst_27 = arith.constant dense<0.000000e+00> : vector<16xf32>
    %76 = vector.multi_reduction <add>, %75, %cst_27 [1] : vector<16x16xf32> to vector<16xf32>
    %77 = vector.shape_cast %76 : vector<16xf32> to vector<16x1xf32>
    %78 = tpu.reciprocal %77 {approx = true} : vector<16x1xf32> -> vector<16x1xf32>
    %79 = vector.broadcast %78 : vector<16x1xf32> to vector<16x16xf32>
    %80 = arith.mulf %75, %79 : vector<16x16xf32>
    %81 = arith.truncf %80 : vector<16x16xf32> to vector<16x16xbf16>
    %82 = arith.truncf %59 : vector<16x8xf32> to vector<16x8xbf16>
    %cst_28 = arith.constant dense<0.000000e+00> : vector<16x8xf32>
    %83 = tpu.matmul %81, %82, %cst_28 {dimension_numbers = #tpu.dot_dimension_numbers<[1], [0], [0], [1], [0, 0, 1, 1], [], []>} : vector<16x16xbf16>, vector<16x8xbf16>, vector<16x8xf32> -> vector<16x8xf32>
    %84 = vector.extract_strided_slice %24 {offsets = [8, 0], sizes = [8, 32], strides = [1, 1]} : vector<32x32xbf16> to vector<8x32xbf16>
    %85 = arith.truncf %83 : vector<16x8xf32> to vector<16x8xbf16>
    %cst_29 = arith.constant dense<0.000000e+00> : vector<16x32xf32>
    %86 = tpu.matmul %85, %84, %cst_29 {dimension_numbers = #tpu.dot_dimension_numbers<[1], [0], [0], [1], [0, 0, 1, 1], [], []>} : vector<16x8xbf16>, vector<8x32xbf16>, vector<16x32xf32> -> vector<16x32xf32>
    %87 = arith.addf %56, %86 : vector<16x32xf32>
    %88 = vector.extract_strided_slice %23 {offsets = [0, 16], sizes = [16, 8], strides = [1, 1]} : vector<16x96xf32> to vector<16x8xf32>
    %89 = vector.extract_strided_slice %23 {offsets = [0, 48], sizes = [16, 8], strides = [1, 1]} : vector<16x96xf32> to vector<16x8xf32>
    %90 = vector.extract_strided_slice %23 {offsets = [0, 80], sizes = [16, 8], strides = [1, 1]} : vector<16x96xf32> to vector<16x8xf32>
    %91 = arith.truncf %88 : vector<16x8xf32> to vector<16x8xbf16>
    %92 = arith.truncf %89 : vector<16x8xf32> to vector<16x8xbf16>
    %cst_30 = arith.constant dense<0.000000e+00> : vector<16x16xf32>
    %93 = tpu.matmul %91, %92, %cst_30 {dimension_numbers = #tpu.dot_dimension_numbers<[1], [1], [0], [0], [0, 0, 1, 0], [], []>} : vector<16x8xbf16>, vector<16x8xbf16>, vector<16x16xf32> -> vector<16x16xf32>
    %cst_31 = arith.constant 0.353553385 : f32
    %94 = vector.broadcast %cst_31 : f32 to vector<16x16xf32>
    %95 = arith.mulf %93, %94 : vector<16x16xf32>
    %cst_32 = arith.constant 0.000000e+00 : f32
    %96 = vector.broadcast %cst_32 : f32 to vector<1x16xf32>
    %97 = arith.cmpf ogt, %3, %96 : vector<1x16xf32>
    %cst_33 = arith.constant -1.000000e+30 : f32
    %98 = vector.shape_cast %97 : vector<1x16xi1> to vector<1x16xi1>
    %99 = vector.broadcast %98 : vector<1x16xi1> to vector<16x16xi1>
    %100 = vector.broadcast %cst_33 : f32 to vector<16x16xf32>
    %101 = arith.select %99, %95, %100 : vector<16x16xi1>, vector<16x16xf32>
    %cst_34 = arith.constant dense<0xFF800000> : vector<16xf32>
    %102 = vector.multi_reduction <maximumf>, %101, %cst_34 [1] : vector<16x16xf32> to vector<16xf32>
    %103 = vector.shape_cast %102 : vector<16xf32> to vector<16x1xf32>
    %104 = vector.broadcast %103 : vector<16x1xf32> to vector<16x16xf32>
    %105 = arith.subf %101, %104 : vector<16x16xf32>
    %106 = math.exp %105 : vector<16x16xf32>
    %cst_35 = arith.constant dense<0.000000e+00> : vector<16xf32>
    %107 = vector.multi_reduction <add>, %106, %cst_35 [1] : vector<16x16xf32> to vector<16xf32>
    %108 = vector.shape_cast %107 : vector<16xf32> to vector<16x1xf32>
    %109 = tpu.reciprocal %108 {approx = true} : vector<16x1xf32> -> vector<16x1xf32>
    %110 = vector.broadcast %109 : vector<16x1xf32> to vector<16x16xf32>
    %111 = arith.mulf %106, %110 : vector<16x16xf32>
    %112 = arith.truncf %111 : vector<16x16xf32> to vector<16x16xbf16>
    %113 = arith.truncf %90 : vector<16x8xf32> to vector<16x8xbf16>
    %cst_36 = arith.constant dense<0.000000e+00> : vector<16x8xf32>
    %114 = tpu.matmul %112, %113, %cst_36 {dimension_numbers = #tpu.dot_dimension_numbers<[1], [0], [0], [1], [0, 0, 1, 1], [], []>} : vector<16x16xbf16>, vector<16x8xbf16>, vector<16x8xf32> -> vector<16x8xf32>
    %115 = vector.extract_strided_slice %24 {offsets = [16, 0], sizes = [8, 32], strides = [1, 1]} : vector<32x32xbf16> to vector<8x32xbf16>
    %116 = arith.truncf %114 : vector<16x8xf32> to vector<16x8xbf16>
    %cst_37 = arith.constant dense<0.000000e+00> : vector<16x32xf32>
    %117 = tpu.matmul %116, %115, %cst_37 {dimension_numbers = #tpu.dot_dimension_numbers<[1], [0], [0], [1], [0, 0, 1, 1], [], []>} : vector<16x8xbf16>, vector<8x32xbf16>, vector<16x32xf32> -> vector<16x32xf32>
    %118 = arith.addf %87, %117 : vector<16x32xf32>
    %119 = vector.extract_strided_slice %23 {offsets = [0, 24], sizes = [16, 8], strides = [1, 1]} : vector<16x96xf32> to vector<16x8xf32>
    %120 = vector.extract_strided_slice %23 {offsets = [0, 56], sizes = [16, 8], strides = [1, 1]} : vector<16x96xf32> to vector<16x8xf32>
    %121 = vector.extract_strided_slice %23 {offsets = [0, 88], sizes = [16, 8], strides = [1, 1]} : vector<16x96xf32> to vector<16x8xf32>
    %122 = arith.truncf %119 : vector<16x8xf32> to vector<16x8xbf16>
    %123 = arith.truncf %120 : vector<16x8xf32> to vector<16x8xbf16>
    %cst_38 = arith.constant dense<0.000000e+00> : vector<16x16xf32>
    %124 = tpu.matmul %122, %123, %cst_38 {dimension_numbers = #tpu.dot_dimension_numbers<[1], [1], [0], [0], [0, 0, 1, 0], [], []>} : vector<16x8xbf16>, vector<16x8xbf16>, vector<16x16xf32> -> vector<16x16xf32>
    %cst_39 = arith.constant 0.353553385 : f32
    %125 = vector.broadcast %cst_39 : f32 to vector<16x16xf32>
    %126 = arith.mulf %124, %125 : vector<16x16xf32>
    %cst_40 = arith.constant 0.000000e+00 : f32
    %127 = vector.broadcast %cst_40 : f32 to vector<1x16xf32>
    %128 = arith.cmpf ogt, %3, %127 : vector<1x16xf32>
    %cst_41 = arith.constant -1.000000e+30 : f32
    %129 = vector.shape_cast %128 : vector<1x16xi1> to vector<1x16xi1>
    %130 = vector.broadcast %129 : vector<1x16xi1> to vector<16x16xi1>
    %131 = vector.broadcast %cst_41 : f32 to vector<16x16xf32>
    %132 = arith.select %130, %126, %131 : vector<16x16xi1>, vector<16x16xf32>
    %cst_42 = arith.constant dense<0xFF800000> : vector<16xf32>
    %133 = vector.multi_reduction <maximumf>, %132, %cst_42 [1] : vector<16x16xf32> to vector<16xf32>
    %134 = vector.shape_cast %133 : vector<16xf32> to vector<16x1xf32>
    %135 = vector.broadcast %134 : vector<16x1xf32> to vector<16x16xf32>
    %136 = arith.subf %132, %135 : vector<16x16xf32>
    %137 = math.exp %136 : vector<16x16xf32>
    %cst_43 = arith.constant dense<0.000000e+00> : vector<16xf32>
    %138 = vector.multi_reduction <add>, %137, %cst_43 [1] : vector<16x16xf32> to vector<16xf32>
    %139 = vector.shape_cast %138 : vector<16xf32> to vector<16x1xf32>
    %140 = tpu.reciprocal %139 {approx = true} : vector<16x1xf32> -> vector<16x1xf32>
    %141 = vector.broadcast %140 : vector<16x1xf32> to vector<16x16xf32>
    %142 = arith.mulf %137, %141 : vector<16x16xf32>
    %143 = arith.truncf %142 : vector<16x16xf32> to vector<16x16xbf16>
    %144 = arith.truncf %121 : vector<16x8xf32> to vector<16x8xbf16>
    %cst_44 = arith.constant dense<0.000000e+00> : vector<16x8xf32>
    %145 = tpu.matmul %143, %144, %cst_44 {dimension_numbers = #tpu.dot_dimension_numbers<[1], [0], [0], [1], [0, 0, 1, 1], [], []>} : vector<16x16xbf16>, vector<16x8xbf16>, vector<16x8xf32> -> vector<16x8xf32>
    %146 = vector.extract_strided_slice %24 {offsets = [24, 0], sizes = [8, 32], strides = [1, 1]} : vector<32x32xbf16> to vector<8x32xbf16>
    %147 = arith.truncf %145 : vector<16x8xf32> to vector<16x8xbf16>
    %cst_45 = arith.constant dense<0.000000e+00> : vector<16x32xf32>
    %148 = tpu.matmul %147, %146, %cst_45 {dimension_numbers = #tpu.dot_dimension_numbers<[1], [0], [0], [1], [0, 0, 1, 1], [], []>} : vector<16x8xbf16>, vector<8x32xbf16>, vector<16x32xf32> -> vector<16x32xf32>
    %149 = arith.addf %118, %148 : vector<16x32xf32>
    %150 = arith.addf %18, %149 : vector<16x32xf32>
    %cst_46 = arith.constant dense<0.000000e+00> : vector<16xf32>
    %151 = vector.multi_reduction <add>, %150, %cst_46 [1] : vector<16x32xf32> to vector<16xf32>
    %152 = vector.shape_cast %151 : vector<16xf32> to vector<16x1xf32>
    %cst_47 = arith.constant 3.200000e+01 : f32
    %153 = vector.broadcast %cst_47 : f32 to vector<16x1xf32>
    %154 = arith.divf %152, %153 : vector<16x1xf32>
    %155 = vector.broadcast %154 : vector<16x1xf32> to vector<16x32xf32>
    %156 = arith.subf %150, %155 : vector<16x32xf32>
    %157 = arith.mulf %156, %156 : vector<16x32xf32>
    %cst_48 = arith.constant dense<0.000000e+00> : vector<16xf32>
    %158 = vector.multi_reduction <add>, %157, %cst_48 [1] : vector<16x32xf32> to vector<16xf32>
    %159 = vector.shape_cast %158 : vector<16xf32> to vector<16x1xf32>
    %cst_49 = arith.constant 3.200000e+01 : f32
    %160 = vector.broadcast %cst_49 : f32 to vector<16x1xf32>
    %161 = arith.divf %159, %160 : vector<16x1xf32>
    %162 = vector.broadcast %154 : vector<16x1xf32> to vector<16x32xf32>
    %163 = arith.subf %150, %162 : vector<16x32xf32>
    %cst_50 = arith.constant 9.99999974E-6 : f32
    %164 = vector.broadcast %cst_50 : f32 to vector<16x1xf32>
    %165 = arith.addf %161, %164 : vector<16x1xf32>
    %166 = math.rsqrt %165 : vector<16x1xf32>
    %167 = vector.broadcast %166 : vector<16x1xf32> to vector<16x32xf32>
    %168 = arith.mulf %163, %167 : vector<16x32xf32>
    %169 = vector.broadcast %9 : vector<1x32xf32> to vector<16x32xf32>
    %170 = arith.mulf %168, %169 : vector<16x32xf32>
    %171 = vector.broadcast %10 : vector<1x32xf32> to vector<16x32xf32>
    %172 = arith.addf %170, %171 : vector<16x32xf32>
    %c0_51 = arith.constant 0 : index
    %c0_52 = arith.constant 0 : index
    %173 = vector.load %arg6[%c0_51, %c0_52] : memref<32x64xbf16, #tpu.memory_space<vmem>>, vector<32x64xbf16>
    %174 = arith.truncf %172 : vector<16x32xf32> to vector<16x32xbf16>
    %cst_53 = arith.constant dense<0.000000e+00> : vector<16x64xf32>
    %175 = tpu.matmul %174, %173, %cst_53 {dimension_numbers = #tpu.dot_dimension_numbers<[1], [0], [0], [1], [0, 0, 1, 1], [], []>} : vector<16x32xbf16>, vector<32x64xbf16>, vector<16x64xf32> -> vector<16x64xf32>
    %176 = vector.broadcast %7 : vector<1x64xf32> to vector<16x64xf32>
    %177 = arith.addf %175, %176 : vector<16x64xf32>
    %cst_54 = arith.constant 0.000000e+00 : f32
    %178 = vector.broadcast %cst_54 : f32 to vector<16x64xf32>
    %179 = arith.maximumf %177, %178 : vector<16x64xf32>
    %c0_55 = arith.constant 0 : index
    %c0_56 = arith.constant 0 : index
    %180 = vector.load %arg7[%c0_55, %c0_56] : memref<64x32xbf16, #tpu.memory_space<vmem>>, vector<64x32xbf16>
    %181 = arith.truncf %179 : vector<16x64xf32> to vector<16x64xbf16>
    %cst_57 = arith.constant dense<0.000000e+00> : vector<16x32xf32>
    %182 = tpu.matmul %181, %180, %cst_57 {dimension_numbers = #tpu.dot_dimension_numbers<[1], [0], [0], [1], [0, 0, 1, 1], [], []>} : vector<16x64xbf16>, vector<64x32xbf16>, vector<16x32xf32> -> vector<16x32xf32>
    %183 = vector.broadcast %8 : vector<1x32xf32> to vector<16x32xf32>
    %184 = arith.addf %182, %183 : vector<16x32xf32>
    %185 = arith.addf %172, %184 : vector<16x32xf32>
    %cst_58 = arith.constant dense<0.000000e+00> : vector<16xf32>
    %186 = vector.multi_reduction <add>, %185, %cst_58 [1] : vector<16x32xf32> to vector<16xf32>
    %187 = vector.shape_cast %186 : vector<16xf32> to vector<16x1xf32>
    %cst_59 = arith.constant 3.200000e+01 : f32
    %188 = vector.broadcast %cst_59 : f32 to vector<16x1xf32>
    %189 = arith.divf %187, %188 : vector<16x1xf32>
    %190 = vector.broadcast %189 : vector<16x1xf32> to vector<16x32xf32>
    %191 = arith.subf %185, %190 : vector<16x32xf32>
    %192 = arith.mulf %191, %191 : vector<16x32xf32>
    %cst_60 = arith.constant dense<0.000000e+00> : vector<16xf32>
    %193 = vector.multi_reduction <add>, %192, %cst_60 [1] : vector<16x32xf32> to vector<16xf32>
    %194 = vector.shape_cast %193 : vector<16xf32> to vector<16x1xf32>
    %cst_61 = arith.constant 3.200000e+01 : f32
    %195 = vector.broadcast %cst_61 : f32 to vector<16x1xf32>
    %196 = arith.divf %194, %195 : vector<16x1xf32>
    %197 = vector.broadcast %189 : vector<16x1xf32> to vector<16x32xf32>
    %198 = arith.subf %185, %197 : vector<16x32xf32>
    %cst_62 = arith.constant 9.99999974E-6 : f32
    %199 = vector.broadcast %cst_62 : f32 to vector<16x1xf32>
    %200 = arith.addf %196, %199 : vector<16x1xf32>
    %201 = math.rsqrt %200 : vector<16x1xf32>
    %202 = vector.broadcast %201 : vector<16x1xf32> to vector<16x32xf32>
    %203 = arith.mulf %198, %202 : vector<16x32xf32>
    %204 = vector.broadcast %11 : vector<1x32xf32> to vector<16x32xf32>
    %205 = arith.mulf %203, %204 : vector<16x32xf32>
    %206 = vector.broadcast %12 : vector<1x32xf32> to vector<16x32xf32>
    %207 = arith.addf %205, %206 : vector<16x32xf32>
    %208 = arith.truncf %207 : vector<16x32xf32> to vector<16x32xbf16>
    %c0_63 = arith.constant 0 : index
    %c0_64 = arith.constant 0 : index
    %c0_65 = arith.constant 0 : index
    %209 = vector.load %arg9[%c0_63, %c0_64, %c0_65] : memref<1x16x32xbf16, #tpu.memory_space<vmem>>, vector<1x16x32xbf16>
    %210 = vector.shape_cast %209 : vector<1x16x32xbf16> to vector<16x32xbf16>
    %211 = vector.shape_cast %208 : vector<16x32xbf16> to vector<1x16x32xbf16>
    tpu.vector_store %arg9[%c0_63, %c0_64, %c0_65], %211 {strides = array<i32>} : memref<1x16x32xbf16, #tpu.memory_space<vmem>>, vector<1x16x32xbf16>,
    return
  }
  func.func @transform_0(%arg0: i32) -> (i32, i32, i32) {
    %c0_i32 = arith.constant 0 : i32
    %c0_i32_0 = arith.constant 0 : i32
    %c0_i32_1 = arith.constant 0 : i32
    return %arg0, %c0_i32, %c0_i32_0 : i32, i32, i32
  }
  func.func @transform_1(%arg0: i32) -> (i32, i32, i32) {
    %c0_i32 = arith.constant 0 : i32
    %c0_i32_0 = arith.constant 0 : i32
    %c0_i32_1 = arith.constant 0 : i32
    return %arg0, %c0_i32, %c0_i32_0 : i32, i32, i32
  }
  func.func @transform_2(%arg0: i32) -> (i32, i32) {
    %c0_i32 = arith.constant 0 : i32
    %c0_i32_0 = arith.constant 0 : i32
    %c0_i32_1 = arith.constant 0 : i32
    return %c0_i32, %c0_i32_0 : i32, i32
  }
  func.func @transform_3(%arg0: i32) -> (i32, i32) {
    %c0_i32 = arith.constant 0 : i32
    %c0_i32_0 = arith.constant 0 : i32
    %c0_i32_1 = arith.constant 0 : i32
    return %c0_i32, %c0_i32_0 : i32, i32
  }
  func.func @transform_4(%arg0: i32) -> (i32, i32) {
    %c0_i32 = arith.constant 0 : i32
    %c0_i32_0 = arith.constant 0 : i32
    %c0_i32_1 = arith.constant 0 : i32
    return %c0_i32, %c0_i32_0 : i32, i32
  }
  func.func @transform_5(%arg0: i32) -> (i32, i32) {
    %c0_i32 = arith.constant 0 : i32
    %c0_i32_0 = arith.constant 0 : i32
    %c0_i32_1 = arith.constant 0 : i32
    return %c0_i32, %c0_i32_0 : i32, i32
  }
  func.func @transform_6(%arg0: i32) -> (i32, i32) {
    %c0_i32 = arith.constant 0 : i32
    %c0_i32_0 = arith.constant 0 : i32
    %c0_i32_1 = arith.constant 0 : i32
    return %c0_i32, %c0_i32_0 : i32, i32
  }
  func.func @transform_7(%arg0: i32) -> (i32, i32) {
    %c0_i32 = arith.constant 0 : i32
    %c0_i32_0 = arith.constant 0 : i32
    %c0_i32_1 = arith.constant 0 : i32
    return %c0_i32, %c0_i32_0 : i32, i32
  }
  func.func @transform_8(%arg0: i32) -> (i32, i32, i32) {
    %c0_i32 = arith.constant 0 : i32
    %c0_i32_0 = arith.constant 0 : i32
    %c0_i32_1 = arith.constant 0 : i32
    return %arg0, %c0_i32, %c0_i32_0 : i32, i32, i32
  }
}

module attributes {stable_mosaic.version = 11 : i64} {
  func.func @_encoder_layer_kernel(%arg0: i32, %arg1: memref<1x16x288xbf16, #tpu.memory_space<vmem>>, %arg2: memref<1x1x16xf32, #tpu.memory_space<vmem>>, %arg3: memref<288x32xbf16, #tpu.memory_space<vmem>>, %arg4: memref<32x96xbf16, #tpu.memory_space<vmem>>, %arg5: memref<32x32xbf16, #tpu.memory_space<vmem>>, %arg6: memref<32x64xbf16, #tpu.memory_space<vmem>>, %arg7: memref<64x32xbf16, #tpu.memory_space<vmem>>, %arg8: memref<9x96xf32, #tpu.memory_space<vmem>>, %arg9: memref<1x16x32xf32, #tpu.memory_space<vmem>>) attributes {dimension_semantics = [#tpu.dimension_semantics<parallel>], iteration_bounds = array<i64: 2>, scalar_prefetch = 0 : i64, scratch_operands = 0 : i64, tpu.core_type = #tpu.core_type<tc>, window_params = [{transform_indices = @transform_0, window_bounds = array<i64: 1, 16, 288>}, {transform_indices = @transform_1, window_bounds = array<i64: 1, 1, 16>}, {pipeline_mode = #tpu.pipeline_mode<synchronous>, transform_indices = @transform_2, window_bounds = array<i64: 288, 32>}, {pipeline_mode = #tpu.pipeline_mode<synchronous>, transform_indices = @transform_3, window_bounds = array<i64: 32, 96>}, {pipeline_mode = #tpu.pipeline_mode<synchronous>, transform_indices = @transform_4, window_bounds = array<i64: 32, 32>}, {pipeline_mode = #tpu.pipeline_mode<synchronous>, transform_indices = @transform_5, window_bounds = array<i64: 32, 64>}, {pipeline_mode = #tpu.pipeline_mode<synchronous>, transform_indices = @transform_6, window_bounds = array<i64: 64, 32>}, {pipeline_mode = #tpu.pipeline_mode<synchronous>, transform_indices = @transform_7, window_bounds = array<i64: 9, 96>}, {transform_indices = @transform_8, window_bounds = array<i64: 1, 16, 32>}]} {
    %c0 = arith.constant 0 : index
    %c0_0 = arith.constant 0 : index
    %c0_1 = arith.constant 0 : index
    %0 = vector.load %arg1[%c0, %c0_0, %c0_1] : memref<1x16x288xbf16, #tpu.memory_space<vmem>>, vector<1x16x288xbf16>
    %1 = vector.shape_cast %0 : vector<1x16x288xbf16> to vector<16x288xbf16>
    %c0_2 = arith.constant 0 : index
    %c0_3 = arith.constant 0 : index
    %c0_4 = arith.constant 0 : index
    %2 = vector.load %arg2[%c0_2, %c0_3, %c0_4] : memref<1x1x16xf32, #tpu.memory_space<vmem>>, vector<1x1x16xf32>
    %3 = vector.shape_cast %2 : vector<1x1x16xf32> to vector<1x16xf32>
    %c0_5 = arith.constant 0 : index
    %c0_6 = arith.constant 0 : index
    %4 = vector.load %arg8[%c0_5, %c0_6] : memref<9x96xf32, #tpu.memory_space<vmem>>, vector<9x96xf32>
    %5 = vector.extract_strided_slice %4 {offsets = [0, 0], sizes = [1, 96], strides = [1, 1]} : vector<9x96xf32> to vector<1x96xf32>
    %6 = vector.extract_strided_slice %4 {offsets = [1, 0], sizes = [1, 32], strides = [1, 1]} : vector<9x96xf32> to vector<1x32xf32>
    %7 = vector.extract_strided_slice %4 {offsets = [2, 0], sizes = [1, 64], strides = [1, 1]} : vector<9x96xf32> to vector<1x64xf32>
    %8 = vector.extract_strided_slice %4 {offsets = [3, 0], sizes = [1, 32], strides = [1, 1]} : vector<9x96xf32> to vector<1x32xf32>
    %9 = vector.extract_strided_slice %4 {offsets = [4, 0], sizes = [1, 32], strides = [1, 1]} : vector<9x96xf32> to vector<1x32xf32>
    %10 = vector.extract_strided_slice %4 {offsets = [5, 0], sizes = [1, 32], strides = [1, 1]} : vector<9x96xf32> to vector<1x32xf32>
    %11 = vector.extract_strided_slice %4 {offsets = [6, 0], sizes = [1, 32], strides = [1, 1]} : vector<9x96xf32> to vector<1x32xf32>
    %12 = vector.extract_strided_slice %4 {offsets = [7, 0], sizes = [1, 32], strides = [1, 1]} : vector<9x96xf32> to vector<1x32xf32>
    %c0_7 = arith.constant 0 : index
    %c0_8 = arith.constant 0 : index
    %13 = vector.load %arg3[%c0_7, %c0_8] : memref<288x32xbf16, #tpu.memory_space<vmem>>, vector<288x32xbf16>
    %cst = arith.constant dense<0.000000e+00> : vector<16x32xf32>
    %14 = tpu.matmul %1, %13, %cst {dimension_numbers = #tpu.dot_dimension_numbers<[1], [0], [0], [1], [0, 0, 1, 1], [], []>} : vector<16x288xbf16>, vector<288x32xbf16>, vector<16x32xf32> -> vector<16x32xf32>
    %15 = vector.extract_strided_slice %4 {offsets = [8, 0], sizes = [1, 32], strides = [1, 1]} : vector<9x96xf32> to vector<1x32xf32>
    %16 = vector.broadcast %15 : vector<1x32xf32> to vector<16x32xf32>
    %17 = arith.addf %14, %16 : vector<16x32xf32>
    %c0_9 = arith.constant 0 : index
    %c0_10 = arith.constant 0 : index
    %18 = vector.load %arg4[%c0_9, %c0_10] : memref<32x96xbf16, #tpu.memory_space<vmem>>, vector<32x96xbf16>
    %19 = arith.truncf %17 : vector<16x32xf32> to vector<16x32xbf16>
    %cst_11 = arith.constant dense<0.000000e+00> : vector<16x96xf32>
    %20 = tpu.matmul %19, %18, %cst_11 {dimension_numbers = #tpu.dot_dimension_numbers<[1], [0], [0], [1], [0, 0, 1, 1], [], []>} : vector<16x32xbf16>, vector<32x96xbf16>, vector<16x96xf32> -> vector<16x96xf32>
    %21 = vector.broadcast %5 : vector<1x96xf32> to vector<16x96xf32>
    %22 = arith.addf %20, %21 : vector<16x96xf32>
    %c0_12 = arith.constant 0 : index
    %c0_13 = arith.constant 0 : index
    %23 = vector.load %arg5[%c0_12, %c0_13] : memref<32x32xbf16, #tpu.memory_space<vmem>>, vector<32x32xbf16>
    %24 = vector.extract_strided_slice %22 {offsets = [0, 0], sizes = [16, 8], strides = [1, 1]} : vector<16x96xf32> to vector<16x8xf32>
    %25 = vector.extract_strided_slice %22 {offsets = [0, 32], sizes = [16, 8], strides = [1, 1]} : vector<16x96xf32> to vector<16x8xf32>
    %26 = vector.extract_strided_slice %22 {offsets = [0, 64], sizes = [16, 8], strides = [1, 1]} : vector<16x96xf32> to vector<16x8xf32>
    %27 = arith.truncf %24 : vector<16x8xf32> to vector<16x8xbf16>
    %28 = arith.truncf %25 : vector<16x8xf32> to vector<16x8xbf16>
    %cst_14 = arith.constant dense<0.000000e+00> : vector<16x16xf32>
    %29 = tpu.matmul %27, %28, %cst_14 {dimension_numbers = #tpu.dot_dimension_numbers<[1], [1], [0], [0], [0, 0, 1, 0], [], []>} : vector<16x8xbf16>, vector<16x8xbf16>, vector<16x16xf32> -> vector<16x16xf32>
    %cst_15 = arith.constant 0.353553385 : f32
    %30 = vector.broadcast %cst_15 : f32 to vector<16x16xf32>
    %31 = arith.mulf %29, %30 : vector<16x16xf32>
    %cst_16 = arith.constant 0.000000e+00 : f32
    %32 = vector.broadcast %cst_16 : f32 to vector<1x16xf32>
    %33 = arith.cmpf ogt, %3, %32 : vector<1x16xf32>
    %cst_17 = arith.constant -1.000000e+30 : f32
    %34 = vector.shape_cast %33 : vector<1x16xi1> to vector<1x16xi1>
    %35 = vector.broadcast %34 : vector<1x16xi1> to vector<16x16xi1>
    %36 = vector.broadcast %cst_17 : f32 to vector<16x16xf32>
    %37 = arith.select %35, %31, %36 : vector<16x16xi1>, vector<16x16xf32>
    %cst_18 = arith.constant dense<0xFF800000> : vector<16xf32>
    %38 = vector.multi_reduction <maximumf>, %37, %cst_18 [1] : vector<16x16xf32> to vector<16xf32>
    %39 = vector.shape_cast %38 : vector<16xf32> to vector<16x1xf32>
    %40 = vector.broadcast %39 : vector<16x1xf32> to vector<16x16xf32>
    %41 = arith.subf %37, %40 : vector<16x16xf32>
    %42 = math.exp %41 : vector<16x16xf32>
    %cst_19 = arith.constant dense<0.000000e+00> : vector<16xf32>
    %43 = vector.multi_reduction <add>, %42, %cst_19 [1] : vector<16x16xf32> to vector<16xf32>
    %44 = vector.shape_cast %43 : vector<16xf32> to vector<16x1xf32>
    %45 = tpu.reciprocal %44 {approx = true} : vector<16x1xf32> -> vector<16x1xf32>
    %46 = vector.broadcast %45 : vector<16x1xf32> to vector<16x16xf32>
    %47 = arith.mulf %42, %46 : vector<16x16xf32>
    %48 = arith.truncf %47 : vector<16x16xf32> to vector<16x16xbf16>
    %49 = arith.truncf %26 : vector<16x8xf32> to vector<16x8xbf16>
    %cst_20 = arith.constant dense<0.000000e+00> : vector<16x8xf32>
    %50 = tpu.matmul %48, %49, %cst_20 {dimension_numbers = #tpu.dot_dimension_numbers<[1], [0], [0], [1], [0, 0, 1, 1], [], []>} : vector<16x16xbf16>, vector<16x8xbf16>, vector<16x8xf32> -> vector<16x8xf32>
    %51 = vector.extract_strided_slice %23 {offsets = [0, 0], sizes = [8, 32], strides = [1, 1]} : vector<32x32xbf16> to vector<8x32xbf16>
    %52 = arith.truncf %50 : vector<16x8xf32> to vector<16x8xbf16>
    %cst_21 = arith.constant dense<0.000000e+00> : vector<16x32xf32>
    %53 = tpu.matmul %52, %51, %cst_21 {dimension_numbers = #tpu.dot_dimension_numbers<[1], [0], [0], [1], [0, 0, 1, 1], [], []>} : vector<16x8xbf16>, vector<8x32xbf16>, vector<16x32xf32> -> vector<16x32xf32>
    %54 = vector.broadcast %6 : vector<1x32xf32> to vector<16x32xf32>
    %55 = arith.addf %54, %53 : vector<16x32xf32>
    %56 = vector.extract_strided_slice %22 {offsets = [0, 8], sizes = [16, 8], strides = [1, 1]} : vector<16x96xf32> to vector<16x8xf32>
    %57 = vector.extract_strided_slice %22 {offsets = [0, 40], sizes = [16, 8], strides = [1, 1]} : vector<16x96xf32> to vector<16x8xf32>
    %58 = vector.extract_strided_slice %22 {offsets = [0, 72], sizes = [16, 8], strides = [1, 1]} : vector<16x96xf32> to vector<16x8xf32>
    %59 = arith.truncf %56 : vector<16x8xf32> to vector<16x8xbf16>
    %60 = arith.truncf %57 : vector<16x8xf32> to vector<16x8xbf16>
    %cst_22 = arith.constant dense<0.000000e+00> : vector<16x16xf32>
    %61 = tpu.matmul %59, %60, %cst_22 {dimension_numbers = #tpu.dot_dimension_numbers<[1], [1], [0], [0], [0, 0, 1, 0], [], []>} : vector<16x8xbf16>, vector<16x8xbf16>, vector<16x16xf32> -> vector<16x16xf32>
    %cst_23 = arith.constant 0.353553385 : f32
    %62 = vector.broadcast %cst_23 : f32 to vector<16x16xf32>
    %63 = arith.mulf %61, %62 : vector<16x16xf32>
    %cst_24 = arith.constant 0.000000e+00 : f32
    %64 = vector.broadcast %cst_24 : f32 to vector<1x16xf32>
    %65 = arith.cmpf ogt, %3, %64 : vector<1x16xf32>
    %cst_25 = arith.constant -1.000000e+30 : f32
    %66 = vector.shape_cast %65 : vector<1x16xi1> to vector<1x16xi1>
    %67 = vector.broadcast %66 : vector<1x16xi1> to vector<16x16xi1>
    %68 = vector.broadcast %cst_25 : f32 to vector<16x16xf32>
    %69 = arith.select %67, %63, %68 : vector<16x16xi1>, vector<16x16xf32>
    %cst_26 = arith.constant dense<0xFF800000> : vector<16xf32>
    %70 = vector.multi_reduction <maximumf>, %69, %cst_26 [1] : vector<16x16xf32> to vector<16xf32>
    %71 = vector.shape_cast %70 : vector<16xf32> to vector<16x1xf32>
    %72 = vector.broadcast %71 : vector<16x1xf32> to vector<16x16xf32>
    %73 = arith.subf %69, %72 : vector<16x16xf32>
    %74 = math.exp %73 : vector<16x16xf32>
    %cst_27 = arith.constant dense<0.000000e+00> : vector<16xf32>
    %75 = vector.multi_reduction <add>, %74, %cst_27 [1] : vector<16x16xf32> to vector<16xf32>
    %76 = vector.shape_cast %75 : vector<16xf32> to vector<16x1xf32>
    %77 = tpu.reciprocal %76 {approx = true} : vector<16x1xf32> -> vector<16x1xf32>
    %78 = vector.broadcast %77 : vector<16x1xf32> to vector<16x16xf32>
    %79 = arith.mulf %74, %78 : vector<16x16xf32>
    %80 = arith.truncf %79 : vector<16x16xf32> to vector<16x16xbf16>
    %81 = arith.truncf %58 : vector<16x8xf32> to vector<16x8xbf16>
    %cst_28 = arith.constant dense<0.000000e+00> : vector<16x8xf32>
    %82 = tpu.matmul %80, %81, %cst_28 {dimension_numbers = #tpu.dot_dimension_numbers<[1], [0], [0], [1], [0, 0, 1, 1], [], []>} : vector<16x16xbf16>, vector<16x8xbf16>, vector<16x8xf32> -> vector<16x8xf32>
    %83 = vector.extract_strided_slice %23 {offsets = [8, 0], sizes = [8, 32], strides = [1, 1]} : vector<32x32xbf16> to vector<8x32xbf16>
    %84 = arith.truncf %82 : vector<16x8xf32> to vector<16x8xbf16>
    %cst_29 = arith.constant dense<0.000000e+00> : vector<16x32xf32>
    %85 = tpu.matmul %84, %83, %cst_29 {dimension_numbers = #tpu.dot_dimension_numbers<[1], [0], [0], [1], [0, 0, 1, 1], [], []>} : vector<16x8xbf16>, vector<8x32xbf16>, vector<16x32xf32> -> vector<16x32xf32>
    %86 = arith.addf %55, %85 : vector<16x32xf32>
    %87 = vector.extract_strided_slice %22 {offsets = [0, 16], sizes = [16, 8], strides = [1, 1]} : vector<16x96xf32> to vector<16x8xf32>
    %88 = vector.extract_strided_slice %22 {offsets = [0, 48], sizes = [16, 8], strides = [1, 1]} : vector<16x96xf32> to vector<16x8xf32>
    %89 = vector.extract_strided_slice %22 {offsets = [0, 80], sizes = [16, 8], strides = [1, 1]} : vector<16x96xf32> to vector<16x8xf32>
    %90 = arith.truncf %87 : vector<16x8xf32> to vector<16x8xbf16>
    %91 = arith.truncf %88 : vector<16x8xf32> to vector<16x8xbf16>
    %cst_30 = arith.constant dense<0.000000e+00> : vector<16x16xf32>
    %92 = tpu.matmul %90, %91, %cst_30 {dimension_numbers = #tpu.dot_dimension_numbers<[1], [1], [0], [0], [0, 0, 1, 0], [], []>} : vector<16x8xbf16>, vector<16x8xbf16>, vector<16x16xf32> -> vector<16x16xf32>
    %cst_31 = arith.constant 0.353553385 : f32
    %93 = vector.broadcast %cst_31 : f32 to vector<16x16xf32>
    %94 = arith.mulf %92, %93 : vector<16x16xf32>
    %cst_32 = arith.constant 0.000000e+00 : f32
    %95 = vector.broadcast %cst_32 : f32 to vector<1x16xf32>
    %96 = arith.cmpf ogt, %3, %95 : vector<1x16xf32>
    %cst_33 = arith.constant -1.000000e+30 : f32
    %97 = vector.shape_cast %96 : vector<1x16xi1> to vector<1x16xi1>
    %98 = vector.broadcast %97 : vector<1x16xi1> to vector<16x16xi1>
    %99 = vector.broadcast %cst_33 : f32 to vector<16x16xf32>
    %100 = arith.select %98, %94, %99 : vector<16x16xi1>, vector<16x16xf32>
    %cst_34 = arith.constant dense<0xFF800000> : vector<16xf32>
    %101 = vector.multi_reduction <maximumf>, %100, %cst_34 [1] : vector<16x16xf32> to vector<16xf32>
    %102 = vector.shape_cast %101 : vector<16xf32> to vector<16x1xf32>
    %103 = vector.broadcast %102 : vector<16x1xf32> to vector<16x16xf32>
    %104 = arith.subf %100, %103 : vector<16x16xf32>
    %105 = math.exp %104 : vector<16x16xf32>
    %cst_35 = arith.constant dense<0.000000e+00> : vector<16xf32>
    %106 = vector.multi_reduction <add>, %105, %cst_35 [1] : vector<16x16xf32> to vector<16xf32>
    %107 = vector.shape_cast %106 : vector<16xf32> to vector<16x1xf32>
    %108 = tpu.reciprocal %107 {approx = true} : vector<16x1xf32> -> vector<16x1xf32>
    %109 = vector.broadcast %108 : vector<16x1xf32> to vector<16x16xf32>
    %110 = arith.mulf %105, %109 : vector<16x16xf32>
    %111 = arith.truncf %110 : vector<16x16xf32> to vector<16x16xbf16>
    %112 = arith.truncf %89 : vector<16x8xf32> to vector<16x8xbf16>
    %cst_36 = arith.constant dense<0.000000e+00> : vector<16x8xf32>
    %113 = tpu.matmul %111, %112, %cst_36 {dimension_numbers = #tpu.dot_dimension_numbers<[1], [0], [0], [1], [0, 0, 1, 1], [], []>} : vector<16x16xbf16>, vector<16x8xbf16>, vector<16x8xf32> -> vector<16x8xf32>
    %114 = vector.extract_strided_slice %23 {offsets = [16, 0], sizes = [8, 32], strides = [1, 1]} : vector<32x32xbf16> to vector<8x32xbf16>
    %115 = arith.truncf %113 : vector<16x8xf32> to vector<16x8xbf16>
    %cst_37 = arith.constant dense<0.000000e+00> : vector<16x32xf32>
    %116 = tpu.matmul %115, %114, %cst_37 {dimension_numbers = #tpu.dot_dimension_numbers<[1], [0], [0], [1], [0, 0, 1, 1], [], []>} : vector<16x8xbf16>, vector<8x32xbf16>, vector<16x32xf32> -> vector<16x32xf32>
    %117 = arith.addf %86, %116 : vector<16x32xf32>
    %118 = vector.extract_strided_slice %22 {offsets = [0, 24], sizes = [16, 8], strides = [1, 1]} : vector<16x96xf32> to vector<16x8xf32>
    %119 = vector.extract_strided_slice %22 {offsets = [0, 56], sizes = [16, 8], strides = [1, 1]} : vector<16x96xf32> to vector<16x8xf32>
    %120 = vector.extract_strided_slice %22 {offsets = [0, 88], sizes = [16, 8], strides = [1, 1]} : vector<16x96xf32> to vector<16x8xf32>
    %121 = arith.truncf %118 : vector<16x8xf32> to vector<16x8xbf16>
    %122 = arith.truncf %119 : vector<16x8xf32> to vector<16x8xbf16>
    %cst_38 = arith.constant dense<0.000000e+00> : vector<16x16xf32>
    %123 = tpu.matmul %121, %122, %cst_38 {dimension_numbers = #tpu.dot_dimension_numbers<[1], [1], [0], [0], [0, 0, 1, 0], [], []>} : vector<16x8xbf16>, vector<16x8xbf16>, vector<16x16xf32> -> vector<16x16xf32>
    %cst_39 = arith.constant 0.353553385 : f32
    %124 = vector.broadcast %cst_39 : f32 to vector<16x16xf32>
    %125 = arith.mulf %123, %124 : vector<16x16xf32>
    %cst_40 = arith.constant 0.000000e+00 : f32
    %126 = vector.broadcast %cst_40 : f32 to vector<1x16xf32>
    %127 = arith.cmpf ogt, %3, %126 : vector<1x16xf32>
    %cst_41 = arith.constant -1.000000e+30 : f32
    %128 = vector.shape_cast %127 : vector<1x16xi1> to vector<1x16xi1>
    %129 = vector.broadcast %128 : vector<1x16xi1> to vector<16x16xi1>
    %130 = vector.broadcast %cst_41 : f32 to vector<16x16xf32>
    %131 = arith.select %129, %125, %130 : vector<16x16xi1>, vector<16x16xf32>
    %cst_42 = arith.constant dense<0xFF800000> : vector<16xf32>
    %132 = vector.multi_reduction <maximumf>, %131, %cst_42 [1] : vector<16x16xf32> to vector<16xf32>
    %133 = vector.shape_cast %132 : vector<16xf32> to vector<16x1xf32>
    %134 = vector.broadcast %133 : vector<16x1xf32> to vector<16x16xf32>
    %135 = arith.subf %131, %134 : vector<16x16xf32>
    %136 = math.exp %135 : vector<16x16xf32>
    %cst_43 = arith.constant dense<0.000000e+00> : vector<16xf32>
    %137 = vector.multi_reduction <add>, %136, %cst_43 [1] : vector<16x16xf32> to vector<16xf32>
    %138 = vector.shape_cast %137 : vector<16xf32> to vector<16x1xf32>
    %139 = tpu.reciprocal %138 {approx = true} : vector<16x1xf32> -> vector<16x1xf32>
    %140 = vector.broadcast %139 : vector<16x1xf32> to vector<16x16xf32>
    %141 = arith.mulf %136, %140 : vector<16x16xf32>
    %142 = arith.truncf %141 : vector<16x16xf32> to vector<16x16xbf16>
    %143 = arith.truncf %120 : vector<16x8xf32> to vector<16x8xbf16>
    %cst_44 = arith.constant dense<0.000000e+00> : vector<16x8xf32>
    %144 = tpu.matmul %142, %143, %cst_44 {dimension_numbers = #tpu.dot_dimension_numbers<[1], [0], [0], [1], [0, 0, 1, 1], [], []>} : vector<16x16xbf16>, vector<16x8xbf16>, vector<16x8xf32> -> vector<16x8xf32>
    %145 = vector.extract_strided_slice %23 {offsets = [24, 0], sizes = [8, 32], strides = [1, 1]} : vector<32x32xbf16> to vector<8x32xbf16>
    %146 = arith.truncf %144 : vector<16x8xf32> to vector<16x8xbf16>
    %cst_45 = arith.constant dense<0.000000e+00> : vector<16x32xf32>
    %147 = tpu.matmul %146, %145, %cst_45 {dimension_numbers = #tpu.dot_dimension_numbers<[1], [0], [0], [1], [0, 0, 1, 1], [], []>} : vector<16x8xbf16>, vector<8x32xbf16>, vector<16x32xf32> -> vector<16x32xf32>
    %148 = arith.addf %117, %147 : vector<16x32xf32>
    %149 = arith.addf %17, %148 : vector<16x32xf32>
    %cst_46 = arith.constant dense<0.000000e+00> : vector<16xf32>
    %150 = vector.multi_reduction <add>, %149, %cst_46 [1] : vector<16x32xf32> to vector<16xf32>
    %151 = vector.shape_cast %150 : vector<16xf32> to vector<16x1xf32>
    %cst_47 = arith.constant 3.200000e+01 : f32
    %152 = vector.broadcast %cst_47 : f32 to vector<16x1xf32>
    %153 = arith.divf %151, %152 : vector<16x1xf32>
    %154 = vector.broadcast %153 : vector<16x1xf32> to vector<16x32xf32>
    %155 = arith.subf %149, %154 : vector<16x32xf32>
    %156 = arith.mulf %155, %155 : vector<16x32xf32>
    %cst_48 = arith.constant dense<0.000000e+00> : vector<16xf32>
    %157 = vector.multi_reduction <add>, %156, %cst_48 [1] : vector<16x32xf32> to vector<16xf32>
    %158 = vector.shape_cast %157 : vector<16xf32> to vector<16x1xf32>
    %cst_49 = arith.constant 3.200000e+01 : f32
    %159 = vector.broadcast %cst_49 : f32 to vector<16x1xf32>
    %160 = arith.divf %158, %159 : vector<16x1xf32>
    %161 = vector.broadcast %153 : vector<16x1xf32> to vector<16x32xf32>
    %162 = arith.subf %149, %161 : vector<16x32xf32>
    %cst_50 = arith.constant 9.99999974E-6 : f32
    %163 = vector.broadcast %cst_50 : f32 to vector<16x1xf32>
    %164 = arith.addf %160, %163 : vector<16x1xf32>
    %165 = math.rsqrt %164 : vector<16x1xf32>
    %166 = vector.broadcast %165 : vector<16x1xf32> to vector<16x32xf32>
    %167 = arith.mulf %162, %166 : vector<16x32xf32>
    %168 = vector.broadcast %9 : vector<1x32xf32> to vector<16x32xf32>
    %169 = arith.mulf %167, %168 : vector<16x32xf32>
    %170 = vector.broadcast %10 : vector<1x32xf32> to vector<16x32xf32>
    %171 = arith.addf %169, %170 : vector<16x32xf32>
    %c0_51 = arith.constant 0 : index
    %c0_52 = arith.constant 0 : index
    %172 = vector.load %arg6[%c0_51, %c0_52] : memref<32x64xbf16, #tpu.memory_space<vmem>>, vector<32x64xbf16>
    %173 = arith.truncf %171 : vector<16x32xf32> to vector<16x32xbf16>
    %cst_53 = arith.constant dense<0.000000e+00> : vector<16x64xf32>
    %174 = tpu.matmul %173, %172, %cst_53 {dimension_numbers = #tpu.dot_dimension_numbers<[1], [0], [0], [1], [0, 0, 1, 1], [], []>} : vector<16x32xbf16>, vector<32x64xbf16>, vector<16x64xf32> -> vector<16x64xf32>
    %175 = vector.broadcast %7 : vector<1x64xf32> to vector<16x64xf32>
    %176 = arith.addf %174, %175 : vector<16x64xf32>
    %cst_54 = arith.constant 0.000000e+00 : f32
    %177 = vector.broadcast %cst_54 : f32 to vector<16x64xf32>
    %178 = arith.maximumf %176, %177 : vector<16x64xf32>
    %c0_55 = arith.constant 0 : index
    %c0_56 = arith.constant 0 : index
    %179 = vector.load %arg7[%c0_55, %c0_56] : memref<64x32xbf16, #tpu.memory_space<vmem>>, vector<64x32xbf16>
    %180 = arith.truncf %178 : vector<16x64xf32> to vector<16x64xbf16>
    %cst_57 = arith.constant dense<0.000000e+00> : vector<16x32xf32>
    %181 = tpu.matmul %180, %179, %cst_57 {dimension_numbers = #tpu.dot_dimension_numbers<[1], [0], [0], [1], [0, 0, 1, 1], [], []>} : vector<16x64xbf16>, vector<64x32xbf16>, vector<16x32xf32> -> vector<16x32xf32>
    %182 = vector.broadcast %8 : vector<1x32xf32> to vector<16x32xf32>
    %183 = arith.addf %181, %182 : vector<16x32xf32>
    %184 = arith.addf %171, %183 : vector<16x32xf32>
    %cst_58 = arith.constant dense<0.000000e+00> : vector<16xf32>
    %185 = vector.multi_reduction <add>, %184, %cst_58 [1] : vector<16x32xf32> to vector<16xf32>
    %186 = vector.shape_cast %185 : vector<16xf32> to vector<16x1xf32>
    %cst_59 = arith.constant 3.200000e+01 : f32
    %187 = vector.broadcast %cst_59 : f32 to vector<16x1xf32>
    %188 = arith.divf %186, %187 : vector<16x1xf32>
    %189 = vector.broadcast %188 : vector<16x1xf32> to vector<16x32xf32>
    %190 = arith.subf %184, %189 : vector<16x32xf32>
    %191 = arith.mulf %190, %190 : vector<16x32xf32>
    %cst_60 = arith.constant dense<0.000000e+00> : vector<16xf32>
    %192 = vector.multi_reduction <add>, %191, %cst_60 [1] : vector<16x32xf32> to vector<16xf32>
    %193 = vector.shape_cast %192 : vector<16xf32> to vector<16x1xf32>
    %cst_61 = arith.constant 3.200000e+01 : f32
    %194 = vector.broadcast %cst_61 : f32 to vector<16x1xf32>
    %195 = arith.divf %193, %194 : vector<16x1xf32>
    %196 = vector.broadcast %188 : vector<16x1xf32> to vector<16x32xf32>
    %197 = arith.subf %184, %196 : vector<16x32xf32>
    %cst_62 = arith.constant 9.99999974E-6 : f32
    %198 = vector.broadcast %cst_62 : f32 to vector<16x1xf32>
    %199 = arith.addf %195, %198 : vector<16x1xf32>
    %200 = math.rsqrt %199 : vector<16x1xf32>
    %201 = vector.broadcast %200 : vector<16x1xf32> to vector<16x32xf32>
    %202 = arith.mulf %197, %201 : vector<16x32xf32>
    %203 = vector.broadcast %11 : vector<1x32xf32> to vector<16x32xf32>
    %204 = arith.mulf %202, %203 : vector<16x32xf32>
    %205 = vector.broadcast %12 : vector<1x32xf32> to vector<16x32xf32>
    %206 = arith.addf %204, %205 : vector<16x32xf32>
    %c0_63 = arith.constant 0 : index
    %c0_64 = arith.constant 0 : index
    %c0_65 = arith.constant 0 : index
    %207 = vector.load %arg9[%c0_63, %c0_64, %c0_65] : memref<1x16x32xf32, #tpu.memory_space<vmem>>, vector<1x16x32xf32>
    %208 = vector.shape_cast %207 : vector<1x16x32xf32> to vector<16x32xf32>
    %209 = vector.shape_cast %206 : vector<16x32xf32> to vector<1x16x32xf32>
    tpu.vector_store %arg9[%c0_63, %c0_64, %c0_65], %209 {strides = array<i32>} : memref<1x16x32xf32, #tpu.memory_space<vmem>>, vector<1x16x32xf32>,
    return
  }
  func.func @transform_0(%arg0: i32) -> (i32, i32, i32) {
    %c0_i32 = arith.constant 0 : i32
    %c0_i32_0 = arith.constant 0 : i32
    %c0_i32_1 = arith.constant 0 : i32
    return %arg0, %c0_i32, %c0_i32_0 : i32, i32, i32
  }
  func.func @transform_1(%arg0: i32) -> (i32, i32, i32) {
    %c0_i32 = arith.constant 0 : i32
    %c0_i32_0 = arith.constant 0 : i32
    %c0_i32_1 = arith.constant 0 : i32
    return %arg0, %c0_i32, %c0_i32_0 : i32, i32, i32
  }
  func.func @transform_2(%arg0: i32) -> (i32, i32) {
    %c0_i32 = arith.constant 0 : i32
    %c0_i32_0 = arith.constant 0 : i32
    %c0_i32_1 = arith.constant 0 : i32
    return %c0_i32, %c0_i32_0 : i32, i32
  }
  func.func @transform_3(%arg0: i32) -> (i32, i32) {
    %c0_i32 = arith.constant 0 : i32
    %c0_i32_0 = arith.constant 0 : i32
    %c0_i32_1 = arith.constant 0 : i32
    return %c0_i32, %c0_i32_0 : i32, i32
  }
  func.func @transform_4(%arg0: i32) -> (i32, i32) {
    %c0_i32 = arith.constant 0 : i32
    %c0_i32_0 = arith.constant 0 : i32
    %c0_i32_1 = arith.constant 0 : i32
    return %c0_i32, %c0_i32_0 : i32, i32
  }
  func.func @transform_5(%arg0: i32) -> (i32, i32) {
    %c0_i32 = arith.constant 0 : i32
    %c0_i32_0 = arith.constant 0 : i32
    %c0_i32_1 = arith.constant 0 : i32
    return %c0_i32, %c0_i32_0 : i32, i32
  }
  func.func @transform_6(%arg0: i32) -> (i32, i32) {
    %c0_i32 = arith.constant 0 : i32
    %c0_i32_0 = arith.constant 0 : i32
    %c0_i32_1 = arith.constant 0 : i32
    return %c0_i32, %c0_i32_0 : i32, i32
  }
  func.func @transform_7(%arg0: i32) -> (i32, i32) {
    %c0_i32 = arith.constant 0 : i32
    %c0_i32_0 = arith.constant 0 : i32
    %c0_i32_1 = arith.constant 0 : i32
    return %c0_i32, %c0_i32_0 : i32, i32
  }
  func.func @transform_8(%arg0: i32) -> (i32, i32, i32) {
    %c0_i32 = arith.constant 0 : i32
    %c0_i32_0 = arith.constant 0 : i32
    %c0_i32_1 = arith.constant 0 : i32
    return %arg0, %c0_i32, %c0_i32_0 : i32, i32, i32
  }
}

module attributes {stable_mosaic.version = 11 : i64} {
  func.func @_tri_dual_kernel(%arg0: i32, %arg1: memref<1x16x32xbf16, #tpu.memory_space<vmem>>, %arg2: memref<1x8x32xbf16, #tpu.memory_space<vmem>>, %arg3: memref<1x8x32xbf16, #tpu.memory_space<vmem>>, %arg4: memref<1x1x16xf32, #tpu.memory_space<vmem>>, %arg5: memref<1x1x8xf32, #tpu.memory_space<vmem>>, %arg6: memref<1x1x8xf32, #tpu.memory_space<vmem>>, %arg7: memref<1x16x1xf32, #tpu.memory_space<vmem>>, %arg8: memref<1x8x1xf32, #tpu.memory_space<vmem>>, %arg9: memref<1x8x1xf32, #tpu.memory_space<vmem>>, %arg10: memref<32x32xbf16, #tpu.memory_space<vmem>>, %arg11: memref<32x32xbf16, #tpu.memory_space<vmem>>, %arg12: memref<32x32xbf16, #tpu.memory_space<vmem>>, %arg13: memref<1x16x288xbf16, #tpu.memory_space<vmem>>, %arg14: memref<1x8x288xbf16, #tpu.memory_space<vmem>>, %arg15: memref<1x8x288xbf16, #tpu.memory_space<vmem>>) attributes {dimension_semantics = [#tpu.dimension_semantics<parallel>], iteration_bounds = array<i64: 2>, scalar_prefetch = 0 : i64, scratch_operands = 0 : i64, tpu.core_type = #tpu.core_type<tc>, window_params = [{transform_indices = @transform_0, window_bounds = array<i64: 1, 16, 32>}, {transform_indices = @transform_1, window_bounds = array<i64: 1, 8, 32>}, {transform_indices = @transform_2, window_bounds = array<i64: 1, 8, 32>}, {transform_indices = @transform_3, window_bounds = array<i64: 1, 1, 16>}, {transform_indices = @transform_4, window_bounds = array<i64: 1, 1, 8>}, {transform_indices = @transform_5, window_bounds = array<i64: 1, 1, 8>}, {transform_indices = @transform_6, window_bounds = array<i64: 1, 16, 1>}, {transform_indices = @transform_7, window_bounds = array<i64: 1, 8, 1>}, {transform_indices = @transform_8, window_bounds = array<i64: 1, 8, 1>}, {pipeline_mode = #tpu.pipeline_mode<synchronous>, transform_indices = @transform_9, window_bounds = array<i64: 32, 32>}, {pipeline_mode = #tpu.pipeline_mode<synchronous>, transform_indices = @transform_10, window_bounds = array<i64: 32, 32>}, {pipeline_mode = #tpu.pipeline_mode<synchronous>, transform_indices = @transform_11, window_bounds = array<i64: 32, 32>}, {transform_indices = @transform_12, window_bounds = array<i64: 1, 16, 288>}, {transform_indices = @transform_13, window_bounds = array<i64: 1, 8, 288>}, {transform_indices = @transform_14, window_bounds = array<i64: 1, 8, 288>}]} {
    %c0 = arith.constant 0 : index
    %c0_0 = arith.constant 0 : index
    %c0_1 = arith.constant 0 : index
    %0 = vector.load %arg1[%c0, %c0_0, %c0_1] : memref<1x16x32xbf16, #tpu.memory_space<vmem>>, vector<1x16x32xbf16>
    %1 = vector.shape_cast %0 : vector<1x16x32xbf16> to vector<16x32xbf16>
    %c0_2 = arith.constant 0 : index
    %c0_3 = arith.constant 0 : index
    %c0_4 = arith.constant 0 : index
    %2 = vector.load %arg2[%c0_2, %c0_3, %c0_4] : memref<1x8x32xbf16, #tpu.memory_space<vmem>>, vector<1x8x32xbf16>
    %3 = vector.shape_cast %2 : vector<1x8x32xbf16> to vector<8x32xbf16>
    %c0_5 = arith.constant 0 : index
    %c0_6 = arith.constant 0 : index
    %c0_7 = arith.constant 0 : index
    %4 = vector.load %arg3[%c0_5, %c0_6, %c0_7] : memref<1x8x32xbf16, #tpu.memory_space<vmem>>, vector<1x8x32xbf16>
    %5 = vector.shape_cast %4 : vector<1x8x32xbf16> to vector<8x32xbf16>
    %6 = arith.extf %1 : vector<16x32xbf16> to vector<16x32xf32>
    %7 = arith.extf %3 : vector<8x32xbf16> to vector<8x32xf32>
    %8 = arith.extf %5 : vector<8x32xbf16> to vector<8x32xf32>
    %c0_8 = arith.constant 0 : index
    %c0_9 = arith.constant 0 : index
    %c0_10 = arith.constant 0 : index
    %9 = vector.load %arg5[%c0_8, %c0_9, %c0_10] : memref<1x1x8xf32, #tpu.memory_space<vmem>>, vector<1x1x8xf32>
    %10 = vector.shape_cast %9 : vector<1x1x8xf32> to vector<1x8xf32>
    %c0_11 = arith.constant 0 : index
    %c0_12 = arith.constant 0 : index
    %c0_13 = arith.constant 0 : index
    %11 = vector.load %arg6[%c0_11, %c0_12, %c0_13] : memref<1x1x8xf32, #tpu.memory_space<vmem>>, vector<1x1x8xf32>
    %12 = vector.shape_cast %11 : vector<1x1x8xf32> to vector<1x8xf32>
    %c0_14 = arith.constant 0 : index
    %c0_15 = arith.constant 0 : index
    %c0_16 = arith.constant 0 : index
    %13 = vector.load %arg7[%c0_14, %c0_15, %c0_16] : memref<1x16x1xf32, #tpu.memory_space<vmem>>, vector<1x16x1xf32>
    %14 = vector.shape_cast %13 : vector<1x16x1xf32> to vector<16x1xf32>
    %c0_17 = arith.constant 0 : index
    %c0_18 = arith.constant 0 : index
    %c0_19 = arith.constant 0 : index
    %15 = vector.load %arg8[%c0_17, %c0_18, %c0_19] : memref<1x8x1xf32, #tpu.memory_space<vmem>>, vector<1x8x1xf32>
    %16 = vector.shape_cast %15 : vector<1x8x1xf32> to vector<8x1xf32>
    %c0_20 = arith.constant 0 : index
    %c0_21 = arith.constant 0 : index
    %17 = vector.load %arg10[%c0_20, %c0_21] : memref<32x32xbf16, #tpu.memory_space<vmem>>, vector<32x32xbf16>
    %cst = arith.constant dense<0.000000e+00> : vector<16x32xf32>
    %18 = tpu.matmul %1, %17, %cst {dimension_numbers = #tpu.dot_dimension_numbers<[1], [0], [0], [1], [0, 0, 1, 1], [], []>} : vector<16x32xbf16>, vector<32x32xbf16>, vector<16x32xf32> -> vector<16x32xf32>
    %19 = arith.truncf %18 : vector<16x32xf32> to vector<16x32xbf16>
    %cst_22 = arith.constant dense<0.000000e+00> : vector<16x8xf32>
    %20 = tpu.matmul %19, %3, %cst_22 {dimension_numbers = #tpu.dot_dimension_numbers<[1], [1], [0], [0], [0, 0, 1, 0], [], []>} : vector<16x32xbf16>, vector<8x32xbf16>, vector<16x8xf32> -> vector<16x8xf32>
    %cst_23 = arith.constant 0.176776692 : f32
    %21 = vector.broadcast %cst_23 : f32 to vector<16x8xf32>
    %22 = arith.mulf %20, %21 : vector<16x8xf32>
    %cst_24 = arith.constant 0.000000e+00 : f32
    %23 = vector.broadcast %cst_24 : f32 to vector<1x8xf32>
    %24 = arith.cmpf ogt, %10, %23 : vector<1x8xf32>
    %cst_25 = arith.constant -1.000000e+30 : f32
    %25 = vector.shape_cast %24 : vector<1x8xi1> to vector<1x8xi1>
    %26 = vector.broadcast %25 : vector<1x8xi1> to vector<16x8xi1>
    %27 = vector.broadcast %cst_25 : f32 to vector<16x8xf32>
    %28 = arith.select %26, %22, %27 : vector<16x8xi1>, vector<16x8xf32>
    %cst_26 = arith.constant dense<0xFF800000> : vector<16xf32>
    %29 = vector.multi_reduction <maximumf>, %28, %cst_26 [1] : vector<16x8xf32> to vector<16xf32>
    %30 = vector.shape_cast %29 : vector<16xf32> to vector<16x1xf32>
    %31 = vector.broadcast %30 : vector<16x1xf32> to vector<16x8xf32>
    %32 = arith.subf %28, %31 : vector<16x8xf32>
    %33 = math.exp %32 : vector<16x8xf32>
    %cst_27 = arith.constant dense<0.000000e+00> : vector<16xf32>
    %34 = vector.multi_reduction <add>, %33, %cst_27 [1] : vector<16x8xf32> to vector<16xf32>
    %35 = vector.shape_cast %34 : vector<16xf32> to vector<16x1xf32>
    %36 = tpu.reciprocal %35 {approx = true} : vector<16x1xf32> -> vector<16x1xf32>
    %37 = vector.broadcast %36 : vector<16x1xf32> to vector<16x8xf32>
    %38 = arith.mulf %33, %37 : vector<16x8xf32>
    %cst_28 = arith.constant 0.000000e+00 : f32
    %39 = vector.broadcast %cst_28 : f32 to vector<16x1xf32>
    %40 = arith.cmpf ogt, %14, %39 : vector<16x1xf32>
    %cst_29 = arith.constant -1.000000e+30 : f32
    %41 = vector.shape_cast %40 : vector<16x1xi1> to vector<16x1xi1>
    %42 = vector.broadcast %41 : vector<16x1xi1> to vector<16x8xi1>
    %43 = vector.broadcast %cst_29 : f32 to vector<16x8xf32>
    %44 = arith.select %42, %22, %43 : vector<16x8xi1>, vector<16x8xf32>
    %cst_30 = arith.constant dense<0xFF800000> : vector<8xf32>
    %45 = vector.multi_reduction <maximumf>, %44, %cst_30 [0] : vector<16x8xf32> to vector<8xf32>
    %46 = vector.shape_cast %45 : vector<8xf32> to vector<1x8xf32>
    %47 = vector.broadcast %46 : vector<1x8xf32> to vector<16x8xf32>
    %48 = arith.subf %44, %47 : vector<16x8xf32>
    %49 = math.exp %48 : vector<16x8xf32>
    %cst_31 = arith.constant dense<0.000000e+00> : vector<8xf32>
    %50 = vector.multi_reduction <add>, %49, %cst_31 [0] : vector<16x8xf32> to vector<8xf32>
    %51 = vector.shape_cast %50 : vector<8xf32> to vector<1x8xf32>
    %52 = tpu.reciprocal %51 {approx = true} : vector<1x8xf32> -> vector<1x8xf32>
    %53 = vector.broadcast %52 : vector<1x8xf32> to vector<16x8xf32>
    %54 = arith.mulf %49, %53 : vector<16x8xf32>
    %55 = arith.truncf %38 : vector<16x8xf32> to vector<16x8xbf16>
    %cst_32 = arith.constant dense<0.000000e+00> : vector<16x32xf32>
    %56 = tpu.matmul %55, %3, %cst_32 {dimension_numbers = #tpu.dot_dimension_numbers<[1], [0], [0], [1], [0, 0, 1, 1], [], []>} : vector<16x8xbf16>, vector<8x32xbf16>, vector<16x32xf32> -> vector<16x32xf32>
    %57 = arith.truncf %54 : vector<16x8xf32> to vector<16x8xbf16>
    %cst_33 = arith.constant dense<0.000000e+00> : vector<8x32xf32>
    %58 = tpu.matmul %57, %1, %cst_33 {dimension_numbers = #tpu.dot_dimension_numbers<[0], [0], [1], [1], [0, 1, 1, 1], [], []>} : vector<16x8xbf16>, vector<16x32xbf16>, vector<8x32xf32> -> vector<8x32xf32>
    %59 = arith.truncf %38 : vector<16x8xf32> to vector<16x8xbf16>
    %60 = arith.truncf %58 : vector<8x32xf32> to vector<8x32xbf16>
    %cst_34 = arith.constant dense<0.000000e+00> : vector<16x32xf32>
    %61 = tpu.matmul %59, %60, %cst_34 {dimension_numbers = #tpu.dot_dimension_numbers<[1], [0], [0], [1], [0, 0, 1, 1], [], []>} : vector<16x8xbf16>, vector<8x32xbf16>, vector<16x32xf32> -> vector<16x32xf32>
    %62 = arith.truncf %54 : vector<16x8xf32> to vector<16x8xbf16>
    %63 = arith.truncf %56 : vector<16x32xf32> to vector<16x32xbf16>
    %cst_35 = arith.constant dense<0.000000e+00> : vector<8x32xf32>
    %64 = tpu.matmul %62, %63, %cst_35 {dimension_numbers = #tpu.dot_dimension_numbers<[0], [0], [1], [1], [0, 1, 1, 1], [], []>} : vector<16x8xbf16>, vector<16x32xbf16>, vector<8x32xf32> -> vector<8x32xf32>
    %c0_36 = arith.constant 0 : index
    %c0_37 = arith.constant 0 : index
    %65 = vector.load %arg11[%c0_36, %c0_37] : memref<32x32xbf16, #tpu.memory_space<vmem>>, vector<32x32xbf16>
    %cst_38 = arith.constant dense<0.000000e+00> : vector<16x32xf32>
    %66 = tpu.matmul %1, %65, %cst_38 {dimension_numbers = #tpu.dot_dimension_numbers<[1], [0], [0], [1], [0, 0, 1, 1], [], []>} : vector<16x32xbf16>, vector<32x32xbf16>, vector<16x32xf32> -> vector<16x32xf32>
    %67 = arith.truncf %66 : vector<16x32xf32> to vector<16x32xbf16>
    %cst_39 = arith.constant dense<0.000000e+00> : vector<16x8xf32>
    %68 = tpu.matmul %67, %5, %cst_39 {dimension_numbers = #tpu.dot_dimension_numbers<[1], [1], [0], [0], [0, 0, 1, 0], [], []>} : vector<16x32xbf16>, vector<8x32xbf16>, vector<16x8xf32> -> vector<16x8xf32>
    %cst_40 = arith.constant 0.176776692 : f32
    %69 = vector.broadcast %cst_40 : f32 to vector<16x8xf32>
    %70 = arith.mulf %68, %69 : vector<16x8xf32>
    %cst_41 = arith.constant 0.000000e+00 : f32
    %71 = vector.broadcast %cst_41 : f32 to vector<1x8xf32>
    %72 = arith.cmpf ogt, %12, %71 : vector<1x8xf32>
    %cst_42 = arith.constant -1.000000e+30 : f32
    %73 = vector.shape_cast %72 : vector<1x8xi1> to vector<1x8xi1>
    %74 = vector.broadcast %73 : vector<1x8xi1> to vector<16x8xi1>
    %75 = vector.broadcast %cst_42 : f32 to vector<16x8xf32>
    %76 = arith.select %74, %70, %75 : vector<16x8xi1>, vector<16x8xf32>
    %cst_43 = arith.constant dense<0xFF800000> : vector<16xf32>
    %77 = vector.multi_reduction <maximumf>, %76, %cst_43 [1] : vector<16x8xf32> to vector<16xf32>
    %78 = vector.shape_cast %77 : vector<16xf32> to vector<16x1xf32>
    %79 = vector.broadcast %78 : vector<16x1xf32> to vector<16x8xf32>
    %80 = arith.subf %76, %79 : vector<16x8xf32>
    %81 = math.exp %80 : vector<16x8xf32>
    %cst_44 = arith.constant dense<0.000000e+00> : vector<16xf32>
    %82 = vector.multi_reduction <add>, %81, %cst_44 [1] : vector<16x8xf32> to vector<16xf32>
    %83 = vector.shape_cast %82 : vector<16xf32> to vector<16x1xf32>
    %84 = tpu.reciprocal %83 {approx = true} : vector<16x1xf32> -> vector<16x1xf32>
    %85 = vector.broadcast %84 : vector<16x1xf32> to vector<16x8xf32>
    %86 = arith.mulf %81, %85 : vector<16x8xf32>
    %cst_45 = arith.constant 0.000000e+00 : f32
    %87 = vector.broadcast %cst_45 : f32 to vector<16x1xf32>
    %88 = arith.cmpf ogt, %14, %87 : vector<16x1xf32>
    %cst_46 = arith.constant -1.000000e+30 : f32
    %89 = vector.shape_cast %88 : vector<16x1xi1> to vector<16x1xi1>
    %90 = vector.broadcast %89 : vector<16x1xi1> to vector<16x8xi1>
    %91 = vector.broadcast %cst_46 : f32 to vector<16x8xf32>
    %92 = arith.select %90, %70, %91 : vector<16x8xi1>, vector<16x8xf32>
    %cst_47 = arith.constant dense<0xFF800000> : vector<8xf32>
    %93 = vector.multi_reduction <maximumf>, %92, %cst_47 [0] : vector<16x8xf32> to vector<8xf32>
    %94 = vector.shape_cast %93 : vector<8xf32> to vector<1x8xf32>
    %95 = vector.broadcast %94 : vector<1x8xf32> to vector<16x8xf32>
    %96 = arith.subf %92, %95 : vector<16x8xf32>
    %97 = math.exp %96 : vector<16x8xf32>
    %cst_48 = arith.constant dense<0.000000e+00> : vector<8xf32>
    %98 = vector.multi_reduction <add>, %97, %cst_48 [0] : vector<16x8xf32> to vector<8xf32>
    %99 = vector.shape_cast %98 : vector<8xf32> to vector<1x8xf32>
    %100 = tpu.reciprocal %99 {approx = true} : vector<1x8xf32> -> vector<1x8xf32>
    %101 = vector.broadcast %100 : vector<1x8xf32> to vector<16x8xf32>
    %102 = arith.mulf %97, %101 : vector<16x8xf32>
    %103 = arith.truncf %86 : vector<16x8xf32> to vector<16x8xbf16>
    %cst_49 = arith.constant dense<0.000000e+00> : vector<16x32xf32>
    %104 = tpu.matmul %103, %5, %cst_49 {dimension_numbers = #tpu.dot_dimension_numbers<[1], [0], [0], [1], [0, 0, 1, 1], [], []>} : vector<16x8xbf16>, vector<8x32xbf16>, vector<16x32xf32> -> vector<16x32xf32>
    %105 = arith.truncf %102 : vector<16x8xf32> to vector<16x8xbf16>
    %cst_50 = arith.constant dense<0.000000e+00> : vector<8x32xf32>
    %106 = tpu.matmul %105, %1, %cst_50 {dimension_numbers = #tpu.dot_dimension_numbers<[0], [0], [1], [1], [0, 1, 1, 1], [], []>} : vector<16x8xbf16>, vector<16x32xbf16>, vector<8x32xf32> -> vector<8x32xf32>
    %107 = arith.truncf %86 : vector<16x8xf32> to vector<16x8xbf16>
    %108 = arith.truncf %106 : vector<8x32xf32> to vector<8x32xbf16>
    %cst_51 = arith.constant dense<0.000000e+00> : vector<16x32xf32>
    %109 = tpu.matmul %107, %108, %cst_51 {dimension_numbers = #tpu.dot_dimension_numbers<[1], [0], [0], [1], [0, 0, 1, 1], [], []>} : vector<16x8xbf16>, vector<8x32xbf16>, vector<16x32xf32> -> vector<16x32xf32>
    %110 = arith.truncf %102 : vector<16x8xf32> to vector<16x8xbf16>
    %111 = arith.truncf %104 : vector<16x32xf32> to vector<16x32xbf16>
    %cst_52 = arith.constant dense<0.000000e+00> : vector<8x32xf32>
    %112 = tpu.matmul %110, %111, %cst_52 {dimension_numbers = #tpu.dot_dimension_numbers<[0], [0], [1], [1], [0, 1, 1, 1], [], []>} : vector<16x8xbf16>, vector<16x32xbf16>, vector<8x32xf32> -> vector<8x32xf32>
    %c0_53 = arith.constant 0 : index
    %c0_54 = arith.constant 0 : index
    %113 = vector.load %arg12[%c0_53, %c0_54] : memref<32x32xbf16, #tpu.memory_space<vmem>>, vector<32x32xbf16>
    %cst_55 = arith.constant dense<0.000000e+00> : vector<8x32xf32>
    %114 = tpu.matmul %3, %113, %cst_55 {dimension_numbers = #tpu.dot_dimension_numbers<[1], [0], [0], [1], [0, 0, 1, 1], [], []>} : vector<8x32xbf16>, vector<32x32xbf16>, vector<8x32xf32> -> vector<8x32xf32>
    %115 = arith.truncf %114 : vector<8x32xf32> to vector<8x32xbf16>
    %cst_56 = arith.constant dense<0.000000e+00> : vector<8x8xf32>
    %116 = tpu.matmul %115, %5, %cst_56 {dimension_numbers = #tpu.dot_dimension_numbers<[1], [1], [0], [0], [0, 0, 1, 0], [], []>} : vector<8x32xbf16>, vector<8x32xbf16>, vector<8x8xf32> -> vector<8x8xf32>
    %cst_57 = arith.constant 0.176776692 : f32
    %117 = vector.broadcast %cst_57 : f32 to vector<8x8xf32>
    %118 = arith.mulf %116, %117 : vector<8x8xf32>
    %cst_58 = arith.constant 0.000000e+00 : f32
    %119 = vector.broadcast %cst_58 : f32 to vector<1x8xf32>
    %120 = arith.cmpf ogt, %12, %119 : vector<1x8xf32>
    %cst_59 = arith.constant -1.000000e+30 : f32
    %121 = vector.shape_cast %120 : vector<1x8xi1> to vector<1x8xi1>
    %122 = vector.broadcast %121 : vector<1x8xi1> to vector<8x8xi1>
    %123 = vector.broadcast %cst_59 : f32 to vector<8x8xf32>
    %124 = arith.select %122, %118, %123 : vector<8x8xi1>, vector<8x8xf32>
    %cst_60 = arith.constant dense<0xFF800000> : vector<8xf32>
    %125 = vector.multi_reduction <maximumf>, %124, %cst_60 [1] : vector<8x8xf32> to vector<8xf32>
    %126 = vector.shape_cast %125 : vector<8xf32> to vector<8x1xf32>
    %127 = vector.broadcast %126 : vector<8x1xf32> to vector<8x8xf32>
    %128 = arith.subf %124, %127 : vector<8x8xf32>
    %129 = math.exp %128 : vector<8x8xf32>
    %cst_61 = arith.constant dense<0.000000e+00> : vector<8xf32>
    %130 = vector.multi_reduction <add>, %129, %cst_61 [1] : vector<8x8xf32> to vector<8xf32>
    %131 = vector.shape_cast %130 : vector<8xf32> to vector<8x1xf32>
    %132 = tpu.reciprocal %131 {approx = true} : vector<8x1xf32> -> vector<8x1xf32>
    %133 = vector.broadcast %132 : vector<8x1xf32> to vector<8x8xf32>
    %134 = arith.mulf %129, %133 : vector<8x8xf32>
    %cst_62 = arith.constant 0.000000e+00 : f32
    %135 = vector.broadcast %cst_62 : f32 to vector<8x1xf32>
    %136 = arith.cmpf ogt, %16, %135 : vector<8x1xf32>
    %cst_63 = arith.constant -1.000000e+30 : f32
    %137 = vector.shape_cast %136 : vector<8x1xi1> to vector<8x1xi1>
    %138 = vector.broadcast %137 : vector<8x1xi1> to vector<8x8xi1>
    %139 = vector.broadcast %cst_63 : f32 to vector<8x8xf32>
    %140 = arith.select %138, %118, %139 : vector<8x8xi1>, vector<8x8xf32>
    %cst_64 = arith.constant dense<0xFF800000> : vector<8xf32>
    %141 = vector.multi_reduction <maximumf>, %140, %cst_64 [0] : vector<8x8xf32> to vector<8xf32>
    %142 = vector.shape_cast %141 : vector<8xf32> to vector<1x8xf32>
    %143 = vector.broadcast %142 : vector<1x8xf32> to vector<8x8xf32>
    %144 = arith.subf %140, %143 : vector<8x8xf32>
    %145 = math.exp %144 : vector<8x8xf32>
    %cst_65 = arith.constant dense<0.000000e+00> : vector<8xf32>
    %146 = vector.multi_reduction <add>, %145, %cst_65 [0] : vector<8x8xf32> to vector<8xf32>
    %147 = vector.shape_cast %146 : vector<8xf32> to vector<1x8xf32>
    %148 = tpu.reciprocal %147 {approx = true} : vector<1x8xf32> -> vector<1x8xf32>
    %149 = vector.broadcast %148 : vector<1x8xf32> to vector<8x8xf32>
    %150 = arith.mulf %145, %149 : vector<8x8xf32>
    %151 = arith.truncf %134 : vector<8x8xf32> to vector<8x8xbf16>
    %cst_66 = arith.constant dense<0.000000e+00> : vector<8x32xf32>
    %152 = tpu.matmul %151, %5, %cst_66 {dimension_numbers = #tpu.dot_dimension_numbers<[1], [0], [0], [1], [0, 0, 1, 1], [], []>} : vector<8x8xbf16>, vector<8x32xbf16>, vector<8x32xf32> -> vector<8x32xf32>
    %153 = arith.truncf %150 : vector<8x8xf32> to vector<8x8xbf16>
    %cst_67 = arith.constant dense<0.000000e+00> : vector<8x32xf32>
    %154 = tpu.matmul %153, %3, %cst_67 {dimension_numbers = #tpu.dot_dimension_numbers<[0], [0], [1], [1], [0, 1, 1, 1], [], []>} : vector<8x8xbf16>, vector<8x32xbf16>, vector<8x32xf32> -> vector<8x32xf32>
    %155 = arith.truncf %134 : vector<8x8xf32> to vector<8x8xbf16>
    %156 = arith.truncf %154 : vector<8x32xf32> to vector<8x32xbf16>
    %cst_68 = arith.constant dense<0.000000e+00> : vector<8x32xf32>
    %157 = tpu.matmul %155, %156, %cst_68 {dimension_numbers = #tpu.dot_dimension_numbers<[1], [0], [0], [1], [0, 0, 1, 1], [], []>} : vector<8x8xbf16>, vector<8x32xbf16>, vector<8x32xf32> -> vector<8x32xf32>
    %158 = arith.truncf %150 : vector<8x8xf32> to vector<8x8xbf16>
    %159 = arith.truncf %152 : vector<8x32xf32> to vector<8x32xbf16>
    %cst_69 = arith.constant dense<0.000000e+00> : vector<8x32xf32>
    %160 = tpu.matmul %158, %159, %cst_69 {dimension_numbers = #tpu.dot_dimension_numbers<[0], [0], [1], [1], [0, 1, 1, 1], [], []>} : vector<8x8xbf16>, vector<8x32xbf16>, vector<8x32xf32> -> vector<8x32xf32>
    %161 = arith.mulf %6, %56 : vector<16x32xf32>
    %162 = arith.mulf %6, %61 : vector<16x32xf32>
    %163 = arith.mulf %6, %104 : vector<16x32xf32>
    %164 = arith.mulf %6, %109 : vector<16x32xf32>
    %165 = arith.truncf %6 : vector<16x32xf32> to vector<16x32xbf16>
    %c0_70 = arith.constant 0 : index
    %c0_71 = arith.constant 0 : index
    %c0_72 = arith.constant 0 : index
    %166 = vector.load %arg13[%c0_70, %c0_71, %c0_72] : memref<1x16x288xbf16, #tpu.memory_space<vmem>>, vector<1x16x32xbf16>
    %167 = vector.shape_cast %166 : vector<1x16x32xbf16> to vector<16x32xbf16>
    %168 = vector.shape_cast %165 : vector<16x32xbf16> to vector<1x16x32xbf16>
    tpu.vector_store %arg13[%c0_70, %c0_71, %c0_72], %168 {strides = array<i32>} : memref<1x16x288xbf16, #tpu.memory_space<vmem>>, vector<1x16x32xbf16>,
    %169 = arith.truncf %56 : vector<16x32xf32> to vector<16x32xbf16>
    %c0_73 = arith.constant 0 : index
    %c0_74 = arith.constant 0 : index
    %c32 = arith.constant 32 : index
    %170 = vector.load %arg13[%c0_73, %c0_74, %c32] : memref<1x16x288xbf16, #tpu.memory_space<vmem>>, vector<1x16x32xbf16>
    %171 = vector.shape_cast %170 : vector<1x16x32xbf16> to vector<16x32xbf16>
    %172 = vector.shape_cast %169 : vector<16x32xbf16> to vector<1x16x32xbf16>
    tpu.vector_store %arg13[%c0_73, %c0_74, %c32], %172 {strides = array<i32>} : memref<1x16x288xbf16, #tpu.memory_space<vmem>>, vector<1x16x32xbf16>,
    %173 = arith.truncf %61 : vector<16x32xf32> to vector<16x32xbf16>
    %c0_75 = arith.constant 0 : index
    %c0_76 = arith.constant 0 : index
    %c64 = arith.constant 64 : index
    %174 = vector.load %arg13[%c0_75, %c0_76, %c64] : memref<1x16x288xbf16, #tpu.memory_space<vmem>>, vector<1x16x32xbf16>
    %175 = vector.shape_cast %174 : vector<1x16x32xbf16> to vector<16x32xbf16>
    %176 = vector.shape_cast %173 : vector<16x32xbf16> to vector<1x16x32xbf16>
    tpu.vector_store %arg13[%c0_75, %c0_76, %c64], %176 {strides = array<i32>} : memref<1x16x288xbf16, #tpu.memory_space<vmem>>, vector<1x16x32xbf16>,
    %177 = arith.truncf %161 : vector<16x32xf32> to vector<16x32xbf16>
    %c0_77 = arith.constant 0 : index
    %c0_78 = arith.constant 0 : index
    %c96 = arith.constant 96 : index
    %178 = vector.load %arg13[%c0_77, %c0_78, %c96] : memref<1x16x288xbf16, #tpu.memory_space<vmem>>, vector<1x16x32xbf16>
    %179 = vector.shape_cast %178 : vector<1x16x32xbf16> to vector<16x32xbf16>
    %180 = vector.shape_cast %177 : vector<16x32xbf16> to vector<1x16x32xbf16>
    tpu.vector_store %arg13[%c0_77, %c0_78, %c96], %180 {strides = array<i32>} : memref<1x16x288xbf16, #tpu.memory_space<vmem>>, vector<1x16x32xbf16>,
    %181 = arith.truncf %162 : vector<16x32xf32> to vector<16x32xbf16>
    %c0_79 = arith.constant 0 : index
    %c0_80 = arith.constant 0 : index
    %c128 = arith.constant 128 : index
    %182 = vector.load %arg13[%c0_79, %c0_80, %c128] : memref<1x16x288xbf16, #tpu.memory_space<vmem>>, vector<1x16x32xbf16>
    %183 = vector.shape_cast %182 : vector<1x16x32xbf16> to vector<16x32xbf16>
    %184 = vector.shape_cast %181 : vector<16x32xbf16> to vector<1x16x32xbf16>
    tpu.vector_store %arg13[%c0_79, %c0_80, %c128], %184 {strides = array<i32>} : memref<1x16x288xbf16, #tpu.memory_space<vmem>>, vector<1x16x32xbf16>,
    %185 = arith.truncf %104 : vector<16x32xf32> to vector<16x32xbf16>
    %c0_81 = arith.constant 0 : index
    %c0_82 = arith.constant 0 : index
    %c160 = arith.constant 160 : index
    %186 = vector.load %arg13[%c0_81, %c0_82, %c160] : memref<1x16x288xbf16, #tpu.memory_space<vmem>>, vector<1x16x32xbf16>
    %187 = vector.shape_cast %186 : vector<1x16x32xbf16> to vector<16x32xbf16>
    %188 = vector.shape_cast %185 : vector<16x32xbf16> to vector<1x16x32xbf16>
    tpu.vector_store %arg13[%c0_81, %c0_82, %c160], %188 {strides = array<i32>} : memref<1x16x288xbf16, #tpu.memory_space<vmem>>, vector<1x16x32xbf16>,
    %189 = arith.truncf %109 : vector<16x32xf32> to vector<16x32xbf16>
    %c0_83 = arith.constant 0 : index
    %c0_84 = arith.constant 0 : index
    %c192 = arith.constant 192 : index
    %190 = vector.load %arg13[%c0_83, %c0_84, %c192] : memref<1x16x288xbf16, #tpu.memory_space<vmem>>, vector<1x16x32xbf16>
    %191 = vector.shape_cast %190 : vector<1x16x32xbf16> to vector<16x32xbf16>
    %192 = vector.shape_cast %189 : vector<16x32xbf16> to vector<1x16x32xbf16>
    tpu.vector_store %arg13[%c0_83, %c0_84, %c192], %192 {strides = array<i32>} : memref<1x16x288xbf16, #tpu.memory_space<vmem>>, vector<1x16x32xbf16>,
    %193 = arith.truncf %163 : vector<16x32xf32> to vector<16x32xbf16>
    %c0_85 = arith.constant 0 : index
    %c0_86 = arith.constant 0 : index
    %c224 = arith.constant 224 : index
    %194 = vector.load %arg13[%c0_85, %c0_86, %c224] : memref<1x16x288xbf16, #tpu.memory_space<vmem>>, vector<1x16x32xbf16>
    %195 = vector.shape_cast %194 : vector<1x16x32xbf16> to vector<16x32xbf16>
    %196 = vector.shape_cast %193 : vector<16x32xbf16> to vector<1x16x32xbf16>
    tpu.vector_store %arg13[%c0_85, %c0_86, %c224], %196 {strides = array<i32>} : memref<1x16x288xbf16, #tpu.memory_space<vmem>>, vector<1x16x32xbf16>,
    %197 = arith.truncf %164 : vector<16x32xf32> to vector<16x32xbf16>
    %c0_87 = arith.constant 0 : index
    %c0_88 = arith.constant 0 : index
    %c256 = arith.constant 256 : index
    %198 = vector.load %arg13[%c0_87, %c0_88, %c256] : memref<1x16x288xbf16, #tpu.memory_space<vmem>>, vector<1x16x32xbf16>
    %199 = vector.shape_cast %198 : vector<1x16x32xbf16> to vector<16x32xbf16>
    %200 = vector.shape_cast %197 : vector<16x32xbf16> to vector<1x16x32xbf16>
    tpu.vector_store %arg13[%c0_87, %c0_88, %c256], %200 {strides = array<i32>} : memref<1x16x288xbf16, #tpu.memory_space<vmem>>, vector<1x16x32xbf16>,
    %201 = arith.mulf %7, %58 : vector<8x32xf32>
    %202 = arith.mulf %7, %64 : vector<8x32xf32>
    %203 = arith.mulf %7, %152 : vector<8x32xf32>
    %204 = arith.mulf %7, %157 : vector<8x32xf32>
    %205 = arith.truncf %7 : vector<8x32xf32> to vector<8x32xbf16>
    %c0_89 = arith.constant 0 : index
    %c0_90 = arith.constant 0 : index
    %c0_91 = arith.constant 0 : index
    %206 = vector.load %arg14[%c0_89, %c0_90, %c0_91] : memref<1x8x288xbf16, #tpu.memory_space<vmem>>, vector<1x8x32xbf16>
    %207 = vector.shape_cast %206 : vector<1x8x32xbf16> to vector<8x32xbf16>
    %208 = vector.shape_cast %205 : vector<8x32xbf16> to vector<1x8x32xbf16>
    tpu.vector_store %arg14[%c0_89, %c0_90, %c0_91], %208 {strides = array<i32>} : memref<1x8x288xbf16, #tpu.memory_space<vmem>>, vector<1x8x32xbf16>,
    %209 = arith.truncf %58 : vector<8x32xf32> to vector<8x32xbf16>
    %c0_92 = arith.constant 0 : index
    %c0_93 = arith.constant 0 : index
    %c32_94 = arith.constant 32 : index
    %210 = vector.load %arg14[%c0_92, %c0_93, %c32_94] : memref<1x8x288xbf16, #tpu.memory_space<vmem>>, vector<1x8x32xbf16>
    %211 = vector.shape_cast %210 : vector<1x8x32xbf16> to vector<8x32xbf16>
    %212 = vector.shape_cast %209 : vector<8x32xbf16> to vector<1x8x32xbf16>
    tpu.vector_store %arg14[%c0_92, %c0_93, %c32_94], %212 {strides = array<i32>} : memref<1x8x288xbf16, #tpu.memory_space<vmem>>, vector<1x8x32xbf16>,
    %213 = arith.truncf %64 : vector<8x32xf32> to vector<8x32xbf16>
    %c0_95 = arith.constant 0 : index
    %c0_96 = arith.constant 0 : index
    %c64_97 = arith.constant 64 : index
    %214 = vector.load %arg14[%c0_95, %c0_96, %c64_97] : memref<1x8x288xbf16, #tpu.memory_space<vmem>>, vector<1x8x32xbf16>
    %215 = vector.shape_cast %214 : vector<1x8x32xbf16> to vector<8x32xbf16>
    %216 = vector.shape_cast %213 : vector<8x32xbf16> to vector<1x8x32xbf16>
    tpu.vector_store %arg14[%c0_95, %c0_96, %c64_97], %216 {strides = array<i32>} : memref<1x8x288xbf16, #tpu.memory_space<vmem>>, vector<1x8x32xbf16>,
    %217 = arith.truncf %201 : vector<8x32xf32> to vector<8x32xbf16>
    %c0_98 = arith.constant 0 : index
    %c0_99 = arith.constant 0 : index
    %c96_100 = arith.constant 96 : index
    %218 = vector.load %arg14[%c0_98, %c0_99, %c96_100] : memref<1x8x288xbf16, #tpu.memory_space<vmem>>, vector<1x8x32xbf16>
    %219 = vector.shape_cast %218 : vector<1x8x32xbf16> to vector<8x32xbf16>
    %220 = vector.shape_cast %217 : vector<8x32xbf16> to vector<1x8x32xbf16>
    tpu.vector_store %arg14[%c0_98, %c0_99, %c96_100], %220 {strides = array<i32>} : memref<1x8x288xbf16, #tpu.memory_space<vmem>>, vector<1x8x32xbf16>,
    %221 = arith.truncf %202 : vector<8x32xf32> to vector<8x32xbf16>
    %c0_101 = arith.constant 0 : index
    %c0_102 = arith.constant 0 : index
    %c128_103 = arith.constant 128 : index
    %222 = vector.load %arg14[%c0_101, %c0_102, %c128_103] : memref<1x8x288xbf16, #tpu.memory_space<vmem>>, vector<1x8x32xbf16>
    %223 = vector.shape_cast %222 : vector<1x8x32xbf16> to vector<8x32xbf16>
    %224 = vector.shape_cast %221 : vector<8x32xbf16> to vector<1x8x32xbf16>
    tpu.vector_store %arg14[%c0_101, %c0_102, %c128_103], %224 {strides = array<i32>} : memref<1x8x288xbf16, #tpu.memory_space<vmem>>, vector<1x8x32xbf16>,
    %225 = arith.truncf %152 : vector<8x32xf32> to vector<8x32xbf16>
    %c0_104 = arith.constant 0 : index
    %c0_105 = arith.constant 0 : index
    %c160_106 = arith.constant 160 : index
    %226 = vector.load %arg14[%c0_104, %c0_105, %c160_106] : memref<1x8x288xbf16, #tpu.memory_space<vmem>>, vector<1x8x32xbf16>
    %227 = vector.shape_cast %226 : vector<1x8x32xbf16> to vector<8x32xbf16>
    %228 = vector.shape_cast %225 : vector<8x32xbf16> to vector<1x8x32xbf16>
    tpu.vector_store %arg14[%c0_104, %c0_105, %c160_106], %228 {strides = array<i32>} : memref<1x8x288xbf16, #tpu.memory_space<vmem>>, vector<1x8x32xbf16>,
    %229 = arith.truncf %157 : vector<8x32xf32> to vector<8x32xbf16>
    %c0_107 = arith.constant 0 : index
    %c0_108 = arith.constant 0 : index
    %c192_109 = arith.constant 192 : index
    %230 = vector.load %arg14[%c0_107, %c0_108, %c192_109] : memref<1x8x288xbf16, #tpu.memory_space<vmem>>, vector<1x8x32xbf16>
    %231 = vector.shape_cast %230 : vector<1x8x32xbf16> to vector<8x32xbf16>
    %232 = vector.shape_cast %229 : vector<8x32xbf16> to vector<1x8x32xbf16>
    tpu.vector_store %arg14[%c0_107, %c0_108, %c192_109], %232 {strides = array<i32>} : memref<1x8x288xbf16, #tpu.memory_space<vmem>>, vector<1x8x32xbf16>,
    %233 = arith.truncf %203 : vector<8x32xf32> to vector<8x32xbf16>
    %c0_110 = arith.constant 0 : index
    %c0_111 = arith.constant 0 : index
    %c224_112 = arith.constant 224 : index
    %234 = vector.load %arg14[%c0_110, %c0_111, %c224_112] : memref<1x8x288xbf16, #tpu.memory_space<vmem>>, vector<1x8x32xbf16>
    %235 = vector.shape_cast %234 : vector<1x8x32xbf16> to vector<8x32xbf16>
    %236 = vector.shape_cast %233 : vector<8x32xbf16> to vector<1x8x32xbf16>
    tpu.vector_store %arg14[%c0_110, %c0_111, %c224_112], %236 {strides = array<i32>} : memref<1x8x288xbf16, #tpu.memory_space<vmem>>, vector<1x8x32xbf16>,
    %237 = arith.truncf %204 : vector<8x32xf32> to vector<8x32xbf16>
    %c0_113 = arith.constant 0 : index
    %c0_114 = arith.constant 0 : index
    %c256_115 = arith.constant 256 : index
    %238 = vector.load %arg14[%c0_113, %c0_114, %c256_115] : memref<1x8x288xbf16, #tpu.memory_space<vmem>>, vector<1x8x32xbf16>
    %239 = vector.shape_cast %238 : vector<1x8x32xbf16> to vector<8x32xbf16>
    %240 = vector.shape_cast %237 : vector<8x32xbf16> to vector<1x8x32xbf16>
    tpu.vector_store %arg14[%c0_113, %c0_114, %c256_115], %240 {strides = array<i32>} : memref<1x8x288xbf16, #tpu.memory_space<vmem>>, vector<1x8x32xbf16>,
    %241 = arith.mulf %8, %106 : vector<8x32xf32>
    %242 = arith.mulf %8, %112 : vector<8x32xf32>
    %243 = arith.mulf %8, %154 : vector<8x32xf32>
    %244 = arith.mulf %8, %160 : vector<8x32xf32>
    %245 = arith.truncf %8 : vector<8x32xf32> to vector<8x32xbf16>
    %c0_116 = arith.constant 0 : index
    %c0_117 = arith.constant 0 : index
    %c0_118 = arith.constant 0 : index
    %246 = vector.load %arg15[%c0_116, %c0_117, %c0_118] : memref<1x8x288xbf16, #tpu.memory_space<vmem>>, vector<1x8x32xbf16>
    %247 = vector.shape_cast %246 : vector<1x8x32xbf16> to vector<8x32xbf16>
    %248 = vector.shape_cast %245 : vector<8x32xbf16> to vector<1x8x32xbf16>
    tpu.vector_store %arg15[%c0_116, %c0_117, %c0_118], %248 {strides = array<i32>} : memref<1x8x288xbf16, #tpu.memory_space<vmem>>, vector<1x8x32xbf16>,
    %249 = arith.truncf %106 : vector<8x32xf32> to vector<8x32xbf16>
    %c0_119 = arith.constant 0 : index
    %c0_120 = arith.constant 0 : index
    %c32_121 = arith.constant 32 : index
    %250 = vector.load %arg15[%c0_119, %c0_120, %c32_121] : memref<1x8x288xbf16, #tpu.memory_space<vmem>>, vector<1x8x32xbf16>
    %251 = vector.shape_cast %250 : vector<1x8x32xbf16> to vector<8x32xbf16>
    %252 = vector.shape_cast %249 : vector<8x32xbf16> to vector<1x8x32xbf16>
    tpu.vector_store %arg15[%c0_119, %c0_120, %c32_121], %252 {strides = array<i32>} : memref<1x8x288xbf16, #tpu.memory_space<vmem>>, vector<1x8x32xbf16>,
    %253 = arith.truncf %112 : vector<8x32xf32> to vector<8x32xbf16>
    %c0_122 = arith.constant 0 : index
    %c0_123 = arith.constant 0 : index
    %c64_124 = arith.constant 64 : index
    %254 = vector.load %arg15[%c0_122, %c0_123, %c64_124] : memref<1x8x288xbf16, #tpu.memory_space<vmem>>, vector<1x8x32xbf16>
    %255 = vector.shape_cast %254 : vector<1x8x32xbf16> to vector<8x32xbf16>
    %256 = vector.shape_cast %253 : vector<8x32xbf16> to vector<1x8x32xbf16>
    tpu.vector_store %arg15[%c0_122, %c0_123, %c64_124], %256 {strides = array<i32>} : memref<1x8x288xbf16, #tpu.memory_space<vmem>>, vector<1x8x32xbf16>,
    %257 = arith.truncf %241 : vector<8x32xf32> to vector<8x32xbf16>
    %c0_125 = arith.constant 0 : index
    %c0_126 = arith.constant 0 : index
    %c96_127 = arith.constant 96 : index
    %258 = vector.load %arg15[%c0_125, %c0_126, %c96_127] : memref<1x8x288xbf16, #tpu.memory_space<vmem>>, vector<1x8x32xbf16>
    %259 = vector.shape_cast %258 : vector<1x8x32xbf16> to vector<8x32xbf16>
    %260 = vector.shape_cast %257 : vector<8x32xbf16> to vector<1x8x32xbf16>
    tpu.vector_store %arg15[%c0_125, %c0_126, %c96_127], %260 {strides = array<i32>} : memref<1x8x288xbf16, #tpu.memory_space<vmem>>, vector<1x8x32xbf16>,
    %261 = arith.truncf %242 : vector<8x32xf32> to vector<8x32xbf16>
    %c0_128 = arith.constant 0 : index
    %c0_129 = arith.constant 0 : index
    %c128_130 = arith.constant 128 : index
    %262 = vector.load %arg15[%c0_128, %c0_129, %c128_130] : memref<1x8x288xbf16, #tpu.memory_space<vmem>>, vector<1x8x32xbf16>
    %263 = vector.shape_cast %262 : vector<1x8x32xbf16> to vector<8x32xbf16>
    %264 = vector.shape_cast %261 : vector<8x32xbf16> to vector<1x8x32xbf16>
    tpu.vector_store %arg15[%c0_128, %c0_129, %c128_130], %264 {strides = array<i32>} : memref<1x8x288xbf16, #tpu.memory_space<vmem>>, vector<1x8x32xbf16>,
    %265 = arith.truncf %154 : vector<8x32xf32> to vector<8x32xbf16>
    %c0_131 = arith.constant 0 : index
    %c0_132 = arith.constant 0 : index
    %c160_133 = arith.constant 160 : index
    %266 = vector.load %arg15[%c0_131, %c0_132, %c160_133] : memref<1x8x288xbf16, #tpu.memory_space<vmem>>, vector<1x8x32xbf16>
    %267 = vector.shape_cast %266 : vector<1x8x32xbf16> to vector<8x32xbf16>
    %268 = vector.shape_cast %265 : vector<8x32xbf16> to vector<1x8x32xbf16>
    tpu.vector_store %arg15[%c0_131, %c0_132, %c160_133], %268 {strides = array<i32>} : memref<1x8x288xbf16, #tpu.memory_space<vmem>>, vector<1x8x32xbf16>,
    %269 = arith.truncf %160 : vector<8x32xf32> to vector<8x32xbf16>
    %c0_134 = arith.constant 0 : index
    %c0_135 = arith.constant 0 : index
    %c192_136 = arith.constant 192 : index
    %270 = vector.load %arg15[%c0_134, %c0_135, %c192_136] : memref<1x8x288xbf16, #tpu.memory_space<vmem>>, vector<1x8x32xbf16>
    %271 = vector.shape_cast %270 : vector<1x8x32xbf16> to vector<8x32xbf16>
    %272 = vector.shape_cast %269 : vector<8x32xbf16> to vector<1x8x32xbf16>
    tpu.vector_store %arg15[%c0_134, %c0_135, %c192_136], %272 {strides = array<i32>} : memref<1x8x288xbf16, #tpu.memory_space<vmem>>, vector<1x8x32xbf16>,
    %273 = arith.truncf %243 : vector<8x32xf32> to vector<8x32xbf16>
    %c0_137 = arith.constant 0 : index
    %c0_138 = arith.constant 0 : index
    %c224_139 = arith.constant 224 : index
    %274 = vector.load %arg15[%c0_137, %c0_138, %c224_139] : memref<1x8x288xbf16, #tpu.memory_space<vmem>>, vector<1x8x32xbf16>
    %275 = vector.shape_cast %274 : vector<1x8x32xbf16> to vector<8x32xbf16>
    %276 = vector.shape_cast %273 : vector<8x32xbf16> to vector<1x8x32xbf16>
    tpu.vector_store %arg15[%c0_137, %c0_138, %c224_139], %276 {strides = array<i32>} : memref<1x8x288xbf16, #tpu.memory_space<vmem>>, vector<1x8x32xbf16>,
    %277 = arith.truncf %244 : vector<8x32xf32> to vector<8x32xbf16>
    %c0_140 = arith.constant 0 : index
    %c0_141 = arith.constant 0 : index
    %c256_142 = arith.constant 256 : index
    %278 = vector.load %arg15[%c0_140, %c0_141, %c256_142] : memref<1x8x288xbf16, #tpu.memory_space<vmem>>, vector<1x8x32xbf16>
    %279 = vector.shape_cast %278 : vector<1x8x32xbf16> to vector<8x32xbf16>
    %280 = vector.shape_cast %277 : vector<8x32xbf16> to vector<1x8x32xbf16>
    tpu.vector_store %arg15[%c0_140, %c0_141, %c256_142], %280 {strides = array<i32>} : memref<1x8x288xbf16, #tpu.memory_space<vmem>>, vector<1x8x32xbf16>,
    return
  }
  func.func @transform_0(%arg0: i32) -> (i32, i32, i32) {
    %c0_i32 = arith.constant 0 : i32
    %c0_i32_0 = arith.constant 0 : i32
    %c0_i32_1 = arith.constant 0 : i32
    return %arg0, %c0_i32, %c0_i32_0 : i32, i32, i32
  }
  func.func @transform_1(%arg0: i32) -> (i32, i32, i32) {
    %c0_i32 = arith.constant 0 : i32
    %c0_i32_0 = arith.constant 0 : i32
    %c0_i32_1 = arith.constant 0 : i32
    return %arg0, %c0_i32, %c0_i32_0 : i32, i32, i32
  }
  func.func @transform_2(%arg0: i32) -> (i32, i32, i32) {
    %c0_i32 = arith.constant 0 : i32
    %c0_i32_0 = arith.constant 0 : i32
    %c0_i32_1 = arith.constant 0 : i32
    return %arg0, %c0_i32, %c0_i32_0 : i32, i32, i32
  }
  func.func @transform_3(%arg0: i32) -> (i32, i32, i32) {
    %c0_i32 = arith.constant 0 : i32
    %c0_i32_0 = arith.constant 0 : i32
    %c0_i32_1 = arith.constant 0 : i32
    return %arg0, %c0_i32, %c0_i32_0 : i32, i32, i32
  }
  func.func @transform_4(%arg0: i32) -> (i32, i32, i32) {
    %c0_i32 = arith.constant 0 : i32
    %c0_i32_0 = arith.constant 0 : i32
    %c0_i32_1 = arith.constant 0 : i32
    return %arg0, %c0_i32, %c0_i32_0 : i32, i32, i32
  }
  func.func @transform_5(%arg0: i32) -> (i32, i32, i32) {
    %c0_i32 = arith.constant 0 : i32
    %c0_i32_0 = arith.constant 0 : i32
    %c0_i32_1 = arith.constant 0 : i32
    return %arg0, %c0_i32, %c0_i32_0 : i32, i32, i32
  }
  func.func @transform_6(%arg0: i32) -> (i32, i32, i32) {
    %c0_i32 = arith.constant 0 : i32
    %c0_i32_0 = arith.constant 0 : i32
    %c0_i32_1 = arith.constant 0 : i32
    return %arg0, %c0_i32, %c0_i32_0 : i32, i32, i32
  }
  func.func @transform_7(%arg0: i32) -> (i32, i32, i32) {
    %c0_i32 = arith.constant 0 : i32
    %c0_i32_0 = arith.constant 0 : i32
    %c0_i32_1 = arith.constant 0 : i32
    return %arg0, %c0_i32, %c0_i32_0 : i32, i32, i32
  }
  func.func @transform_8(%arg0: i32) -> (i32, i32, i32) {
    %c0_i32 = arith.constant 0 : i32
    %c0_i32_0 = arith.constant 0 : i32
    %c0_i32_1 = arith.constant 0 : i32
    return %arg0, %c0_i32, %c0_i32_0 : i32, i32, i32
  }
  func.func @transform_9(%arg0: i32) -> (i32, i32) {
    %c0_i32 = arith.constant 0 : i32
    %c0_i32_0 = arith.constant 0 : i32
    %c0_i32_1 = arith.constant 0 : i32
    return %c0_i32, %c0_i32_0 : i32, i32
  }
  func.func @transform_10(%arg0: i32) -> (i32, i32) {
    %c0_i32 = arith.constant 0 : i32
    %c0_i32_0 = arith.constant 0 : i32
    %c0_i32_1 = arith.constant 0 : i32
    return %c0_i32, %c0_i32_0 : i32, i32
  }
  func.func @transform_11(%arg0: i32) -> (i32, i32) {
    %c0_i32 = arith.constant 0 : i32
    %c0_i32_0 = arith.constant 0 : i32
    %c0_i32_1 = arith.constant 0 : i32
    return %c0_i32, %c0_i32_0 : i32, i32
  }
  func.func @transform_12(%arg0: i32) -> (i32, i32, i32) {
    %c0_i32 = arith.constant 0 : i32
    %c0_i32_0 = arith.constant 0 : i32
    %c0_i32_1 = arith.constant 0 : i32
    return %arg0, %c0_i32, %c0_i32_0 : i32, i32, i32
  }
  func.func @transform_13(%arg0: i32) -> (i32, i32, i32) {
    %c0_i32 = arith.constant 0 : i32
    %c0_i32_0 = arith.constant 0 : i32
    %c0_i32_1 = arith.constant 0 : i32
    return %arg0, %c0_i32, %c0_i32_0 : i32, i32, i32
  }
  func.func @transform_14(%arg0: i32) -> (i32, i32, i32) {
    %c0_i32 = arith.constant 0 : i32
    %c0_i32_0 = arith.constant 0 : i32
    %c0_i32_1 = arith.constant 0 : i32
    return %arg0, %c0_i32, %c0_i32_0 : i32, i32, i32
  }
}

module attributes {stable_mosaic.version = 11 : i64} {
  func.func @_encoder_layer_kernel(%arg0: i32, %arg1: memref<1x8x288xbf16, #tpu.memory_space<vmem>>, %arg2: memref<1x1x8xf32, #tpu.memory_space<vmem>>, %arg3: memref<288x32xbf16, #tpu.memory_space<vmem>>, %arg4: memref<32x96xbf16, #tpu.memory_space<vmem>>, %arg5: memref<32x32xbf16, #tpu.memory_space<vmem>>, %arg6: memref<32x64xbf16, #tpu.memory_space<vmem>>, %arg7: memref<64x32xbf16, #tpu.memory_space<vmem>>, %arg8: memref<9x96xf32, #tpu.memory_space<vmem>>, %arg9: memref<1x8x32xf32, #tpu.memory_space<vmem>>) attributes {dimension_semantics = [#tpu.dimension_semantics<parallel>], iteration_bounds = array<i64: 2>, scalar_prefetch = 0 : i64, scratch_operands = 0 : i64, tpu.core_type = #tpu.core_type<tc>, window_params = [{transform_indices = @transform_0, window_bounds = array<i64: 1, 8, 288>}, {transform_indices = @transform_1, window_bounds = array<i64: 1, 1, 8>}, {pipeline_mode = #tpu.pipeline_mode<synchronous>, transform_indices = @transform_2, window_bounds = array<i64: 288, 32>}, {pipeline_mode = #tpu.pipeline_mode<synchronous>, transform_indices = @transform_3, window_bounds = array<i64: 32, 96>}, {pipeline_mode = #tpu.pipeline_mode<synchronous>, transform_indices = @transform_4, window_bounds = array<i64: 32, 32>}, {pipeline_mode = #tpu.pipeline_mode<synchronous>, transform_indices = @transform_5, window_bounds = array<i64: 32, 64>}, {pipeline_mode = #tpu.pipeline_mode<synchronous>, transform_indices = @transform_6, window_bounds = array<i64: 64, 32>}, {pipeline_mode = #tpu.pipeline_mode<synchronous>, transform_indices = @transform_7, window_bounds = array<i64: 9, 96>}, {transform_indices = @transform_8, window_bounds = array<i64: 1, 8, 32>}]} {
    %c0 = arith.constant 0 : index
    %c0_0 = arith.constant 0 : index
    %c0_1 = arith.constant 0 : index
    %0 = vector.load %arg1[%c0, %c0_0, %c0_1] : memref<1x8x288xbf16, #tpu.memory_space<vmem>>, vector<1x8x288xbf16>
    %1 = vector.shape_cast %0 : vector<1x8x288xbf16> to vector<8x288xbf16>
    %c0_2 = arith.constant 0 : index
    %c0_3 = arith.constant 0 : index
    %c0_4 = arith.constant 0 : index
    %2 = vector.load %arg2[%c0_2, %c0_3, %c0_4] : memref<1x1x8xf32, #tpu.memory_space<vmem>>, vector<1x1x8xf32>
    %3 = vector.shape_cast %2 : vector<1x1x8xf32> to vector<1x8xf32>
    %c0_5 = arith.constant 0 : index
    %c0_6 = arith.constant 0 : index
    %4 = vector.load %arg8[%c0_5, %c0_6] : memref<9x96xf32, #tpu.memory_space<vmem>>, vector<9x96xf32>
    %5 = vector.extract_strided_slice %4 {offsets = [0, 0], sizes = [1, 96], strides = [1, 1]} : vector<9x96xf32> to vector<1x96xf32>
    %6 = vector.extract_strided_slice %4 {offsets = [1, 0], sizes = [1, 32], strides = [1, 1]} : vector<9x96xf32> to vector<1x32xf32>
    %7 = vector.extract_strided_slice %4 {offsets = [2, 0], sizes = [1, 64], strides = [1, 1]} : vector<9x96xf32> to vector<1x64xf32>
    %8 = vector.extract_strided_slice %4 {offsets = [3, 0], sizes = [1, 32], strides = [1, 1]} : vector<9x96xf32> to vector<1x32xf32>
    %9 = vector.extract_strided_slice %4 {offsets = [4, 0], sizes = [1, 32], strides = [1, 1]} : vector<9x96xf32> to vector<1x32xf32>
    %10 = vector.extract_strided_slice %4 {offsets = [5, 0], sizes = [1, 32], strides = [1, 1]} : vector<9x96xf32> to vector<1x32xf32>
    %11 = vector.extract_strided_slice %4 {offsets = [6, 0], sizes = [1, 32], strides = [1, 1]} : vector<9x96xf32> to vector<1x32xf32>
    %12 = vector.extract_strided_slice %4 {offsets = [7, 0], sizes = [1, 32], strides = [1, 1]} : vector<9x96xf32> to vector<1x32xf32>
    %c0_7 = arith.constant 0 : index
    %c0_8 = arith.constant 0 : index
    %13 = vector.load %arg3[%c0_7, %c0_8] : memref<288x32xbf16, #tpu.memory_space<vmem>>, vector<288x32xbf16>
    %cst = arith.constant dense<0.000000e+00> : vector<8x32xf32>
    %14 = tpu.matmul %1, %13, %cst {dimension_numbers = #tpu.dot_dimension_numbers<[1], [0], [0], [1], [0, 0, 1, 1], [], []>} : vector<8x288xbf16>, vector<288x32xbf16>, vector<8x32xf32> -> vector<8x32xf32>
    %15 = vector.extract_strided_slice %4 {offsets = [8, 0], sizes = [1, 32], strides = [1, 1]} : vector<9x96xf32> to vector<1x32xf32>
    %16 = vector.broadcast %15 : vector<1x32xf32> to vector<8x32xf32>
    %17 = arith.addf %14, %16 : vector<8x32xf32>
    %c0_9 = arith.constant 0 : index
    %c0_10 = arith.constant 0 : index
    %18 = vector.load %arg4[%c0_9, %c0_10] : memref<32x96xbf16, #tpu.memory_space<vmem>>, vector<32x96xbf16>
    %19 = arith.truncf %17 : vector<8x32xf32> to vector<8x32xbf16>
    %cst_11 = arith.constant dense<0.000000e+00> : vector<8x96xf32>
    %20 = tpu.matmul %19, %18, %cst_11 {dimension_numbers = #tpu.dot_dimension_numbers<[1], [0], [0], [1], [0, 0, 1, 1], [], []>} : vector<8x32xbf16>, vector<32x96xbf16>, vector<8x96xf32> -> vector<8x96xf32>
    %21 = vector.broadcast %5 : vector<1x96xf32> to vector<8x96xf32>
    %22 = arith.addf %20, %21 : vector<8x96xf32>
    %c0_12 = arith.constant 0 : index
    %c0_13 = arith.constant 0 : index
    %23 = vector.load %arg5[%c0_12, %c0_13] : memref<32x32xbf16, #tpu.memory_space<vmem>>, vector<32x32xbf16>
    %24 = vector.extract_strided_slice %22 {offsets = [0, 0], sizes = [8, 8], strides = [1, 1]} : vector<8x96xf32> to vector<8x8xf32>
    %25 = vector.extract_strided_slice %22 {offsets = [0, 32], sizes = [8, 8], strides = [1, 1]} : vector<8x96xf32> to vector<8x8xf32>
    %26 = vector.extract_strided_slice %22 {offsets = [0, 64], sizes = [8, 8], strides = [1, 1]} : vector<8x96xf32> to vector<8x8xf32>
    %27 = arith.truncf %24 : vector<8x8xf32> to vector<8x8xbf16>
    %28 = arith.truncf %25 : vector<8x8xf32> to vector<8x8xbf16>
    %cst_14 = arith.constant dense<0.000000e+00> : vector<8x8xf32>
    %29 = tpu.matmul %27, %28, %cst_14 {dimension_numbers = #tpu.dot_dimension_numbers<[1], [1], [0], [0], [0, 0, 1, 0], [], []>} : vector<8x8xbf16>, vector<8x8xbf16>, vector<8x8xf32> -> vector<8x8xf32>
    %cst_15 = arith.constant 0.353553385 : f32
    %30 = vector.broadcast %cst_15 : f32 to vector<8x8xf32>
    %31 = arith.mulf %29, %30 : vector<8x8xf32>
    %cst_16 = arith.constant 0.000000e+00 : f32
    %32 = vector.broadcast %cst_16 : f32 to vector<1x8xf32>
    %33 = arith.cmpf ogt, %3, %32 : vector<1x8xf32>
    %cst_17 = arith.constant -1.000000e+30 : f32
    %34 = vector.shape_cast %33 : vector<1x8xi1> to vector<1x8xi1>
    %35 = vector.broadcast %34 : vector<1x8xi1> to vector<8x8xi1>
    %36 = vector.broadcast %cst_17 : f32 to vector<8x8xf32>
    %37 = arith.select %35, %31, %36 : vector<8x8xi1>, vector<8x8xf32>
    %cst_18 = arith.constant dense<0xFF800000> : vector<8xf32>
    %38 = vector.multi_reduction <maximumf>, %37, %cst_18 [1] : vector<8x8xf32> to vector<8xf32>
    %39 = vector.shape_cast %38 : vector<8xf32> to vector<8x1xf32>
    %40 = vector.broadcast %39 : vector<8x1xf32> to vector<8x8xf32>
    %41 = arith.subf %37, %40 : vector<8x8xf32>
    %42 = math.exp %41 : vector<8x8xf32>
    %cst_19 = arith.constant dense<0.000000e+00> : vector<8xf32>
    %43 = vector.multi_reduction <add>, %42, %cst_19 [1] : vector<8x8xf32> to vector<8xf32>
    %44 = vector.shape_cast %43 : vector<8xf32> to vector<8x1xf32>
    %45 = tpu.reciprocal %44 {approx = true} : vector<8x1xf32> -> vector<8x1xf32>
    %46 = vector.broadcast %45 : vector<8x1xf32> to vector<8x8xf32>
    %47 = arith.mulf %42, %46 : vector<8x8xf32>
    %48 = arith.truncf %47 : vector<8x8xf32> to vector<8x8xbf16>
    %49 = arith.truncf %26 : vector<8x8xf32> to vector<8x8xbf16>
    %cst_20 = arith.constant dense<0.000000e+00> : vector<8x8xf32>
    %50 = tpu.matmul %48, %49, %cst_20 {dimension_numbers = #tpu.dot_dimension_numbers<[1], [0], [0], [1], [0, 0, 1, 1], [], []>} : vector<8x8xbf16>, vector<8x8xbf16>, vector<8x8xf32> -> vector<8x8xf32>
    %51 = vector.extract_strided_slice %23 {offsets = [0, 0], sizes = [8, 32], strides = [1, 1]} : vector<32x32xbf16> to vector<8x32xbf16>
    %52 = arith.truncf %50 : vector<8x8xf32> to vector<8x8xbf16>
    %cst_21 = arith.constant dense<0.000000e+00> : vector<8x32xf32>
    %53 = tpu.matmul %52, %51, %cst_21 {dimension_numbers = #tpu.dot_dimension_numbers<[1], [0], [0], [1], [0, 0, 1, 1], [], []>} : vector<8x8xbf16>, vector<8x32xbf16>, vector<8x32xf32> -> vector<8x32xf32>
    %54 = vector.broadcast %6 : vector<1x32xf32> to vector<8x32xf32>
    %55 = arith.addf %54, %53 : vector<8x32xf32>
    %56 = vector.extract_strided_slice %22 {offsets = [0, 8], sizes = [8, 8], strides = [1, 1]} : vector<8x96xf32> to vector<8x8xf32>
    %57 = vector.extract_strided_slice %22 {offsets = [0, 40], sizes = [8, 8], strides = [1, 1]} : vector<8x96xf32> to vector<8x8xf32>
    %58 = vector.extract_strided_slice %22 {offsets = [0, 72], sizes = [8, 8], strides = [1, 1]} : vector<8x96xf32> to vector<8x8xf32>
    %59 = arith.truncf %56 : vector<8x8xf32> to vector<8x8xbf16>
    %60 = arith.truncf %57 : vector<8x8xf32> to vector<8x8xbf16>
    %cst_22 = arith.constant dense<0.000000e+00> : vector<8x8xf32>
    %61 = tpu.matmul %59, %60, %cst_22 {dimension_numbers = #tpu.dot_dimension_numbers<[1], [1], [0], [0], [0, 0, 1, 0], [], []>} : vector<8x8xbf16>, vector<8x8xbf16>, vector<8x8xf32> -> vector<8x8xf32>
    %cst_23 = arith.constant 0.353553385 : f32
    %62 = vector.broadcast %cst_23 : f32 to vector<8x8xf32>
    %63 = arith.mulf %61, %62 : vector<8x8xf32>
    %cst_24 = arith.constant 0.000000e+00 : f32
    %64 = vector.broadcast %cst_24 : f32 to vector<1x8xf32>
    %65 = arith.cmpf ogt, %3, %64 : vector<1x8xf32>
    %cst_25 = arith.constant -1.000000e+30 : f32
    %66 = vector.shape_cast %65 : vector<1x8xi1> to vector<1x8xi1>
    %67 = vector.broadcast %66 : vector<1x8xi1> to vector<8x8xi1>
    %68 = vector.broadcast %cst_25 : f32 to vector<8x8xf32>
    %69 = arith.select %67, %63, %68 : vector<8x8xi1>, vector<8x8xf32>
    %cst_26 = arith.constant dense<0xFF800000> : vector<8xf32>
    %70 = vector.multi_reduction <maximumf>, %69, %cst_26 [1] : vector<8x8xf32> to vector<8xf32>
    %71 = vector.shape_cast %70 : vector<8xf32> to vector<8x1xf32>
    %72 = vector.broadcast %71 : vector<8x1xf32> to vector<8x8xf32>
    %73 = arith.subf %69, %72 : vector<8x8xf32>
    %74 = math.exp %73 : vector<8x8xf32>
    %cst_27 = arith.constant dense<0.000000e+00> : vector<8xf32>
    %75 = vector.multi_reduction <add>, %74, %cst_27 [1] : vector<8x8xf32> to vector<8xf32>
    %76 = vector.shape_cast %75 : vector<8xf32> to vector<8x1xf32>
    %77 = tpu.reciprocal %76 {approx = true} : vector<8x1xf32> -> vector<8x1xf32>
    %78 = vector.broadcast %77 : vector<8x1xf32> to vector<8x8xf32>
    %79 = arith.mulf %74, %78 : vector<8x8xf32>
    %80 = arith.truncf %79 : vector<8x8xf32> to vector<8x8xbf16>
    %81 = arith.truncf %58 : vector<8x8xf32> to vector<8x8xbf16>
    %cst_28 = arith.constant dense<0.000000e+00> : vector<8x8xf32>
    %82 = tpu.matmul %80, %81, %cst_28 {dimension_numbers = #tpu.dot_dimension_numbers<[1], [0], [0], [1], [0, 0, 1, 1], [], []>} : vector<8x8xbf16>, vector<8x8xbf16>, vector<8x8xf32> -> vector<8x8xf32>
    %83 = vector.extract_strided_slice %23 {offsets = [8, 0], sizes = [8, 32], strides = [1, 1]} : vector<32x32xbf16> to vector<8x32xbf16>
    %84 = arith.truncf %82 : vector<8x8xf32> to vector<8x8xbf16>
    %cst_29 = arith.constant dense<0.000000e+00> : vector<8x32xf32>
    %85 = tpu.matmul %84, %83, %cst_29 {dimension_numbers = #tpu.dot_dimension_numbers<[1], [0], [0], [1], [0, 0, 1, 1], [], []>} : vector<8x8xbf16>, vector<8x32xbf16>, vector<8x32xf32> -> vector<8x32xf32>
    %86 = arith.addf %55, %85 : vector<8x32xf32>
    %87 = vector.extract_strided_slice %22 {offsets = [0, 16], sizes = [8, 8], strides = [1, 1]} : vector<8x96xf32> to vector<8x8xf32>
    %88 = vector.extract_strided_slice %22 {offsets = [0, 48], sizes = [8, 8], strides = [1, 1]} : vector<8x96xf32> to vector<8x8xf32>
    %89 = vector.extract_strided_slice %22 {offsets = [0, 80], sizes = [8, 8], strides = [1, 1]} : vector<8x96xf32> to vector<8x8xf32>
    %90 = arith.truncf %87 : vector<8x8xf32> to vector<8x8xbf16>
    %91 = arith.truncf %88 : vector<8x8xf32> to vector<8x8xbf16>
    %cst_30 = arith.constant dense<0.000000e+00> : vector<8x8xf32>
    %92 = tpu.matmul %90, %91, %cst_30 {dimension_numbers = #tpu.dot_dimension_numbers<[1], [1], [0], [0], [0, 0, 1, 0], [], []>} : vector<8x8xbf16>, vector<8x8xbf16>, vector<8x8xf32> -> vector<8x8xf32>
    %cst_31 = arith.constant 0.353553385 : f32
    %93 = vector.broadcast %cst_31 : f32 to vector<8x8xf32>
    %94 = arith.mulf %92, %93 : vector<8x8xf32>
    %cst_32 = arith.constant 0.000000e+00 : f32
    %95 = vector.broadcast %cst_32 : f32 to vector<1x8xf32>
    %96 = arith.cmpf ogt, %3, %95 : vector<1x8xf32>
    %cst_33 = arith.constant -1.000000e+30 : f32
    %97 = vector.shape_cast %96 : vector<1x8xi1> to vector<1x8xi1>
    %98 = vector.broadcast %97 : vector<1x8xi1> to vector<8x8xi1>
    %99 = vector.broadcast %cst_33 : f32 to vector<8x8xf32>
    %100 = arith.select %98, %94, %99 : vector<8x8xi1>, vector<8x8xf32>
    %cst_34 = arith.constant dense<0xFF800000> : vector<8xf32>
    %101 = vector.multi_reduction <maximumf>, %100, %cst_34 [1] : vector<8x8xf32> to vector<8xf32>
    %102 = vector.shape_cast %101 : vector<8xf32> to vector<8x1xf32>
    %103 = vector.broadcast %102 : vector<8x1xf32> to vector<8x8xf32>
    %104 = arith.subf %100, %103 : vector<8x8xf32>
    %105 = math.exp %104 : vector<8x8xf32>
    %cst_35 = arith.constant dense<0.000000e+00> : vector<8xf32>
    %106 = vector.multi_reduction <add>, %105, %cst_35 [1] : vector<8x8xf32> to vector<8xf32>
    %107 = vector.shape_cast %106 : vector<8xf32> to vector<8x1xf32>
    %108 = tpu.reciprocal %107 {approx = true} : vector<8x1xf32> -> vector<8x1xf32>
    %109 = vector.broadcast %108 : vector<8x1xf32> to vector<8x8xf32>
    %110 = arith.mulf %105, %109 : vector<8x8xf32>
    %111 = arith.truncf %110 : vector<8x8xf32> to vector<8x8xbf16>
    %112 = arith.truncf %89 : vector<8x8xf32> to vector<8x8xbf16>
    %cst_36 = arith.constant dense<0.000000e+00> : vector<8x8xf32>
    %113 = tpu.matmul %111, %112, %cst_36 {dimension_numbers = #tpu.dot_dimension_numbers<[1], [0], [0], [1], [0, 0, 1, 1], [], []>} : vector<8x8xbf16>, vector<8x8xbf16>, vector<8x8xf32> -> vector<8x8xf32>
    %114 = vector.extract_strided_slice %23 {offsets = [16, 0], sizes = [8, 32], strides = [1, 1]} : vector<32x32xbf16> to vector<8x32xbf16>
    %115 = arith.truncf %113 : vector<8x8xf32> to vector<8x8xbf16>
    %cst_37 = arith.constant dense<0.000000e+00> : vector<8x32xf32>
    %116 = tpu.matmul %115, %114, %cst_37 {dimension_numbers = #tpu.dot_dimension_numbers<[1], [0], [0], [1], [0, 0, 1, 1], [], []>} : vector<8x8xbf16>, vector<8x32xbf16>, vector<8x32xf32> -> vector<8x32xf32>
    %117 = arith.addf %86, %116 : vector<8x32xf32>
    %118 = vector.extract_strided_slice %22 {offsets = [0, 24], sizes = [8, 8], strides = [1, 1]} : vector<8x96xf32> to vector<8x8xf32>
    %119 = vector.extract_strided_slice %22 {offsets = [0, 56], sizes = [8, 8], strides = [1, 1]} : vector<8x96xf32> to vector<8x8xf32>
    %120 = vector.extract_strided_slice %22 {offsets = [0, 88], sizes = [8, 8], strides = [1, 1]} : vector<8x96xf32> to vector<8x8xf32>
    %121 = arith.truncf %118 : vector<8x8xf32> to vector<8x8xbf16>
    %122 = arith.truncf %119 : vector<8x8xf32> to vector<8x8xbf16>
    %cst_38 = arith.constant dense<0.000000e+00> : vector<8x8xf32>
    %123 = tpu.matmul %121, %122, %cst_38 {dimension_numbers = #tpu.dot_dimension_numbers<[1], [1], [0], [0], [0, 0, 1, 0], [], []>} : vector<8x8xbf16>, vector<8x8xbf16>, vector<8x8xf32> -> vector<8x8xf32>
    %cst_39 = arith.constant 0.353553385 : f32
    %124 = vector.broadcast %cst_39 : f32 to vector<8x8xf32>
    %125 = arith.mulf %123, %124 : vector<8x8xf32>
    %cst_40 = arith.constant 0.000000e+00 : f32
    %126 = vector.broadcast %cst_40 : f32 to vector<1x8xf32>
    %127 = arith.cmpf ogt, %3, %126 : vector<1x8xf32>
    %cst_41 = arith.constant -1.000000e+30 : f32
    %128 = vector.shape_cast %127 : vector<1x8xi1> to vector<1x8xi1>
    %129 = vector.broadcast %128 : vector<1x8xi1> to vector<8x8xi1>
    %130 = vector.broadcast %cst_41 : f32 to vector<8x8xf32>
    %131 = arith.select %129, %125, %130 : vector<8x8xi1>, vector<8x8xf32>
    %cst_42 = arith.constant dense<0xFF800000> : vector<8xf32>
    %132 = vector.multi_reduction <maximumf>, %131, %cst_42 [1] : vector<8x8xf32> to vector<8xf32>
    %133 = vector.shape_cast %132 : vector<8xf32> to vector<8x1xf32>
    %134 = vector.broadcast %133 : vector<8x1xf32> to vector<8x8xf32>
    %135 = arith.subf %131, %134 : vector<8x8xf32>
    %136 = math.exp %135 : vector<8x8xf32>
    %cst_43 = arith.constant dense<0.000000e+00> : vector<8xf32>
    %137 = vector.multi_reduction <add>, %136, %cst_43 [1] : vector<8x8xf32> to vector<8xf32>
    %138 = vector.shape_cast %137 : vector<8xf32> to vector<8x1xf32>
    %139 = tpu.reciprocal %138 {approx = true} : vector<8x1xf32> -> vector<8x1xf32>
    %140 = vector.broadcast %139 : vector<8x1xf32> to vector<8x8xf32>
    %141 = arith.mulf %136, %140 : vector<8x8xf32>
    %142 = arith.truncf %141 : vector<8x8xf32> to vector<8x8xbf16>
    %143 = arith.truncf %120 : vector<8x8xf32> to vector<8x8xbf16>
    %cst_44 = arith.constant dense<0.000000e+00> : vector<8x8xf32>
    %144 = tpu.matmul %142, %143, %cst_44 {dimension_numbers = #tpu.dot_dimension_numbers<[1], [0], [0], [1], [0, 0, 1, 1], [], []>} : vector<8x8xbf16>, vector<8x8xbf16>, vector<8x8xf32> -> vector<8x8xf32>
    %145 = vector.extract_strided_slice %23 {offsets = [24, 0], sizes = [8, 32], strides = [1, 1]} : vector<32x32xbf16> to vector<8x32xbf16>
    %146 = arith.truncf %144 : vector<8x8xf32> to vector<8x8xbf16>
    %cst_45 = arith.constant dense<0.000000e+00> : vector<8x32xf32>
    %147 = tpu.matmul %146, %145, %cst_45 {dimension_numbers = #tpu.dot_dimension_numbers<[1], [0], [0], [1], [0, 0, 1, 1], [], []>} : vector<8x8xbf16>, vector<8x32xbf16>, vector<8x32xf32> -> vector<8x32xf32>
    %148 = arith.addf %117, %147 : vector<8x32xf32>
    %149 = arith.addf %17, %148 : vector<8x32xf32>
    %cst_46 = arith.constant dense<0.000000e+00> : vector<8xf32>
    %150 = vector.multi_reduction <add>, %149, %cst_46 [1] : vector<8x32xf32> to vector<8xf32>
    %151 = vector.shape_cast %150 : vector<8xf32> to vector<8x1xf32>
    %cst_47 = arith.constant 3.200000e+01 : f32
    %152 = vector.broadcast %cst_47 : f32 to vector<8x1xf32>
    %153 = arith.divf %151, %152 : vector<8x1xf32>
    %154 = vector.broadcast %153 : vector<8x1xf32> to vector<8x32xf32>
    %155 = arith.subf %149, %154 : vector<8x32xf32>
    %156 = arith.mulf %155, %155 : vector<8x32xf32>
    %cst_48 = arith.constant dense<0.000000e+00> : vector<8xf32>
    %157 = vector.multi_reduction <add>, %156, %cst_48 [1] : vector<8x32xf32> to vector<8xf32>
    %158 = vector.shape_cast %157 : vector<8xf32> to vector<8x1xf32>
    %cst_49 = arith.constant 3.200000e+01 : f32
    %159 = vector.broadcast %cst_49 : f32 to vector<8x1xf32>
    %160 = arith.divf %158, %159 : vector<8x1xf32>
    %161 = vector.broadcast %153 : vector<8x1xf32> to vector<8x32xf32>
    %162 = arith.subf %149, %161 : vector<8x32xf32>
    %cst_50 = arith.constant 9.99999974E-6 : f32
    %163 = vector.broadcast %cst_50 : f32 to vector<8x1xf32>
    %164 = arith.addf %160, %163 : vector<8x1xf32>
    %165 = math.rsqrt %164 : vector<8x1xf32>
    %166 = vector.broadcast %165 : vector<8x1xf32> to vector<8x32xf32>
    %167 = arith.mulf %162, %166 : vector<8x32xf32>
    %168 = vector.broadcast %9 : vector<1x32xf32> to vector<8x32xf32>
    %169 = arith.mulf %167, %168 : vector<8x32xf32>
    %170 = vector.broadcast %10 : vector<1x32xf32> to vector<8x32xf32>
    %171 = arith.addf %169, %170 : vector<8x32xf32>
    %c0_51 = arith.constant 0 : index
    %c0_52 = arith.constant 0 : index
    %172 = vector.load %arg6[%c0_51, %c0_52] : memref<32x64xbf16, #tpu.memory_space<vmem>>, vector<32x64xbf16>
    %173 = arith.truncf %171 : vector<8x32xf32> to vector<8x32xbf16>
    %cst_53 = arith.constant dense<0.000000e+00> : vector<8x64xf32>
    %174 = tpu.matmul %173, %172, %cst_53 {dimension_numbers = #tpu.dot_dimension_numbers<[1], [0], [0], [1], [0, 0, 1, 1], [], []>} : vector<8x32xbf16>, vector<32x64xbf16>, vector<8x64xf32> -> vector<8x64xf32>
    %175 = vector.broadcast %7 : vector<1x64xf32> to vector<8x64xf32>
    %176 = arith.addf %174, %175 : vector<8x64xf32>
    %cst_54 = arith.constant 0.000000e+00 : f32
    %177 = vector.broadcast %cst_54 : f32 to vector<8x64xf32>
    %178 = arith.maximumf %176, %177 : vector<8x64xf32>
    %c0_55 = arith.constant 0 : index
    %c0_56 = arith.constant 0 : index
    %179 = vector.load %arg7[%c0_55, %c0_56] : memref<64x32xbf16, #tpu.memory_space<vmem>>, vector<64x32xbf16>
    %180 = arith.truncf %178 : vector<8x64xf32> to vector<8x64xbf16>
    %cst_57 = arith.constant dense<0.000000e+00> : vector<8x32xf32>
    %181 = tpu.matmul %180, %179, %cst_57 {dimension_numbers = #tpu.dot_dimension_numbers<[1], [0], [0], [1], [0, 0, 1, 1], [], []>} : vector<8x64xbf16>, vector<64x32xbf16>, vector<8x32xf32> -> vector<8x32xf32>
    %182 = vector.broadcast %8 : vector<1x32xf32> to vector<8x32xf32>
    %183 = arith.addf %181, %182 : vector<8x32xf32>
    %184 = arith.addf %171, %183 : vector<8x32xf32>
    %cst_58 = arith.constant dense<0.000000e+00> : vector<8xf32>
    %185 = vector.multi_reduction <add>, %184, %cst_58 [1] : vector<8x32xf32> to vector<8xf32>
    %186 = vector.shape_cast %185 : vector<8xf32> to vector<8x1xf32>
    %cst_59 = arith.constant 3.200000e+01 : f32
    %187 = vector.broadcast %cst_59 : f32 to vector<8x1xf32>
    %188 = arith.divf %186, %187 : vector<8x1xf32>
    %189 = vector.broadcast %188 : vector<8x1xf32> to vector<8x32xf32>
    %190 = arith.subf %184, %189 : vector<8x32xf32>
    %191 = arith.mulf %190, %190 : vector<8x32xf32>
    %cst_60 = arith.constant dense<0.000000e+00> : vector<8xf32>
    %192 = vector.multi_reduction <add>, %191, %cst_60 [1] : vector<8x32xf32> to vector<8xf32>
    %193 = vector.shape_cast %192 : vector<8xf32> to vector<8x1xf32>
    %cst_61 = arith.constant 3.200000e+01 : f32
    %194 = vector.broadcast %cst_61 : f32 to vector<8x1xf32>
    %195 = arith.divf %193, %194 : vector<8x1xf32>
    %196 = vector.broadcast %188 : vector<8x1xf32> to vector<8x32xf32>
    %197 = arith.subf %184, %196 : vector<8x32xf32>
    %cst_62 = arith.constant 9.99999974E-6 : f32
    %198 = vector.broadcast %cst_62 : f32 to vector<8x1xf32>
    %199 = arith.addf %195, %198 : vector<8x1xf32>
    %200 = math.rsqrt %199 : vector<8x1xf32>
    %201 = vector.broadcast %200 : vector<8x1xf32> to vector<8x32xf32>
    %202 = arith.mulf %197, %201 : vector<8x32xf32>
    %203 = vector.broadcast %11 : vector<1x32xf32> to vector<8x32xf32>
    %204 = arith.mulf %202, %203 : vector<8x32xf32>
    %205 = vector.broadcast %12 : vector<1x32xf32> to vector<8x32xf32>
    %206 = arith.addf %204, %205 : vector<8x32xf32>
    %c0_63 = arith.constant 0 : index
    %c0_64 = arith.constant 0 : index
    %c0_65 = arith.constant 0 : index
    %207 = vector.load %arg9[%c0_63, %c0_64, %c0_65] : memref<1x8x32xf32, #tpu.memory_space<vmem>>, vector<1x8x32xf32>
    %208 = vector.shape_cast %207 : vector<1x8x32xf32> to vector<8x32xf32>
    %209 = vector.shape_cast %206 : vector<8x32xf32> to vector<1x8x32xf32>
    tpu.vector_store %arg9[%c0_63, %c0_64, %c0_65], %209 {strides = array<i32>} : memref<1x8x32xf32, #tpu.memory_space<vmem>>, vector<1x8x32xf32>,
    return
  }
  func.func @transform_0(%arg0: i32) -> (i32, i32, i32) {
    %c0_i32 = arith.constant 0 : i32
    %c0_i32_0 = arith.constant 0 : i32
    %c0_i32_1 = arith.constant 0 : i32
    return %arg0, %c0_i32, %c0_i32_0 : i32, i32, i32
  }
  func.func @transform_1(%arg0: i32) -> (i32, i32, i32) {
    %c0_i32 = arith.constant 0 : i32
    %c0_i32_0 = arith.constant 0 : i32
    %c0_i32_1 = arith.constant 0 : i32
    return %arg0, %c0_i32, %c0_i32_0 : i32, i32, i32
  }
  func.func @transform_2(%arg0: i32) -> (i32, i32) {
    %c0_i32 = arith.constant 0 : i32
    %c0_i32_0 = arith.constant 0 : i32
    %c0_i32_1 = arith.constant 0 : i32
    return %c0_i32, %c0_i32_0 : i32, i32
  }
  func.func @transform_3(%arg0: i32) -> (i32, i32) {
    %c0_i32 = arith.constant 0 : i32
    %c0_i32_0 = arith.constant 0 : i32
    %c0_i32_1 = arith.constant 0 : i32
    return %c0_i32, %c0_i32_0 : i32, i32
  }
  func.func @transform_4(%arg0: i32) -> (i32, i32) {
    %c0_i32 = arith.constant 0 : i32
    %c0_i32_0 = arith.constant 0 : i32
    %c0_i32_1 = arith.constant 0 : i32
    return %c0_i32, %c0_i32_0 : i32, i32
  }
  func.func @transform_5(%arg0: i32) -> (i32, i32) {
    %c0_i32 = arith.constant 0 : i32
    %c0_i32_0 = arith.constant 0 : i32
    %c0_i32_1 = arith.constant 0 : i32
    return %c0_i32, %c0_i32_0 : i32, i32
  }
  func.func @transform_6(%arg0: i32) -> (i32, i32) {
    %c0_i32 = arith.constant 0 : i32
    %c0_i32_0 = arith.constant 0 : i32
    %c0_i32_1 = arith.constant 0 : i32
    return %c0_i32, %c0_i32_0 : i32, i32
  }
  func.func @transform_7(%arg0: i32) -> (i32, i32) {
    %c0_i32 = arith.constant 0 : i32
    %c0_i32_0 = arith.constant 0 : i32
    %c0_i32_1 = arith.constant 0 : i32
    return %c0_i32, %c0_i32_0 : i32, i32
  }
  func.func @transform_8(%arg0: i32) -> (i32, i32, i32) {
    %c0_i32 = arith.constant 0 : i32
    %c0_i32_0 = arith.constant 0 : i32
    %c0_i32_1 = arith.constant 0 : i32
    return %arg0, %c0_i32, %c0_i32_0 : i32, i32, i32
  }
}

</mosaic_0001>

<bundles_post_ra>
// kernel: streader_forward.5
= control target key start
LH: loop header
LB: loop body
LE: loop exit
PB: predicated region body
PF: predicated region fallthrough
CT: control target
= control target key end

     0   :  { %s1809_s27 = smov 0   ;;  %s2056_s0 = inlined_call_operand.vmem [shape: f32[6,16,32], index: 0, kind: input, shape index: {}]   ;;  %s2057_s1 = inlined_call_operand.vmem [shape: f32[6,1,16], index: 1, kind: input, shape index: {}]   ;;  %s2058_s2 = inlined_call_operand.vmem [shape: bf16[32,32], index: 2, kind: input, shape index: {}]   ;;  %s2059_s3 = inlined_call_operand.vmem [shape: bf16[32,96], index: 3, kind: input, shape index: {}]   ;;  %s2060_s4 = inlined_call_operand.vmem [shape: bf16[32,32], index: 4, kind: input, shape index: {}]   ;;  %s2061_s5 = inlined_call_operand.vmem [shape: bf16[32,64], index: 5, kind: input, shape index: {}]   ;;  %s2062_s6 = inlined_call_operand.vmem [shape: bf16[64,32], index: 6, kind: input, shape index: {}]   ;;  %s2063_s7 = inlined_call_operand.vmem [shape: f32[9,96], index: 7, kind: input, shape index: {}]   ;;  %s2064_s8 = inlined_call_operand.vmem [shape: bf16[6,16,32], index: 8, kind: output, shape index: {}]  }
   0x1 LB: > { %s1480_s28 = sadd.s32 4294967295, %s1748_s27   ;;  %p1484_p0 = scmp.ge.s32.totalorder %s1748_s27, 1  ;;  %s1748_s27 = sphi %s1809_s27, %s18_s27  }
   0x2   : > { %p270_p1 = scmp.lt.s32.totalorder %s1748_s27, 7 }
   0x4   : > { %p271_p2 = pnand %p1484_p0, %p270_p1 }
   0x5   : > { %v1692_v0 = vld [vmem:[%s2058_s2] sm:$0xff] (!%p271_p2)   ;;  %v1750_v1 = vmov (!%p271_p2), 0.0   ;;  %v1693_v2 = vld [vmem:[%s2058_s2 + $0x8] sm:$0xff] (!%p271_p2)   ;;  %vm1751_vm0 = vmmov (!%p271_p2), 0   ;;  %p307_p3 = scmp.lt.s32.totalorder (!%p271_p2), %s1480_s28, 5  ;;  %vm347_vm1 = vcmask (!%p271_p2), 261120   ;;  %v397_v16 = vlaneseq (!%p271_p2) }
   0x6   : > { %274 = sbr.rel (%p271_p2) target bundleno = 4249 (0x1099), region = 52  ;;  %1562 = vmatprep.subr.bf16.mxu0 (!%p271_p2), %v1750_v1  ;;  %1570 = vmatprep.subr.bf16.mxu1 (!%p271_p2), %v1750_v1  ;;  %v1694_v6 = vld [vmem:[%s2059_s3] sm:$0xff] (!%p271_p2)   ;;  %v1695_v7 = vld [vmem:[%s2059_s3 + $0x8] sm:$0xff] (!%p271_p2)   ;;  %s1752_s23 = smov (!%p271_p2), 96   ;;  %vm465_vm2 = vcmask (!%p271_p2), 64512   ;;  %v1753_v31 = vmov (!%p271_p2), 0  }
   0x7   : > { %1563 = vmatpush3.bf16.msra.mxu0 (!%p271_p2), %v1692_v0  ;;  %1566 = vmatprep.mubr.msk.bf16.mxu0 (!%p271_p2), %vm1751_vm0, %v1750_v1  ;;  %v1489_v8 = vld [vmem:[%s2063_s7 + $0x8] ss:$0 sm:$0xff] (!%p271_p2)  ;;  %v1860_v17 = vshrl.u32 (!%p271_p2), %v397_v16, 7  ;;  %v1866_v19 = vld [vmem:[%s2063_s7] sm:$0xff] (!%p271_p2)  ;;  %vm524_vm5 = vcmask (!%p271_p2), 130048   ;;  %s1754_s29 = smov (!%p271_p2), 64  }
   0x8   : > { %1564 = vmatprep.subr.bf16.mxu0 (!%p271_p2), %v1750_v1  ;;  %1574 = vmatprep.mubr.msk.bf16.mxu1 (!%p271_p2), %vm1751_vm0, %v1750_v1  ;;  %s1755_s30 = smov (!%p271_p2), 88   ;;  %s1756_s9 = smov (!%p271_p2), 120   ;;  %vm599_vm6 = vcmask (!%p271_p2), 1043456   ;;  %vm1320_vm7 = vcmask (!%p271_p2), 523264   ;;  %vm1413_vm8 = vcmask (!%p271_p2), 257024  }
   0x9   : > { %1571 = vmatpush3.bf16.msra.mxu1 (!%p271_p2), %v1694_v6  ;;  %v399_v18 = vsub.s32 (!%p271_p2), 0, %v1860_v17  ;;  %s1757_s12 = smov (!%p271_p2), 56   ;;  %s1758_s13 = smov (!%p271_p2), 80  }
   0xa   : > { %1572 = vmatprep.subr.bf16.mxu1 (!%p271_p2), %v1750_v1  ;;  %s1760_s17 = smov (!%p271_p2), 48   ;;  %s1761_s18 = smov (!%p271_p2), 72  }
   0xb   : > { %1565 = vmatpush3.bf16.msra.mxu0 (!%p271_p2), %v1693_v2  ;;  %v400_v20 = vrot.slane (!%p271_p2), %v1866_v19, %v399_v18  ;;  %v457_v2 = vld [vmem:[%s2060_s4] sm:$0xf] (!%p271_p2)  ;;  %s1762_s19 = smov (!%p271_p2), 104   ;;  %s1763_s22 = smov (!%p271_p2), 40  }
   0xc   : > { %1578 = vmatprep.subr.bf16.mxu0 (!%p271_p2), %v1750_v1 }
   0xd   : > { %s2066_s28 = smov (!%p307_p3, %s1480_s28), 5  ;;  %1573 = vmatpush3.bf16.msra.mxu1 %v1695_v7 }
   0xe   : > { %s1520_s11 = sshll.u32 %s2066_s28, 4  ;;  %1584 = vmatprep.subr.bf16.mxu1 %v1750_v1  ;;  %s314_s26 = scalar_lea.vmem %s2057_s1, %s2066_s28 }
   0xf   : > { %s311_s14 = scalar_lea.vmem %s2056_s0, %s1520_s11  ;;  %v323_v30 = vld [vmem:[%s314_s26] sm:$0x1] }
  0x10   : > { %v321_v3 = vld [vmem:[%s311_s14] sm:$0xff]  ;;  %v322_v4 = vld [vmem:[%s311_s14 + $0x8] sm:$0xff]  ;;  %vm515_vm3 = vcmp.gt.f32.partialorder %v323_v30, 0.0  ;;  %s1759_s14 = smov 112  }
  0x11   : > { %v330_v5 = vpack.c.bf16 %v322_v4, %v321_v3  ;;  %v516_v32 = vsel %vm515_vm3, 1, %v1753_v31  ;;  %v601_v3 = vsel %vm599_vm6, %v457_v2, 0 }
  0x12   : > { %v1882_v33 = vrot.slane %v516_v32, %v399_v18 }
  0x13   : > { %1567 = vmatmul.mubr.msk.bf16.vlgmr.msra.gmra.mrb[0].mxu0 %vm347_vm1, %v330_v5 }
  0x14   : > { %1580 = vmatprep.mubr.msk.bf16.mxu0 %vm1751_vm0, %v1750_v1  ;;  %vm521_vm4 = vcmp.eq.s32.totalorder %v1882_v33, 1  ;;  %v460_v33 = vld [vmem:[%s2060_s4 + $0xc] sm:$0xf] }
  0xe6   : > { %v385_v9 = vpop.f32.mrb[0].mxu0 }
  0xe7   : > { %v1568_v10 = vpop.f32.mrb[1].mxu0  ;;  %v1851_v12 = vadd.f32 %v1489_v8, %v385_v9 }
  0xe8   : > { %v388_v11 = vpop.f32.mrb[2].mxu0 }
  0xe9   : > { %v1853_v13 = vadd.f32 %v1489_v8, %v388_v11  ;;  %v1569_v14 = vpop.f32.mrb[3].mxu0 }
  0xeb   : > { %v396_v15 = vpack.c.bf16 %v1853_v13, %v1851_v12 }
  0xed   : > { %1575 = vmatmul.mubr.msk.bf16.vlgmr.msra.gmra.mrb[0].mxu1 %vm347_vm1, %v396_v15 }
  0xee   : > { %1586 = vmatprep.mubr.msk.bf16.mxu1 %vm1751_vm0, %v1750_v1 }
 0x1c0   : > { %v450_v21 = vpop.f32.mrb[0].mxu1 }
 0x1c1   : > { %v1576_v22 = vpop.f32.mrb[1].mxu1  ;;  %v451_v24 = vadd.f32 %v450_v21, %v400_v20 }
 0x1c2   : > { %v453_v23 = vpop.f32.mrb[2].mxu1 }
 0x1c3   : > { %v454_v25 = vadd.f32 %v453_v23, %v400_v20  ;;  %v1577_v26 = vpop.f32.mrb[3].mxu1 }
 0x1c5   : > { %v1869_v27 = vpack.c.bf16 %v454_v25, %v451_v24 }
 0x1c7   : > { %463 = vrot.lane.b32.xlu0 %v1869_v27, %s1752_s23 }
 0x239   : > { %v464_v28 = vpop.permute.xlu0 %463 }
 0x23a   : > { %v470_v29 = vsel %vm465_vm2, %v464_v28, 0 }
 0x23b   : > { %1579 = vmatpush3.bf16.xpose.msra.mxu0 %v470_v29 }
 0x23c   : > { %1590 = vmatprep.subr.bf16.mxu0 %v1750_v1 }
 0x242   : > { %1581 = vmatmul.mubr.msk.bf16.vlgmr.msra.gmra.mrb[4].mxu0 %vm465_vm2, %v1869_v27 }
 0x243   : > { %1592 = vmatprep.mubr.msk.bf16.mxu0 %vm1751_vm0, %v1750_v1  ;;  %1591 = vmatpush3.bf16.msra.mxu0 %v601_v3 }
 0x244   : > { %1602 = vmatprep.subr.bf16.mxu0 %v1750_v1 }
 0x315   : > { %v506_v34 = vpop.f32.mrb[4].mxu0 }
 0x316   : > { %v513_v35 = vmul.f32 0.35355338, %v506_v34  ;;  %v1582_v36 = vpop.f32.mrb[5].mxu0 }
 0x317   : > { %v509_v37 = vpop.f32.mrb[6].mxu0 }
 0x318   : > { %v514_v38 = vmul.f32 0.35355338, %v509_v37  ;;  %v1583_v39 = vpop.f32.mrb[7].mxu0  ;;  %v522_v40 = vsel %vm521_vm4, %v513_v35, -1e+30 }
 0x319   : > { %v525_v41 = vsel %vm524_vm5, %v522_v40, -inf }
 0x31a   : > { %526 = vmax.xlane.f32.xlu0 %v525_v41  ;;  %v523_v42 = vsel %vm521_vm4, %v514_v38, -1e+30 }
 0x31b   : > { %v528_v43 = vsel %vm524_vm5, %v523_v42, -inf }
 0x31c   : > { %529 = vmax.xlane.f32.xlu1 %v528_v43 }
 0x32d   : > { %548 = vrot.lane.b32.xlu1 %v1869_v27, %s1754_s29 }
 0x3a7   : > { %v527_v44 = vpop.xlane.xlu0 %526 }
 0x3a8   : > { %v531_v45 = vsub.f32 %v522_v40, %v527_v44 }
 0x3a9   : > { %v530_v46 = vpop.xlane.xlu1 %529 }
 0x3aa   : > { %v533_v47 = vmul.f32 1.442695, %v531_v45  ;;  %v532_v48 = vsub.f32 %v523_v42, %v530_v46 }
 0x3ac   : > { %1702 = vpow2.f32 %v533_v47  ;;  %v535_v49 = vmul.f32 1.442695, %v532_v48 }
 0x3ad   : > { %v549_v50 = vpop.permute.xlu1 %548 }
 0x3ae   : > { %1704 = vpow2.f32 %v535_v49  ;;  %1585 = vmatpush3.bf16.msra.mxu1 %v549_v50  ;;  %v458_v50 = vld [vmem:[%s2060_s4 + $0x4] sm:$0xf] }
 0x3af   : > { %1596 = vmatprep.subr.bf16.mxu1 %v1750_v1 }
 0x3b6   : > { %v1703_v51 = vpop.eup %1702 }
 0x3b7   : > { %v537_v52 = vsel %vm524_vm5, %v1703_v51, 0.0 }
 0x3b8   : > { %v1705_v53 = vpop.eup %1704  ;;  %538 = vadd.xlane.f32.xlu1 %v537_v52 }
 0x3b9   : > { %v540_v54 = vsel %vm524_vm5, %v1705_v53, 0.0 }
 0x3bc   : > { %541 = vadd.xlane.f32.xlu1 %v540_v54 }
 0x3cd   : > { %652 = vrot.lane.b32.xlu1 %v1869_v27, %s1755_s30 }
 0x3d1   : > { %650 = vrot.lane.b32.xlu1 %v1869_v27, %s1756_s9 }
 0x445   : > { %v539_v55 = vpop.xlane.xlu1 %538 }
 0x446   : > { %1706 = vrcp.f32 %v539_v55 }
 0x449   : > { %v542_v56 = vpop.xlane.xlu1 %541 }
 0x44a   : > { %1708 = vrcp.f32 %v542_v56 }
 0x44d   : > { %v653_v61 = vpop.permute.xlu1 %652 }
 0x44e   : > { %v658_v63 = vsel %vm465_vm2, %v653_v61, 0 }
 0x450   : > { %v1707_v57 = vpop.eup %1706 }
 0x451   : > { %v545_v59 = vmul.f32 %v1707_v57, %v1703_v51  ;;  %v651_v0 = vpop.permute.xlu1 %650  ;;  %v780_v51 = vsel %vm599_vm6, %v458_v50, 0 }
 0x454   : > { %v1709_v58 = vpop.eup %1708 }
 0x455   : > { %v546_v60 = vmul.f32 %v1709_v58, %v1705_v53 }
 0x457   : > { %v547_v62 = vpack.c.bf16 %v546_v60, %v545_v59 }
 0x459   : > { %1587 = vmatmul.mubr.msk.bf16.vlgmr.msra.gmra.mrb[4].mxu1 %vm524_vm5, %v547_v62 }
 0x45a   : > { %1597 = vmatpush3.bf16.xpose.msra.mxu1 %v658_v63  ;;  %1598 = vmatprep.mubr.msk.bf16.mxu1 %vm1751_vm0, %v1750_v1 }
 0x45b   : > { %1608 = vmatprep.subr.bf16.mxu1 %v1750_v1 }
 0x461   : > { %1599 = vmatmul.mubr.msk.bf16.vlgmr.msra.gmra.mrb[8].mxu1 %vm465_vm2, %v651_v0 }
 0x462   : > { %1610 = vmatprep.mubr.msk.bf16.mxu1 %vm1751_vm0, %v1750_v1  ;;  %1609 = vmatpush3.bf16.msra.mxu1 %v780_v51 }
 0x463   : > { %1620 = vmatprep.subr.bf16.mxu1 %v1750_v1 }
 0x52c   : > { %v588_v4 = vpop.f32.mrb[4].mxu1 }
 0x52d   : > { %v1588_v5 = vpop.f32.mrb[5].mxu1 }
 0x52e   : > { %v591_v6 = vpop.f32.mrb[6].mxu1 }
 0x52f   : > { %v595_v7 = vpack.c.bf16 %v591_v6, %v588_v4  ;;  %v1589_v8 = vpop.f32.mrb[7].mxu1 }
 0x531   : > { %1593 = vmatmul.mubr.msk.bf16.vlgmr.msra.gmra.mrb[8].mxu0 %vm465_vm2, %v595_v7 }
 0x532   : > { %1604 = vmatprep.mubr.msk.bf16.mxu0 %vm1751_vm0, %v1750_v1 }
 0x534   : > { %v694_v9 = vpop.f32.mrb[8].mxu1 }
 0x535   : > { %v701_v10 = vmul.f32 0.35355338, %v694_v9  ;;  %v1600_v11 = vpop.f32.mrb[9].mxu1 }
 0x536   : > { %v697_v14 = vpop.f32.mrb[10].mxu1 }
 0x537   : > { %v702_v15 = vmul.f32 0.35355338, %v697_v14  ;;  %v1601_v16 = vpop.f32.mrb[11].mxu1  ;;  %v703_v18 = vsel %vm521_vm4, %v701_v10, -1e+30 }
 0x538   : > { %v705_v20 = vsel %vm524_vm5, %v703_v18, -inf }
 0x539   : > { %706 = vmax.xlane.f32.xlu0 %v705_v20  ;;  %v704_v21 = vsel %vm521_vm4, %v702_v15, -1e+30 }
 0x53a   : > { %v708_v22 = vsel %vm524_vm5, %v704_v21, -inf }
 0x53b   : > { %709 = vmax.xlane.f32.xlu1 %v708_v22 }
 0x54f   : > { %728 = vrot.lane.b32.xlu0 %v1869_v27, %s1757_s12 }
 0x5c6   : > { %v707_v23 = vpop.xlane.xlu0 %706 }
 0x5c7   : > { %v711_v24 = vsub.f32 %v703_v18, %v707_v23  ;;  %v646_v18 = vsub.s32 1, %v1860_v17 }
 0x5c8   : > { %v710_v25 = vpop.xlane.xlu1 %709 }
 0x5c9   : > { %v713_v26 = vmul.f32 1.442695, %v711_v24  ;;  %v712_v28 = vsub.f32 %v704_v21, %v710_v25  ;;  %v647_v20 = vrot.slane %v1866_v19, %v646_v18 }
 0x5ca   : > { %v729_v29 = vpop.permute.xlu0 %728 }
 0x5cb   : > { %1710 = vpow2.f32 %v713_v26  ;;  %v715_v30 = vmul.f32 1.442695, %v712_v28  ;;  %1603 = vmatpush3.bf16.msra.mxu0 %v729_v29 }
 0x5cc   : > { %1614 = vmatprep.subr.bf16.mxu0 %v1750_v1 }
 0x5cd   : > { %1712 = vpow2.f32 %v715_v30 }
 0x5d5   : > { %v1711_v31 = vpop.eup %1710 }
 0x5d6   : > { %v717_v32 = vsel %vm524_vm5, %v1711_v31, 0.0 }
 0x5d7   : > { %v1713_v34 = vpop.eup %1712  ;;  %718 = vadd.xlane.f32.xlu0 %v717_v32 }
 0x5d8   : > { %v720_v35 = vsel %vm524_vm5, %v1713_v34, 0.0 }
 0x5db   : > { %721 = vadd.xlane.f32.xlu0 %v720_v35 }
 0x5f1   : > { %827 = vrot.lane.b32.xlu0 %v1869_v27, %s1758_s13 }
 0x5f5   : > { %825 = vrot.lane.b32.xlu0 %v1869_v27, %s1759_s14 }
 0x604   : > { %v1925_v36 = vpop.f32.mrb[8].mxu0 }
 0x605   : > { %v1594_v37 = vpop.f32.mrb[9].mxu0  ;;  %v648_v21 = vadd.f32 %v647_v20, %v1925_v36 }
 0x606   : > { %v1927_v38 = vpop.f32.mrb[10].mxu0 }
 0x607   : > { %v1595_v39 = vpop.f32.mrb[11].mxu0  ;;  %v649_v23 = vadd.f32 %v647_v20, %v1927_v38 }
 0x664   : > { %v719_v40 = vpop.xlane.xlu0 %718 }
 0x665   : > { %1714 = vrcp.f32 %v719_v40 }
 0x668   : > { %v722_v41 = vpop.xlane.xlu0 %721 }
 0x669   : > { %1716 = vrcp.f32 %v722_v41  ;;  %v459_v41 = vld [vmem:[%s2060_s4 + $0x8] sm:$0xf] }
 0x66c   : > { %v828_v46 = vpop.permute.xlu0 %827 }
 0x66d   : > { %v833_v48 = vsel %vm465_vm2, %v828_v46, 0 }
 0x66f   : > { %v1715_v42 = vpop.eup %1714 }
 0x670   : > { %v725_v44 = vmul.f32 %v1715_v42, %v1711_v31  ;;  %v826_v49 = vpop.permute.xlu0 %825  ;;  %v955_v42 = vsel %vm599_vm6, %v459_v41, 0 }
 0x673   : > { %v1717_v43 = vpop.eup %1716 }
 0x674   : > { %v726_v45 = vmul.f32 %v1717_v43, %v1713_v34 }
 0x676   : > { %v727_v47 = vpack.c.bf16 %v726_v45, %v725_v44 }
 0x678   : > { %1605 = vmatmul.mubr.msk.bf16.vlgmr.msra.gmra.mrb[12].mxu0 %vm524_vm5, %v727_v47 }
 0x679   : > { %1615 = vmatpush3.bf16.xpose.msra.mxu0 %v833_v48  ;;  %1616 = vmatprep.mubr.msk.bf16.mxu0 %vm1751_vm0, %v1750_v1 }
 0x67a   : > { %1626 = vmatprep.subr.bf16.mxu0 %v1750_v1 }
 0x680   : > { %1617 = vmatmul.mubr.msk.bf16.vlgmr.msra.gmra.mrb[16].mxu0 %vm465_vm2, %v826_v49 }
 0x681   : > { %1628 = vmatprep.mubr.msk.bf16.mxu0 %vm1751_vm0, %v1750_v1  ;;  %1627 = vmatpush3.bf16.msra.mxu0 %v955_v42 }
 0x682   : > { %1638 = vmatprep.subr.bf16.mxu0 %v1750_v1 }
 0x74b   : > { %v768_v52 = vpop.f32.mrb[12].mxu0 }
 0x74c   : > { %v1606_v53 = vpop.f32.mrb[13].mxu0 }
 0x74d   : > { %v771_v54 = vpop.f32.mrb[14].mxu0 }
 0x74e   : > { %v775_v55 = vpack.c.bf16 %v771_v54, %v768_v52  ;;  %v1607_v56 = vpop.f32.mrb[15].mxu0 }
 0x750   : > { %1611 = vmatmul.mubr.msk.bf16.vlgmr.msra.gmra.mrb[12].mxu1 %vm465_vm2, %v775_v55 }
 0x751   : > { %1622 = vmatprep.mubr.msk.bf16.mxu1 %vm1751_vm0, %v1750_v1 }
 0x753   : > { %v869_v57 = vpop.f32.mrb[16].mxu0 }
 0x754   : > { %v876_v58 = vmul.f32 0.35355338, %v869_v57  ;;  %v1618_v59 = vpop.f32.mrb[17].mxu0 }
 0x755   : > { %v872_v60 = vpop.f32.mrb[18].mxu0 }
 0x756   : > { %v877_v61 = vmul.f32 0.35355338, %v872_v60  ;;  %v1619_v62 = vpop.f32.mrb[19].mxu0  ;;  %v878_v63 = vsel %vm521_vm4, %v876_v58, -1e+30 }
 0x757   : > { %v880_v0 = vsel %vm524_vm5, %v878_v63, -inf }
 0x758   : > { %881 = vmax.xlane.f32.xlu1 %v880_v0  ;;  %v879_v2 = vsel %vm521_vm4, %v877_v61, -1e+30 }
 0x759   : > { %v883_v3 = vsel %vm524_vm5, %v879_v2, -inf }
 0x75a   : > { %884 = vmax.xlane.f32.xlu0 %v883_v3 }
 0x769   : > { %903 = vrot.lane.b32.xlu1 %v1869_v27, %s1760_s17  ;;  %s1521_s17 = sshll.u32 %s2066_s28, 3 }
 0x76a   : > { %s319_s20 = scalar_lea.vmem %s2064_s8, %s1521_s17 }
 0x7e5   : > { %v882_v4 = vpop.xlane.xlu1 %881 }
 0x7e6   : > { %v886_v5 = vsub.f32 %v878_v63, %v882_v4 }
 0x7e7   : > { %v885_v6 = vpop.xlane.xlu0 %884 }
 0x7e8   : > { %v888_v7 = vmul.f32 1.442695, %v886_v5  ;;  %v887_v8 = vsub.f32 %v879_v2, %v885_v6  ;;  %v1130_v5 = vsel %vm599_vm6, %v460_v33, 0 }
 0x7e9   : > { %v904_v9 = vpop.permute.xlu1 %903 }
 0x7ea   : > { %1718 = vpow2.f32 %v888_v7  ;;  %v890_v10 = vmul.f32 1.442695, %v887_v8  ;;  %1621 = vmatpush3.bf16.msra.mxu1 %v904_v9 }
 0x7eb   : > { %1632 = vmatprep.subr.bf16.mxu1 %v1750_v1 }
 0x7ec   : > { %1720 = vpow2.f32 %v890_v10 }
 0x7f4   : > { %v1719_v11 = vpop.eup %1718 }
 0x7f5   : > { %v892_v14 = vsel %vm524_vm5, %v1719_v11, 0.0 }
 0x7f6   : > { %v1721_v15 = vpop.eup %1720  ;;  %893 = vadd.xlane.f32.xlu1 %v892_v14 }
 0x7f7   : > { %v895_v16 = vsel %vm524_vm5, %v1721_v15, 0.0 }
 0x7fa   : > { %896 = vadd.xlane.f32.xlu1 %v895_v16 }
 0x80b   : > { %1002 = vrot.lane.b32.xlu1 %v1869_v27, %s1761_s18 }
 0x80f   : > { %1000 = vrot.lane.b32.xlu1 %v1869_v27, %s1762_s19 }
 0x823   : > { %v816_v22 = vpop.f32.mrb[12].mxu1 }
 0x824   : > { %v1961_v24 = vadd.f32 %v816_v22, %v648_v21  ;;  %v1612_v25 = vpop.f32.mrb[13].mxu1 }
 0x825   : > { %v819_v26 = vpop.f32.mrb[14].mxu1 }
 0x826   : > { %v1963_v28 = vadd.f32 %v819_v26, %v649_v23  ;;  %v1613_v29 = vpop.f32.mrb[15].mxu1 }
 0x883   : > { %v894_v30 = vpop.xlane.xlu1 %893 }
 0x884   : > { %1722 = vrcp.f32 %v894_v30 }
 0x887   : > { %v897_v31 = vpop.xlane.xlu1 %896 }
 0x888   : > { %1724 = vrcp.f32 %v897_v31 }
 0x88b   : > { %v1003_v39 = vpop.permute.xlu1 %1002 }
 0x88c   : > { %v1008_v40 = vsel %vm465_vm2, %v1003_v39, 0 }
 0x88e   : > { %v1723_v32 = vpop.eup %1722 }
 0x88f   : > { %v900_v35 = vmul.f32 %v1723_v32, %v1719_v11  ;;  %v1001_v38 = vpop.permute.xlu1 %1000 }
 0x892   : > { %v1725_v34 = vpop.eup %1724 }
 0x893   : > { %v901_v37 = vmul.f32 %v1725_v34, %v1721_v15 }
 0x895   : > { %v902_v36 = vpack.c.bf16 %v901_v37, %v900_v35 }
 0x897   : > { %1623 = vmatmul.mubr.msk.bf16.vlgmr.msra.gmra.mrb[16].mxu1 %vm524_vm5, %v902_v36 }
 0x898   : > { %1633 = vmatpush3.bf16.xpose.msra.mxu1 %v1008_v40  ;;  %1634 = vmatprep.mubr.msk.bf16.mxu1 %vm1751_vm0, %v1750_v1 }
 0x899   : > { %1644 = vmatprep.subr.bf16.mxu1 %v1750_v1 }
 0x89f   : > { %1635 = vmatmul.mubr.msk.bf16.vlgmr.msra.gmra.mrb[20].mxu1 %vm465_vm2, %v1001_v38 }
 0x8a0   : > { %1646 = vmatprep.mubr.msk.bf16.mxu1 %vm1751_vm0, %v1750_v1  ;;  %1645 = vmatpush3.bf16.msra.mxu1 %v1130_v5 }
 0x8a1   : > { %1658 = vmatprep.subr.bf16.mxu1 %v1750_v1 }
 0x96a   : > { %v943_v43 = vpop.f32.mrb[16].mxu1 }
 0x96b   : > { %v1624_v44 = vpop.f32.mrb[17].mxu1 }
 0x96c   : > { %v946_v45 = vpop.f32.mrb[18].mxu1 }
 0x96d   : > { %v950_v46 = vpack.c.bf16 %v946_v45, %v943_v43  ;;  %v1625_v47 = vpop.f32.mrb[19].mxu1 }
 0x96f   : > { %1629 = vmatmul.mubr.msk.bf16.vlgmr.msra.gmra.mrb[20].mxu0 %vm465_vm2, %v950_v46 }
 0x970   : > { %1640 = vmatprep.mubr.msk.bf16.mxu0 %vm1751_vm0, %v1750_v1 }
 0x972   : > { %v1044_v48 = vpop.f32.mrb[20].mxu1 }
 0x973   : > { %v1051_v49 = vmul.f32 0.35355338, %v1044_v48  ;;  %v1636_v50 = vpop.f32.mrb[21].mxu1 }
 0x974   : > { %v1047_v51 = vpop.f32.mrb[22].mxu1  ;;  %v1698_v50 = vld [vmem:[%s2062_s6] sm:$0xff]  }
 0x975   : > { %v1052_v52 = vmul.f32 0.35355338, %v1047_v51  ;;  %v1637_v53 = vpop.f32.mrb[23].mxu1  ;;  %v1053_v54 = vsel %vm521_vm4, %v1051_v49, -1e+30  ;;  %v1697_v49 = vld [vmem:[%s2061_s5 + $0x8] sm:$0xff]  }
 0x976   : > { %v1055_v55 = vsel %vm524_vm5, %v1053_v54, -inf  ;;  %v1699_v51 = vld [vmem:[%s2062_s6 + $0x8] sm:$0xff]  }
 0x977   : > { %1056 = vmax.xlane.f32.xlu0 %v1055_v55  ;;  %v1054_v56 = vsel %vm521_vm4, %v1052_v52, -1e+30 }
 0x978   : > { %v1058_v57 = vsel %vm524_vm5, %v1054_v56, -inf }
 0x979   : > { %1059 = vmax.xlane.f32.xlu1 %v1058_v57 }
 0xa04   : > { %v1057_v58 = vpop.xlane.xlu0 %1056 }
 0xa05   : > { %v1061_v59 = vsub.f32 %v1053_v54, %v1057_v58  ;;  %v1206_v58 = vsub.s32 4, %v1860_v17 }
 0xa06   : > { %v1060_v60 = vpop.xlane.xlu1 %1059 }
 0xa07   : > { %v1063_v61 = vmul.f32 1.442695, %v1061_v59  ;;  %v1062_v62 = vsub.f32 %v1054_v56, %v1060_v60  ;;  %v1207_v60 = vrot.slane %v1866_v19, %v1206_v58 }
 0xa09   : > { %1726 = vpow2.f32 %v1063_v61  ;;  %v1065_v63 = vmul.f32 1.442695, %v1062_v62  ;;  %v1212_v62 = vsub.s32 5, %v1860_v17 }
 0xa0b   : > { %1728 = vpow2.f32 %v1065_v63 }
 0xa13   : > { %v1727_v0 = vpop.eup %1726 }
 0xa14   : > { %v1067_v2 = vsel %vm524_vm5, %v1727_v0, 0.0 }
 0xa15   : > { %v1729_v3 = vpop.eup %1728  ;;  %1068 = vadd.xlane.f32.xlu0 %v1067_v2 }
 0xa16   : > { %v1070_v4 = vsel %vm524_vm5, %v1729_v3, 0.0 }
 0xa19   : > { %1071 = vadd.xlane.f32.xlu0 %v1070_v4 }
 0xa2f   : > { %1078 = vrot.lane.b32.xlu0 %v1869_v27, %s1763_s22 }
 0xa42   : > { %v991_v6 = vpop.f32.mrb[20].mxu0 }
 0xa43   : > { %v998_v7 = vadd.f32 %v991_v6, %v1961_v24  ;;  %v1630_v8 = vpop.f32.mrb[21].mxu0 }
 0xa44   : > { %v994_v9 = vpop.f32.mrb[22].mxu0  ;;  %v1701_v8 = vld [vmem:[%s2062_s6 + $0x18] sm:$0xff]  }
 0xa45   : > { %v999_v10 = vadd.f32 %v994_v9, %v1963_v28  ;;  %v1631_v11 = vpop.f32.mrb[23].mxu0  ;;  %v1223_v9 = vsub.s32 2, %v1860_v17 }
 0xaa2   : > { %v1069_v14 = vpop.xlane.xlu0 %1068 }
 0xaa3   : > { %1730 = vrcp.f32 %v1069_v14 }
 0xaa6   : > { %v1072_v27 = vpop.xlane.xlu0 %1071 }
 0xaa7   : > { %1732 = vrcp.f32 %v1072_v27 }
 0xaaa   : > { %v1079_v15 = vpop.permute.xlu0 %1078 }
 0xaab   : > { %1639 = vmatpush3.bf16.msra.mxu0 %v1079_v15 }
 0xaac   : > { %1650 = vmatprep.subr.bf16.mxu0 %v1750_v1 }
 0xaad   : > { %v1731_v16 = vpop.eup %1730 }
 0xaae   : > { %v1075_v20 = vmul.f32 %v1731_v16, %v1727_v0 }
 0xab1   : > { %v1733_v18 = vpop.eup %1732 }
 0xab2   : > { %v1076_v21 = vmul.f32 %v1733_v18, %v1729_v3  ;;  %v1213_v3 = vrot.slane %v1866_v19, %v1212_v62 }
 0xab4   : > { %v1077_v22 = vpack.c.bf16 %v1076_v21, %v1075_v20 }
 0xab6   : > { %1641 = vmatmul.mubr.msk.bf16.vlgmr.msra.gmra.mrb[24].mxu0 %vm524_vm5, %v1077_v22 }
 0xab7   : > { %1654 = vmatprep.mubr.msk.bf16.mxu0 %vm1751_vm0, %v1750_v1 }
 0xb89   : > { %v1118_v23 = vpop.f32.mrb[24].mxu0 }
 0xb8a   : > { %v1642_v24 = vpop.f32.mrb[25].mxu0 }
 0xb8b   : > { %v1121_v25 = vpop.f32.mrb[26].mxu0 }
 0xb8c   : > { %v1125_v26 = vpack.c.bf16 %v1121_v25, %v1118_v23  ;;  %v1643_v28 = vpop.f32.mrb[27].mxu0 }
 0xb8e   : > { %1647 = vmatmul.mubr.msk.bf16.vlgmr.msra.gmra.mrb[24].mxu1 %vm465_vm2, %v1125_v26 }
 0xb8f   : > { %1666 = vmatprep.mubr.msk.bf16.mxu1 %vm1751_vm0, %v1750_v1  ;;  %1659 = vmatpush3.bf16.msra.mxu1 %v1698_v50  ;;  %v1395_v50 = vsub.s32 6, %v1860_v17 }
 0xb90   : > { %1660 = vmatprep.subr.bf16.mxu1 %v1750_v1 }
 0xb93   : > { %1661 = vmatpush3.bf16.msra.mxu1 %v1699_v51  ;;  %v1401_v51 = vsub.s32 7, %v1860_v17 }
 0xb94   : > { %1662 = vmatprep.subr.bf16.mxu1 %v1750_v1 }
 0xc61   : > { %v1166_v29 = vpop.f32.mrb[24].mxu1 }
 0xc62   : > { %v1173_v30 = vadd.f32 %v1166_v29, %v998_v7  ;;  %v1648_v31 = vpop.f32.mrb[25].mxu1  ;;  %v1700_v7 = vld [vmem:[%s2062_s6 + $0x10] sm:$0xff]  }
 0xc63   : > { %v1169_v32 = vpop.f32.mrb[26].mxu1  ;;  %1663 = vmatpush3.bf16.msra.mxu1 %v1700_v7 }
 0xc64   : > { %v1174_v34 = vadd.f32 %v1169_v32, %v999_v10  ;;  %v1649_v35 = vpop.f32.mrb[27].mxu1  ;;  %v1175_v37 = vadd.f32 %v1173_v30, %v1851_v12  ;;  %1664 = vmatprep.subr.bf16.mxu1 %v1750_v1  ;;  %v1224_v10 = vrot.slane %v1866_v19, %v1223_v9 }
 0xc66   : > { %v1177_v39 = vsel %vm347_vm1, %v1175_v37, 0.0  ;;  %v1176_v36 = vadd.f32 %v1174_v34, %v1853_v13  ;;  %v1696_v13 = vld [vmem:[%s2061_s5] sm:$0xff]  }
 0xc67   : > { %1178 = vadd.xlane.f32.xlu0 %v1177_v39  ;;  %1651 = vmatpush3.bf16.msra.mxu0 %v1696_v13 }
 0xc68   : > { %v1180_v40 = vsel %vm347_vm1, %v1176_v36, 0.0  ;;  %1652 = vmatprep.subr.bf16.mxu0 %v1750_v1  ;;  %1665 = vmatpush3.bf16.msra.mxu1 %v1701_v8  ;;  %v1294_v1 = vsub.s32 3, %v1860_v17 }
 0xc69   : > { %1181 = vadd.xlane.f32.xlu1 %v1180_v40 }
 0xc6a   : > { %v1295_v23 = vrot.slane %v1866_v19, %v1294_v1 }
 0xc6b   : > { %1653 = vmatpush3.bf16.msra.mxu0 %v1697_v49 }
 0xcf4   : > { %v1179_v38 = vpop.xlane.xlu0 %1178 }
 0xcf5   : > { %v1184_v41 = vmul.f32 0.03125, %v1179_v38 }
 0xcf6   : > { %v1182_v42 = vpop.xlane.xlu1 %1181 }
 0xcf7   : > { %v1186_v43 = vsub.f32 %v1175_v37, %v1184_v41  ;;  %v1185_v44 = vmul.f32 0.03125, %v1182_v42 }
 0xcf9   : > { %v1187_v45 = vsub.f32 %v1176_v36, %v1185_v44  ;;  %v1188_v46 = vmul.f32 %v1186_v43, %v1186_v43 }
 0xcfb   : > { %v1190_v47 = vsel %vm347_vm1, %v1188_v46, 0.0  ;;  %v1189_v48 = vmul.f32 %v1187_v45, %v1187_v45 }
 0xcfc   : > { %1191 = vadd.xlane.f32.xlu1 %v1190_v47 }
 0xcfd   : > { %v1193_v12 = vsel %vm347_vm1, %v1189_v48, 0.0 }
 0xd00   : > { %1194 = vadd.xlane.f32.xlu1 %v1193_v12 }
 0xd89   : > { %v1192_v52 = vpop.xlane.xlu1 %1191 }
 0xd8a   : > { %v1196_v53 = vmul.f32 0.03125, %v1192_v52  ;;  %v1396_v52 = vrot.slane %v1866_v19, %v1395_v50 }
 0xd8c   : > { %v1198_v54 = vadd.f32 1e-05, %v1196_v53 }
 0xd8d   : > { %v1195_v55 = vpop.xlane.xlu1 %1194 }
 0xd8e   : > { %1734 = vrsqrt.f32 %v1198_v54  ;;  %v1197_v56 = vmul.f32 0.03125, %v1195_v55  ;;  %v1402_v54 = vrot.slane %v1866_v19, %v1401_v51 }
 0xd90   : > { %v1199_v57 = vadd.f32 1e-05, %v1197_v56 }
 0xd92   : > { %1736 = vrsqrt.f32 %v1199_v57 }
 0xd98   : > { %v1735_v59 = vpop.eup %1734 }
 0xd99   : > { %v1202_v61 = vmul.f32 %v1735_v59, %v1186_v43 }
 0xd9b   : > { %v1208_v0 = vmul.f32 %v1207_v60, %v1202_v61 }
 0xd9c   : > { %v1737_v63 = vpop.eup %1736 }
 0xd9d   : > { %v1203_v2 = vmul.f32 %v1737_v63, %v1187_v45  ;;  %v1214_v33 = vadd.f32 %v1213_v3, %v1208_v0 }
 0xd9f   : > { %v1209_v4 = vmul.f32 %v1207_v60, %v1203_v2 }
 0xda1   : > { %v1215_v5 = vadd.f32 %v1213_v3, %v1209_v4 }
 0xda3   : > { %v1220_v6 = vpack.c.bf16 %v1215_v5, %v1214_v33 }
 0xda5   : > { %1655 = vmatmul.mubr.msk.bf16.vlgmr.msra.gmra.mrb[28].mxu0 %vm347_vm1, %v1220_v6 }
 0xe78   : > { %v1274_v11 = vpop.f32.mrb[28].mxu0 }
 0xe79   : > { %v1275_v14 = vadd.f32 %v1274_v11, %v1224_v10  ;;  %v1656_v27 = vpop.f32.mrb[29].mxu0 }
 0xe7a   : > { %v1277_v15 = vpop.f32.mrb[30].mxu0 }
 0xe7b   : > { %v1278_v16 = vadd.f32 %v1277_v15, %v1224_v10  ;;  %v1657_v18 = vpop.f32.mrb[31].mxu0  ;;  %v1281_v20 = vmax.f32 %v1275_v14, 0.0 }
 0xe7d   : > { %v1282_v21 = vmax.f32 %v1278_v16, 0.0 }
 0xe7f   : > { %v1291_v22 = vpack.c.bf16 %v1282_v21, %v1281_v20 }
 0xe81   : > { %1667 = vmatmul.mubr.msk.bf16.vlgmr.msra.gmra.mrb[28].mxu1 %vm1320_vm7, %v1291_v22 }
 0xf54   : > { %v1358_v24 = vpop.f32.mrb[28].mxu1 }
 0xf55   : > { %v1359_v25 = vadd.f32 %v1358_v24, %v1295_v23  ;;  %v1668_v26 = vpop.f32.mrb[29].mxu1 }
 0xf56   : > { %v1361_v28 = vpop.f32.mrb[30].mxu1 }
 0xf57   : > { %v1362_v29 = vadd.f32 %v1361_v28, %v1295_v23  ;;  %v1669_v30 = vpop.f32.mrb[31].mxu1  ;;  %v1365_v31 = vadd.f32 %v1359_v25, %v1214_v33 }
 0xf59   : > { %v1367_v32 = vsel %vm347_vm1, %v1365_v31, 0.0  ;;  %v1366_v34 = vadd.f32 %v1362_v29, %v1215_v5 }
 0xf5a   : > { %1368 = vadd.xlane.f32.xlu1 %v1367_v32 }
 0xf5b   : > { %v1370_v35 = vsel %vm347_vm1, %v1366_v34, 0.0 }
 0xf5e   : > { %1371 = vadd.xlane.f32.xlu1 %v1370_v35 }
 0xfe7   : > { %v1369_v37 = vpop.xlane.xlu1 %1368 }
 0xfe8   : > { %v1373_v39 = vmul.f32 0.03125, %v1369_v37 }
 0xfea   : > { %v1375_v36 = vsub.f32 %v1365_v31, %v1373_v39 }
 0xfeb   : > { %v1372_v40 = vpop.xlane.xlu1 %1371 }
 0xfec   : > { %v1374_v38 = vmul.f32 0.03125, %v1372_v40  ;;  %v1377_v41 = vmul.f32 %v1375_v36, %v1375_v36 }
 0xfee   : > { %v1376_v42 = vsub.f32 %v1366_v34, %v1374_v38  ;;  %v1379_v43 = vsel %vm347_vm1, %v1377_v41, 0.0 }
 0xfef   : > { %1380 = vadd.xlane.f32.xlu1 %v1379_v43 }
 0xff0   : > { %v1378_v44 = vmul.f32 %v1376_v42, %v1376_v42 }
 0xff2   : > { %v1382_v45 = vsel %vm347_vm1, %v1378_v44, 0.0 }
 0xff3   : > { %1383 = vadd.xlane.f32.xlu1 %v1382_v45 }
0x107c   : > { %v1381_v46 = vpop.xlane.xlu1 %1380 }
0x107d   : > { %v1385_v47 = vmul.f32 0.03125, %v1381_v46 }
0x107f   : > { %v1387_v48 = vadd.f32 1e-05, %v1385_v47 }
0x1080   : > { %v1384_v12 = vpop.xlane.xlu1 %1383 }
0x1081   : > { %1738 = vrsqrt.f32 %v1387_v48  ;;  %v1386_v13 = vmul.f32 0.03125, %v1384_v12 }
0x1083   : > { %v1388_v49 = vadd.f32 1e-05, %v1386_v13 }
0x1085   : > { %1740 = vrsqrt.f32 %v1388_v49 }
0x108b   : > { %v1739_v53 = vpop.eup %1738 }
0x108c   : > { %v1391_v55 = vmul.f32 %v1739_v53, %v1375_v36 }
0x108e   : > { %v1397_v56 = vmul.f32 %v1396_v52, %v1391_v55 }
0x108f   : > { %v1741_v57 = vpop.eup %1740 }
0x1090   : > { %v1403_v58 = vadd.f32 %v1402_v54, %v1397_v56  ;;  %v1392_v59 = vmul.f32 %v1741_v57, %v1376_v42 }
0x1092   : > { %v1522_v60 = vpack.c.bf16 %v1403_v58, %v1403_v58  ;;  %v1398_v61 = vmul.f32 %v1396_v52, %v1392_v59 }
0x1094   : > { %1414 = vst.msk [vmem:[%s319_s20] sm:$0xf] %vm1413_vm8, %v1522_v60  ;;  %v1404_v17 = vadd.f32 %v1402_v54, %v1398_v61 }
0x1096   : > { %v1523_v62 = vpack.c.bf16 %v1404_v17, %v1404_v17 }
0x1098   : > { %1415 = vst.msk [vmem:[%s319_s20 + $0x4] sm:$0xf] %vm1413_vm8, %v1523_v62 }
0x1099 PF: > { %s18_s27 = sadd.s32 1, %s1748_s27  }
0x109a   : > { %p15_p4 = scmp.ge.s32.totalorder %s18_s27, 8  }
0x109c   :  { %17 = sbr.rel (!%p15_p4) target bundleno = 1 (0x1), region = 85 }

// kernel: streader_forward.8
= control target key start
LH: loop header
LB: loop body
LE: loop exit
PB: predicated region body
PF: predicated region fallthrough
CT: control target
= control target key end

     0   :  { %13 = vsyncpa [#allocation3], 0  ;;  %s2363_s0 = inlined_call_operand.vmem [shape: bf16[2,8,288], index: 0, kind: input, shape index: {}]   ;;  %s2364_s1 = inlined_call_operand.vmem [shape: f32[2,1,8], index: 1, kind: input, shape index: {}]   ;;  %s2365_s2 = inlined_call_operand.vmem [shape: bf16[288,32], index: 2, kind: input, shape index: {}]   ;;  %s2366_s3 = inlined_call_operand.vmem [shape: bf16[32,96], index: 3, kind: input, shape index: {}]   ;;  %s2367_s4 = inlined_call_operand.vmem [shape: bf16[32,32], index: 4, kind: input, shape index: {}]   ;;  %s2368_s5 = inlined_call_operand.vmem [shape: bf16[32,64], index: 5, kind: input, shape index: {}]   ;;  %s2369_s6 = inlined_call_operand.vmem [shape: bf16[64,32], index: 6, kind: input, shape index: {}]   ;;  %s2370_s7 = inlined_call_operand.vmem [shape: f32[9,96], index: 7, kind: input, shape index: {}]   ;;  %s2371_s8 = inlined_call_operand.hbm [shape: f32[2,8,32], index: 8, kind: output, shape index: {}]  }
   0x1   :  { %15 = vsyncpa [#allocation3 + $0x1], 0  ;;  %s2016_s27 = smov 0   ;;  %s2018_s28 = smov 0  }
   0x2   :  { %s2020_s29 = smov 0   ;;  %s2022_s30 = smov 0  }
   0x3 LB: > { %s2037_s9 = sadd.s32 4294967295, %s1954_s30   ;;  %s1565_s10 = sadd.s32 4294967294, %s1954_s30   ;;  %s1954_s30 = sphi %s2022_s30, %s2377_s30   ;;  %s1950_s29 = sphi %s2020_s29, %s2376_s29   ;;  %s1946_s28 = sphi %s2018_s28, %s2375_s28   ;;  %s1942_s27 = sphi %s2016_s27, %s2374_s27  }
   0x4   : > { %s2041_s11 = sadd.s32 1, %s1954_s30   ;;  %s206_s12 = sadd.s32 1, %s1950_s29 }
   0x5   : > { %s203_s13 = ssub.s32 %s1954_s30, %s2041_s11  ;;  %p216_p0 = scmp.ne.s32.totalorder %s1950_s29, %s1946_s28 }
   0x6   : > { %p204_p1 = scmp.eq.s32.totalorder %s203_s13, 0  ;;  %p217_p2 = scmp.eq.s32.totalorder %s2037_s9, 1 }
   0x7   : > { %p222_p3 = scmp.ne.s32.totalorder %s1946_s28, %s1942_s27  ;;  %p223_p4 = scmp.eq.s32.totalorder %s1565_s10, 1 }
   0x8   : > { %s2052_s14 = scalar_select %p204_p1, %s1950_s29, %s206_s12  }
   0x9   : > { %p2054_p5 = por %p217_p2, %p216_p0  ;;  %p2058_p6 = por %p223_p4, %p222_p3 }
   0xa   : > { %p1568_p7 = scmp.ge.s32.totalorder %s1954_s30, 1  ;;  %p273_p8 = scmp.lt.s32.totalorder %s1954_s30, 3 }
   0xc   : > { %p274_p9 = pnand %p1568_p7, %p273_p8 }
   0xd   : > { %v1843_v0 = vld [vmem:[%s2365_s2 + $0x40] sm:$0xff] (!%p274_p9)   ;;  %v1956_v2 = vmov (!%p274_p9), 0.0   ;;  %p310_p10 = scmp.lt.s32.totalorder (!%p274_p9), %s2037_s9, 1  ;;  %v1845_v3 = vld [vmem:[%s2365_s2 + $0x48] sm:$0xff] (!%p274_p9)   ;;  %vm1957_vm0 = vmmov (!%p274_p9), 0   ;;  %v1847_v5 = vld [vmem:[%s2365_s2 + $0x50] sm:$0xff] (!%p274_p9)   ;;  %v571_v38 = vlaneseq (!%p274_p9) }
   0xe   : > { %277 = sbr.rel (%p274_p9) target bundleno = 4260 (0x10a4), region = 52  ;;  %v1844_v1 = vld [vmem:[%s2365_s2] sm:$0xff] (!%p274_p9)   ;;  %1681 = vmatprep.subr.bf16.mxu1 (!%p274_p9), %v1956_v2  ;;  %1621 = vmatprep.subr.bf16.mxu0 (!%p274_p9), %v1843_v0  ;;  %v1846_v4 = vld [vmem:[%s2365_s2 + $0x8] sm:$0xff] (!%p274_p9)   ;;  %v1848_v6 = vld [vmem:[%s2365_s2 + $0x10] sm:$0xff] (!%p274_p9)   ;;  %vm482_vm1 = vcmask (!%p274_p9), 261120   ;;  %s1958_s18 = smov (!%p274_p9), 64  }
   0xf   : > { %1622 = vmatpush3.bf16.msra.mxu0 (!%p274_p9), %v1844_v1  ;;  %1685 = vmatprep.mubr.msk.bf16.mxu1 (!%p274_p9), %vm1957_vm0, %v1956_v2  ;;  %v1849_v7 = vld [vmem:[%s2365_s2 + $0x58] sm:$0xff] (!%p274_p9)   ;;  %v1851_v9 = vld [vmem:[%s2365_s2 + $0x60] sm:$0xff] (!%p274_p9)   ;;  %v1853_v12 = vld [vmem:[%s2365_s2 + $0x68] sm:$0xff] (!%p274_p9)   ;;  %v2155_v39 = vshrl.u32 (!%p274_p9), %v571_v38, 7  ;;  %s1959_s20 = smov (!%p274_p9), 96   ;;  %vm638_vm2 = vcmask (!%p274_p9), 64512  }
  0x10   : > { %1623 = vmatprep.subr.bf16.mxu0 (!%p274_p9), %v1845_v3  ;;  %v1850_v8 = vld [vmem:[%s2365_s2 + $0x18] sm:$0xff] (!%p274_p9)   ;;  %v1857_v10 = vld [vmem:[%s2365_s2 + $0x80] sm:$0xff] (!%p274_p9)   ;;  %v1854_v13 = vld [vmem:[%s2365_s2 + $0x28] sm:$0xff] (!%p274_p9)   ;;  %vm711_vm3 = vcmask (!%p274_p9), 1043456   ;;  %v1960_v54 = vmov (!%p274_p9), 0   ;;  %s1962_s23 = smov (!%p274_p9), 88  }
  0x11   : > { %v1852_v11 = vld [vmem:[%s2365_s2 + $0x20] sm:$0xff] (!%p274_p9)   ;;  %1682 = vmatpush3.bf16.msra.mxu1 (!%p274_p9), %v1857_v10  ;;  %v1855_v15 = vld [vmem:[%s2365_s2 + $0x70] sm:$0xff] (!%p274_p9)   ;;  %v1863_v18 = vld [vmem:[%s2365_s2 + $0x88] sm:$0xff] (!%p274_p9)   ;;  %v573_v40 = vsub.s32 (!%p274_p9), 0, %v2155_v39  ;;  %s1963_s24 = smov (!%p274_p9), 120   ;;  %s1964_s26 = smov (!%p274_p9), 80  }
  0x12   : > { %1683 = vmatprep.subr.bf16.mxu1 (!%p274_p9), %v1956_v2  ;;  %v1856_v19 = vld [vmem:[%s2365_s2 + $0x30] sm:$0xff] (!%p274_p9)   ;;  %v1858_v20 = vld [vmem:[%s2365_s2 + $0x78] sm:$0xff] (!%p274_p9)   ;;  %v1864_v23 = vld [vmem:[%s2366_s3] sm:$0xff] (!%p274_p9)   ;;  %s1965_s12 = smov (!%p274_p9), 112   ;;  %s1968_s21 = smov (!%p274_p9), 104   ;;  %vm1414_vm6 = vcmask (!%p274_p9), 523264  }
  0x13   : > { %1624 = vmatpush3.bf16.msra.mxu0 (!%p274_p9), %v1846_v4  ;;  %v1859_v21 = vld [vmem:[%s2365_s2 + $0x38] sm:$0xff] (!%p274_p9)   ;;  %v1865_v24 = vld [vmem:[%s2366_s3 + $0x8] sm:$0xff] (!%p274_p9)   ;;  %v2161_v41 = vld [vmem:[%s2370_s7] sm:$0xff] (!%p274_p9) }
  0x14   : > { %1625 = vmatprep.subr.bf16.mxu0 (!%p274_p9), %v1847_v5  ;;  %v1571_v31 = vld [vmem:[%s2370_s7 + $0x8] ss:$0 sm:$0xff] (!%p274_p9)  ;;  %v574_v42 = vrot.slane (!%p274_p9), %v2161_v41, %v573_v40 }
  0x15   : > { %s2084_s10 = scalar_select %p310_p10, %s2037_s9, 1  ;;  %1684 = vmatpush3.bf16.msra.mxu1 %v1863_v18 }
  0x16   : > { %1689 = vmatprep.subr.bf16.mxu1 %v1956_v2 }
  0x17   : > { %s1789_s19 = smul.u32 12, %s2084_s10  ;;  %1626 = vmatpush3.bf16.msra.mxu0 %v1848_v6  ;;  %s317_s22 = scalar_lea.vmem %s2364_s1, %s2084_s10  ;;  %v630_v6 = vld [vmem:[%s2367_s4] sm:$0xf] }
  0x18   : > { %1627 = vmatprep.subr.bf16.mxu0 %v1849_v7  ;;  %v321_v53 = vld [vmem:[%s317_s22] sm:$0x1]  ;;  %s1961_s10 = smov 56   ;;  %v760_v7 = vsel %vm711_vm3, %v630_v6, 0 }
  0x19   : > { %s314_s13 = scalar_lea.vmem %s2363_s0, %s1789_s19  ;;  %vm686_vm4 = vcmp.gt.f32.partialorder %v321_v53, 0.0  ;;  %s307_s19 = sand.u32 1, %s1946_s28  }
  0x1a   : > { %v319_v14 = vld [vmem:[%s314_s13] sm:$0xff]  ;;  %v1862_v17 = vld [vmem:[%s314_s13 + $0x8] ss:$0 sps:$4 sm:$0xff]   ;;  %v687_v55 = vsel %vm686_vm4, 1, %v1960_v54  ;;  %s1967_s13 = smov 72   ;;  %s1569_s25 = sshll.u32 %s307_s19, 3 }
  0x1b   : > { %1628 = vmatpush3.bf16.msra.mxu0 %v1850_v8  ;;  %v1573_v16 = vcombine.high %v319_v14, %v319_v14  ;;  %1686 = vmatmul.mubr.msk.bf16.vlgmr.msra.gmra.mrb[0].mxu1 %vm482_vm1, %v1862_v17  ;;  %v1572_v22 = vcombine.low %v319_v14, %v319_v14  ;;  %v2180_v56 = vrot.slane %v687_v55, %v573_v40 }
  0x1c   : > { %1629 = vmatprep.subr.bf16.mxu0 %v1851_v9  ;;  %1693 = vmatprep.mubr.msk.bf16.mxu1 %vm1957_vm0, %v1956_v2 }
  0x1d   : > { %518 = vmatprep.mubr.bf16.mxu0 %v1573_v16  ;;  %1690 = vmatpush3.bf16.msra.mxu1 %v1864_v23  ;;  %vm692_vm5 = vcmp.eq.s32.totalorder %v2180_v56, 1 }
  0x1e   : > { %1691 = vmatprep.subr.bf16.mxu1 %v1956_v2 }
  0x1f   : > { %1630 = vmatpush3.bf16.msra.mxu0 %v1852_v11 }
  0x20   : > { %1631 = vmatprep.subr.bf16.mxu0 %v1853_v12 }
  0x21   : > { %1692 = vmatpush3.bf16.msra.mxu1 %v1865_v24 }
  0x22   : > { %1697 = vmatprep.subr.bf16.mxu1 %v1956_v2 }
  0x23   : > { %1632 = vmatpush3.bf16.msra.mxu0 %v1854_v13 }
  0x24   : > { %1633 = vmatprep.subr.bf16.mxu0 %v1855_v15 }
  0x27   : > { %1634 = vmatpush3.bf16.msra.mxu0 %v1856_v19 }
  0x28   : > { %1635 = vmatprep.subr.bf16.mxu0 %v1858_v20 }
  0x2b   : > { %1636 = vmatpush3.bf16.msra.mxu0 %v1859_v21 }
  0x2c   : > { %1709 = vmatprep.subr.bf16.mxu0 %v1956_v2 }
  0x2e   : > { %519 = vmatmul.mubr.bf16.vlgmr.msra.gmra.mrb[0].mxu0 %v1572_v22 }
  0x2f   : > { %1711 = vmatprep.mubr.msk.bf16.mxu0 %vm1957_vm0, %v1956_v2  ;;  %1710 = vmatpush3.bf16.msra.mxu0 %v760_v7 }
  0x30   : > { %1721 = vmatprep.subr.bf16.mxu0 %v1956_v2 }
  0xee   : > { %v560_v25 = vpop.f32.mrb[0].mxu1 }
  0xef   : > { %v1687_v26 = vpop.f32.mrb[1].mxu1 }
  0xf0   : > { %v563_v27 = vpop.f32.mrb[2].mxu1 }
  0xf1   : > { %v1688_v28 = vpop.f32.mrb[3].mxu1 }
 0x101   : > { %v1637_v29 = vpop.f32.mrb[0].mxu0 }
 0x102   : > { %v1638_v30 = vpop.f32.mrb[1].mxu0 }
 0x103   : > { %v1639_v32 = vadd.f32 %v1638_v30, %v1637_v29  ;;  %v1640_v33 = vpop.f32.mrb[2].mxu0 }
 0x104   : > { %v1641_v34 = vpop.f32.mrb[3].mxu0 }
 0x105   : > { %v521_v35 = vadd.f32 %v1639_v32, %v1571_v31 }
 0x107   : > { %v2148_v36 = vadd.f32 %v560_v25, %v521_v35 }
 0x109   : > { %v570_v37 = vpack.c.bf16 %v2148_v36, %v2148_v36 }
 0x10b   : > { %1694 = vmatmul.mubr.msk.bf16.vlgmr.msra.gmra.mrb[4].mxu1 %vm482_vm1, %v570_v37 }
 0x10c   : > { %1699 = vmatprep.mubr.msk.bf16.mxu1 %vm1957_vm0, %v1956_v2 }
 0x1de   : > { %v624_v43 = vpop.f32.mrb[4].mxu1 }
 0x1df   : > { %v625_v44 = vadd.f32 %v624_v43, %v574_v42  ;;  %v1695_v45 = vpop.f32.mrb[5].mxu1 }
 0x1e0   : > { %v627_v46 = vpop.f32.mrb[6].mxu1 }
 0x1e1   : > { %v2164_v47 = vpack.c.bf16 %v625_v44, %v625_v44  ;;  %v1696_v48 = vpop.f32.mrb[7].mxu1 }
 0x1e3   : > { %706 = vrot.lane.b32.xlu1 %v2164_v47, %s1958_s18  ;;  %636 = vrot.lane.b32.xlu0 %v2164_v47, %s1959_s20  ;;  %s1966_s20 = smov 48  }
 0x255   : > { %v637_v49 = vpop.permute.xlu0 %636  ;;  %v707_v51 = vpop.permute.xlu1 %706 }
 0x256   : > { %v643_v50 = vsel %vm638_vm2, %v637_v49, 0  ;;  %v713_v52 = vsel %vm711_vm3, %v707_v51, 0  ;;  %v631_v49 = vld [vmem:[%s2367_s4 + $0x4] sm:$0xf] }
 0x257   : > { %1698 = vmatpush3.bf16.xpose.msra.mxu1 %v643_v50  ;;  %v924_v50 = vsel %vm711_vm3, %v631_v49, 0 }
 0x258   : > { %1703 = vmatprep.subr.bf16.mxu1 %v1956_v2 }
 0x25e   : > { %1700 = vmatmul.mubr.msk.bf16.vlgmr.msra.gmra.mrb[8].mxu1 %vm638_vm2, %v2164_v47 }
 0x25f   : > { %1704 = vmatpush3.bf16.msra.mxu1 %v713_v52  ;;  %1705 = vmatprep.mubr.msk.bf16.mxu1 %vm1957_vm0, %v1956_v2 }
 0x260   : > { %1715 = vmatprep.subr.bf16.mxu1 %v1956_v2 }
 0x331   : > { %v679_v57 = vpop.f32.mrb[8].mxu1 }
 0x332   : > { %v685_v58 = vmul.f32 0.35355338, %v679_v57  ;;  %v1701_v59 = vpop.f32.mrb[9].mxu1 }
 0x333   : > { %v682_v60 = vpop.f32.mrb[10].mxu1 }
 0x334   : > { %v1702_v61 = vpop.f32.mrb[11].mxu1  ;;  %v693_v62 = vsel %vm692_vm5, %v685_v58, -1e+30 }
 0x335   : > { %v694_v63 = vsel %vm638_vm2, %v693_v62, -inf }
 0x336   : > { %695 = vmax.xlane.f32.xlu0 %v694_v63 }
 0x34c   : > { %871 = vrot.lane.b32.xlu0 %v2164_v47, %s1961_s10 }
 0x3c3   : > { %v696_v0 = vpop.xlane.xlu0 %695 }
 0x3c4   : > { %v697_v1 = vsub.f32 %v693_v62, %v696_v0 }
 0x3c6   : > { %v698_v3 = vmul.f32 1.442695, %v697_v1 }
 0x3c7   : > { %v872_v15 = vpop.permute.xlu0 %871 }
 0x3c8   : > { %1872 = vpow2.f32 %v698_v3  ;;  %v877_v20 = vsel %vm711_vm3, %v872_v15, 0 }
 0x3d2   : > { %v1873_v4 = vpop.eup %1872 }
 0x3d3   : > { %v700_v5 = vsel %vm638_vm2, %v1873_v4, 0.0 }
 0x3d4   : > { %701 = vadd.xlane.f32.xlu1 %v700_v5 }
 0x3e5   : > { %809 = vrot.lane.b32.xlu1 %v2164_v47, %s1962_s23  ;;  %s1969_s23 = smov 40  }
 0x3e9   : > { %807 = vrot.lane.b32.xlu1 %v2164_v47, %s1963_s24 }
 0x461   : > { %v702_v8 = vpop.xlane.xlu1 %701 }
 0x462   : > { %1874 = vrcp.f32 %v702_v8  ;;  %v804_v8 = vsub.s32 1, %v2155_v39 }
 0x465   : > { %v810_v11 = vpop.permute.xlu1 %809 }
 0x466   : > { %v815_v13 = vsel %vm638_vm2, %v810_v11, 0 }
 0x469   : > { %v808_v14 = vpop.permute.xlu1 %807 }
 0x46c   : > { %v1875_v9 = vpop.eup %1874 }
 0x46d   : > { %v704_v10 = vmul.f32 %v1875_v9, %v1873_v4  ;;  %v805_v9 = vrot.slane %v2161_v41, %v804_v8 }
 0x46f   : > { %v705_v12 = vpack.c.bf16 %v704_v10, %v704_v10 }
 0x471   : > { %1706 = vmatmul.mubr.msk.bf16.vlgmr.msra.gmra.mrb[12].mxu1 %vm638_vm2, %v705_v12 }
 0x472   : > { %1716 = vmatpush3.bf16.xpose.msra.mxu1 %v815_v13  ;;  %1717 = vmatprep.mubr.msk.bf16.mxu1 %vm1957_vm0, %v1956_v2 }
 0x473   : > { %1727 = vmatprep.subr.bf16.mxu1 %v1956_v2 }
 0x479   : > { %1718 = vmatmul.mubr.msk.bf16.vlgmr.msra.gmra.mrb[16].mxu1 %vm638_vm2, %v808_v14 }
 0x47a   : > { %1729 = vmatprep.mubr.msk.bf16.mxu1 %vm1957_vm0, %v1956_v2  ;;  %1728 = vmatpush3.bf16.msra.mxu1 %v924_v50 }
 0x47b   : > { %1739 = vmatprep.subr.bf16.mxu1 %v1956_v2 }
 0x544   : > { %v749_v16 = vpop.f32.mrb[12].mxu1 }
 0x545   : > { %v755_v17 = vpack.c.bf16 %v749_v16, %v749_v16  ;;  %v1707_v18 = vpop.f32.mrb[13].mxu1 }
 0x546   : > { %v752_v19 = vpop.f32.mrb[14].mxu1 }
 0x547   : > { %v1708_v21 = vpop.f32.mrb[15].mxu1  ;;  %1712 = vmatmul.mubr.msk.bf16.vlgmr.msra.gmra.mrb[4].mxu0 %vm638_vm2, %v755_v17 }
 0x548   : > { %1722 = vmatpush3.bf16.msra.mxu0 %v877_v20  ;;  %1723 = vmatprep.mubr.msk.bf16.mxu0 %vm1957_vm0, %v1956_v2 }
 0x549   : > { %1733 = vmatprep.subr.bf16.mxu0 %v1956_v2 }
 0x54c   : > { %v851_v22 = vpop.f32.mrb[16].mxu1 }
 0x54d   : > { %v857_v23 = vmul.f32 0.35355338, %v851_v22  ;;  %v1719_v24 = vpop.f32.mrb[17].mxu1 }
 0x54e   : > { %v854_v25 = vpop.f32.mrb[18].mxu1 }
 0x54f   : > { %v1720_v26 = vpop.f32.mrb[19].mxu1  ;;  %v858_v27 = vsel %vm692_vm5, %v857_v23, -1e+30  ;;  %v632_v23 = vld [vmem:[%s2367_s4 + $0x8] sm:$0xf] }
 0x550   : > { %v859_v28 = vsel %vm638_vm2, %v858_v27, -inf  ;;  %v1084_v24 = vsel %vm711_vm3, %v632_v23, 0 }
 0x551   : > { %860 = vmax.xlane.f32.xlu1 %v859_v28 }
 0x5de   : > { %v861_v29 = vpop.xlane.xlu1 %860 }
 0x5df   : > { %v862_v30 = vsub.f32 %v858_v27, %v861_v29 }
 0x5e1   : > { %v863_v31 = vmul.f32 1.442695, %v862_v30 }
 0x5e3   : > { %1876 = vpow2.f32 %v863_v31 }
 0x5ed   : > { %v1877_v32 = vpop.eup %1876 }
 0x5ee   : > { %v865_v33 = vsel %vm638_vm2, %v1877_v32, 0.0 }
 0x5ef   : > { %866 = vadd.xlane.f32.xlu0 %v865_v33 }
 0x605   : > { %969 = vrot.lane.b32.xlu0 %v2164_v47, %s1964_s26  ;;  %s1618_s26 = sshll.u32 %s2037_s9, 7  ;;  %s1970_s9 = smov [#allocation2]  }
 0x606   : > { %s1896_s10 = sshll.u32 %s1970_s9, 4  ;;  %s1897_s10 = int_to_ptr.vmem [resolvable:$false] %s1896_s10 }
 0x609   : > { %967 = vrot.lane.b32.xlu0 %v2164_v47, %s1965_s12  ;;  %s309_s12 = scalar_lea.vmem [#allocation2], %s1569_s25 }
 0x60a   : > { %s1497_s17 = sshll.u32 %s309_s12, 4  ;;  %s2322_s17 = int_to_ptr.vmem [resolvable:$true] %s1497_s17 }
 0x60b   : > { %s1892_s22 = scalar_lea.vmem %s2322_s17, 128  ;;  %p1899_p0 = scmp.lt.s32.totalorder %s2322_s17, %s1897_s10 }
 0x60c   : > { %p1893_p11 = scmp.ne.s32.totalorder %s2322_s17, %s1892_s22 }
 0x60e   : > { %p1894_p12 = pnand %p1893_p11, %p2054_p5 }
 0x610   : > { %p1895_p13 = pneg %p1894_p12 }
 0x61a   : > { %v796_v34 = vpop.f32.mrb[4].mxu0 }
 0x61b   : > { %v1713_v35 = vpop.f32.mrb[5].mxu0  ;;  %v806_v10 = vadd.f32 %v805_v9, %v796_v34 }
 0x61c   : > { %v799_v37 = vpop.f32.mrb[6].mxu0 }
 0x61d   : > { %v1714_v38 = vpop.f32.mrb[7].mxu0 }
 0x67c   : > { %v867_v40 = vpop.xlane.xlu0 %866 }
 0x67d   : > { %1878 = vrcp.f32 %v867_v40 }
 0x680   : > { %v970_v44 = vpop.permute.xlu0 %969 }
 0x681   : > { %v975_v46 = vsel %vm638_vm2, %v970_v44, 0 }
 0x684   : > { %v968_v48 = vpop.permute.xlu0 %967 }
 0x687   : > { %v1879_v42 = vpop.eup %1878 }
 0x688   : > { %v869_v43 = vmul.f32 %v1879_v42, %v1877_v32 }
 0x68a   : > { %v870_v45 = vpack.c.bf16 %v869_v43, %v869_v43 }
 0x68c   : > { %1724 = vmatmul.mubr.msk.bf16.vlgmr.msra.gmra.mrb[8].mxu0 %vm638_vm2, %v870_v45  ;;  %v633_v45 = vld [vmem:[%s2367_s4 + $0xc] sm:$0xf] }
 0x68d   : > { %1734 = vmatpush3.bf16.xpose.msra.mxu0 %v975_v46  ;;  %1735 = vmatprep.mubr.msk.bf16.mxu0 %vm1957_vm0, %v1956_v2  ;;  %v1244_v56 = vsel %vm711_vm3, %v633_v45, 0 }
 0x68e   : > { %1745 = vmatprep.subr.bf16.mxu0 %v1956_v2 }
 0x694   : > { %1736 = vmatmul.mubr.msk.bf16.vlgmr.msra.gmra.mrb[12].mxu0 %vm638_vm2, %v968_v48 }
 0x695   : > { %1747 = vmatprep.mubr.msk.bf16.mxu0 %vm1957_vm0, %v1956_v2  ;;  %1746 = vmatpush3.bf16.msra.mxu0 %v1084_v24 }
 0x696   : > { %1757 = vmatprep.subr.bf16.mxu0 %v1956_v2 }
 0x75f   : > { %v913_v51 = vpop.f32.mrb[8].mxu0 }
 0x760   : > { %v919_v52 = vpack.c.bf16 %v913_v51, %v913_v51  ;;  %v1725_v53 = vpop.f32.mrb[9].mxu0 }
 0x761   : > { %v916_v54 = vpop.f32.mrb[10].mxu0 }
 0x762   : > { %v1726_v55 = vpop.f32.mrb[11].mxu0  ;;  %1730 = vmatmul.mubr.msk.bf16.vlgmr.msra.gmra.mrb[20].mxu1 %vm638_vm2, %v919_v52 }
 0x763   : > { %1741 = vmatprep.mubr.msk.bf16.mxu1 %vm1957_vm0, %v1956_v2 }
 0x767   : > { %v1011_v57 = vpop.f32.mrb[12].mxu0 }
 0x768   : > { %v1017_v58 = vmul.f32 0.35355338, %v1011_v57  ;;  %v1737_v59 = vpop.f32.mrb[13].mxu0 }
 0x769   : > { %v1014_v60 = vpop.f32.mrb[14].mxu0 }
 0x76a   : > { %v1738_v61 = vpop.f32.mrb[15].mxu0  ;;  %v1018_v62 = vsel %vm692_vm5, %v1017_v58, -1e+30 }
 0x76b   : > { %v1019_v63 = vsel %vm638_vm2, %v1018_v62, -inf }
 0x76c   : > { %1020 = vmax.xlane.f32.xlu1 %v1019_v63 }
 0x77d   : > { %1031 = vrot.lane.b32.xlu1 %v2164_v47, %s1966_s20 }
 0x781   : > { %1129 = vrot.lane.b32.xlu1 %v2164_v47, %s1967_s13  ;;  %s2320_s13 = scalar_lea.hbm %s2371_s8, %s1618_s26 }
 0x785   : > { %1127 = vrot.lane.b32.xlu1 %v2164_v47, %s1968_s21  ;;  %s1484_s21 = scalar_lea.sflag [#allocation3], %s307_s19 }
 0x7f9   : > { %v1021_v0 = vpop.xlane.xlu1 %1020 }
 0x7fa   : > { %v1022_v1 = vsub.f32 %v1018_v62, %v1021_v0 }
 0x7fc   : > { %v1023_v3 = vmul.f32 1.442695, %v1022_v1 }
 0x7fd   : > { %v1032_v4 = vpop.permute.xlu1 %1031 }
 0x7fe   : > { %1880 = vpow2.f32 %v1023_v3  ;;  %v1037_v5 = vsel %vm711_vm3, %v1032_v4, 0 }
 0x7ff   : > { %1740 = vmatpush3.bf16.msra.mxu1 %v1037_v5 }
 0x800   : > { %1751 = vmatprep.subr.bf16.mxu1 %v1956_v2 }
 0x801   : > { %v1130_v19 = vpop.permute.xlu1 %1129 }
 0x802   : > { %v1135_v21 = vsel %vm638_vm2, %v1130_v19, 0  ;;  %v1309_v19 = vsub.s32 5, %v2155_v39 }
 0x804   : > { %v1310_v23 = vrot.slane %v2161_v41, %v1309_v19 }
 0x805   : > { %v1128_v22 = vpop.permute.xlu1 %1127 }
 0x808   : > { %v1881_v6 = vpop.eup %1880 }
 0x809   : > { %v1025_v7 = vsel %vm638_vm2, %v1881_v6, 0.0 }
 0x80a   : > { %1026 = vadd.xlane.f32.xlu0 %v1025_v7 }
 0x835   : > { %v960_v11 = vpop.f32.mrb[20].mxu1 }
 0x836   : > { %v966_v12 = vadd.f32 %v960_v11, %v806_v10  ;;  %v1731_v13 = vpop.f32.mrb[21].mxu1 }
 0x837   : > { %v963_v14 = vpop.f32.mrb[22].mxu1  ;;  %v1867_v13 = vld [vmem:[%s2368_s5 + $0x8] sm:$0xff]  }
 0x838   : > { %v1732_v15 = vpop.f32.mrb[23].mxu1  ;;  %v1869_v14 = vld [vmem:[%s2369_s6 + $0x8] sm:$0xff]  }
 0x897   : > { %v1027_v16 = vpop.xlane.xlu0 %1026 }
 0x898   : > { %1882 = vrcp.f32 %v1027_v16 }
 0x8a2   : > { %v1883_v17 = vpop.eup %1882 }
 0x8a3   : > { %v1029_v18 = vmul.f32 %v1883_v17, %v1881_v6 }
 0x8a5   : > { %v1030_v20 = vpack.c.bf16 %v1029_v18, %v1029_v18  ;;  %v1304_v18 = vsub.s32 4, %v2155_v39 }
 0x8a7   : > { %1742 = vmatmul.mubr.msk.bf16.vlgmr.msra.gmra.mrb[24].mxu1 %vm638_vm2, %v1030_v20  ;;  %v1305_v20 = vrot.slane %v2161_v41, %v1304_v18 }
 0x8a8   : > { %1752 = vmatpush3.bf16.xpose.msra.mxu1 %v1135_v21  ;;  %1753 = vmatprep.mubr.msk.bf16.mxu1 %vm1957_vm0, %v1956_v2 }
 0x8a9   : > { %1763 = vmatprep.subr.bf16.mxu1 %v1956_v2 }
 0x8af   : > { %1754 = vmatmul.mubr.msk.bf16.vlgmr.msra.gmra.mrb[28].mxu1 %vm638_vm2, %v1128_v22 }
 0x8b0   : > { %1765 = vmatprep.mubr.msk.bf16.mxu1 %vm1957_vm0, %v1956_v2  ;;  %1764 = vmatpush3.bf16.msra.mxu1 %v1244_v56 }
 0x8b1   : > { %1777 = vmatprep.subr.bf16.mxu1 %v1956_v2 }
 0x97a   : > { %v1073_v25 = vpop.f32.mrb[24].mxu1 }
 0x97b   : > { %v1079_v26 = vpack.c.bf16 %v1073_v25, %v1073_v25  ;;  %v1743_v27 = vpop.f32.mrb[25].mxu1 }
 0x97c   : > { %v1076_v28 = vpop.f32.mrb[26].mxu1  ;;  %v1870_v27 = vld [vmem:[%s2369_s6 + $0x10] sm:$0xff]  }
 0x97d   : > { %v1744_v29 = vpop.f32.mrb[27].mxu1  ;;  %1748 = vmatmul.mubr.msk.bf16.vlgmr.msra.gmra.mrb[16].mxu0 %vm638_vm2, %v1079_v26  ;;  %v1871_v28 = vld [vmem:[%s2369_s6 + $0x18] sm:$0xff]  }
 0x97e   : > { %1759 = vmatprep.mubr.msk.bf16.mxu0 %vm1957_vm0, %v1956_v2  ;;  %v1319_v29 = vsub.s32 2, %v2155_v39 }
 0x982   : > { %v1171_v30 = vpop.f32.mrb[28].mxu1 }
 0x983   : > { %v1177_v31 = vmul.f32 0.35355338, %v1171_v30  ;;  %v1755_v32 = vpop.f32.mrb[29].mxu1  ;;  %v1320_v30 = vrot.slane %v2161_v41, %v1319_v29 }
 0x984   : > { %v1174_v33 = vpop.f32.mrb[30].mxu1 }
 0x985   : > { %v1756_v34 = vpop.f32.mrb[31].mxu1  ;;  %v1178_v35 = vsel %vm692_vm5, %v1177_v31, -1e+30 }
 0x986   : > { %v1179_v37 = vsel %vm638_vm2, %v1178_v35, -inf }
 0x987   : > { %1180 = vmax.xlane.f32.xlu1 %v1179_v37 }
 0xa14   : > { %v1181_v38 = vpop.xlane.xlu1 %1180 }
 0xa15   : > { %v1182_v40 = vsub.f32 %v1178_v35, %v1181_v38 }
 0xa17   : > { %v1183_v42 = vmul.f32 1.442695, %v1182_v40 }
 0xa19   : > { %1884 = vpow2.f32 %v1183_v42 }
 0xa23   : > { %v1885_v43 = vpop.eup %1884 }
 0xa24   : > { %v1185_v44 = vsel %vm638_vm2, %v1885_v43, 0.0 }
 0xa25   : > { %1186 = vadd.xlane.f32.xlu0 %v1185_v44 }
 0xa3b   : > { %1191 = vrot.lane.b32.xlu0 %v2164_v47, %s1969_s23  ;;  %s1898_s23 = scalar_lea.vmem %s1897_s10, 256 }
 0xa3c   : > { %p1900_p1 = scmp.lt.s32.totalorder %s1898_s23, %s1892_s22 }
 0xa3e   : > { %p1901_p2 = por %p1900_p1, %p1899_p0 }
 0xa40   : > { %p1902_p3 = pnand %p1901_p2, %p1895_p13 }
 0xa50   : > { %v1120_v46 = vpop.f32.mrb[16].mxu0 }
 0xa51   : > { %v1126_v48 = vadd.f32 %v1120_v46, %v966_v12  ;;  %v1749_v49 = vpop.f32.mrb[17].mxu0  ;;  %v1866_v12 = vld [vmem:[%s2368_s5] sm:$0xff]  }
 0xa52   : > { %v1123_v50 = vpop.f32.mrb[18].mxu0 }
 0xa53   : > { %v1750_v51 = vpop.f32.mrb[19].mxu0 }
 0xab2   : > { %v1187_v52 = vpop.xlane.xlu0 %1186 }
 0xab3   : > { %1886 = vrcp.f32 %v1187_v52 }
 0xab6   : > { %v1192_v53 = vpop.permute.xlu0 %1191 }
 0xab7   : > { %v1197_v54 = vsel %vm711_vm3, %v1192_v53, 0 }
 0xab8   : > { %1758 = vmatpush3.bf16.msra.mxu0 %v1197_v54 }
 0xab9   : > { %1769 = vmatprep.subr.bf16.mxu0 %v1956_v2 }
 0xabd   : > { %v1887_v47 = vpop.eup %1886 }
 0xabe   : > { %v1189_v55 = vmul.f32 %v1887_v47, %v1885_v43 }
 0xac0   : > { %v1190_v57 = vpack.c.bf16 %v1189_v55, %v1189_v55 }
 0xac2   : > { %1760 = vmatmul.mubr.msk.bf16.vlgmr.msra.gmra.mrb[20].mxu0 %vm638_vm2, %v1190_v57  ;;  %v1474_v57 = vsub.s32 6, %v2155_v39 }
 0xac3   : > { %1773 = vmatprep.mubr.msk.bf16.mxu0 %vm1957_vm0, %v1956_v2  ;;  %1770 = vmatpush3.bf16.msra.mxu0 %v1866_v12 }
 0xac4   : > { %1771 = vmatprep.subr.bf16.mxu0 %v1956_v2 }
 0xac7   : > { %1772 = vmatpush3.bf16.msra.mxu0 %v1867_v13 }
 0xb95   : > { %v1233_v58 = vpop.f32.mrb[20].mxu0 }
 0xb96   : > { %v1239_v59 = vpack.c.bf16 %v1233_v58, %v1233_v58  ;;  %v1761_v60 = vpop.f32.mrb[21].mxu0  ;;  %v1479_v58 = vsub.s32 7, %v2155_v39 }
 0xb97   : > { %v1236_v61 = vpop.f32.mrb[22].mxu0 }
 0xb98   : > { %v1762_v62 = vpop.f32.mrb[23].mxu0  ;;  %1766 = vmatmul.mubr.msk.bf16.vlgmr.msra.gmra.mrb[32].mxu1 %vm638_vm2, %v1239_v59  ;;  %v1475_v59 = vrot.slane %v2161_v41, %v1474_v57 }
 0xb99   : > { %1785 = vmatprep.mubr.msk.bf16.mxu1 %vm1957_vm0, %v1956_v2  ;;  %v1480_v62 = vrot.slane %v2161_v41, %v1479_v58 }
 0xc6b   : > { %v1280_v63 = vpop.f32.mrb[32].mxu1 }
 0xc6c   : > { %v1286_v0 = vadd.f32 %v1280_v63, %v1126_v48  ;;  %v1767_v1 = vpop.f32.mrb[33].mxu1 }
 0xc6d   : > { %v1283_v3 = vpop.f32.mrb[34].mxu1 }
 0xc6e   : > { %v1768_v4 = vpop.f32.mrb[35].mxu1  ;;  %v1287_v5 = vadd.f32 %v1286_v0, %v2148_v36  ;;  %v1868_v36 = vld [vmem:[%s2369_s6] sm:$0xff]  }
 0xc6f   : > { %1778 = vmatpush3.bf16.msra.mxu1 %v1868_v36 }
 0xc70   : > { %v1288_v6 = vsel %vm482_vm1, %v1287_v5, 0.0  ;;  %1779 = vmatprep.subr.bf16.mxu1 %v1956_v2 }
 0xc71   : > { %1289 = vadd.xlane.f32.xlu0 %v1288_v6 }
 0xc73   : > { %1780 = vmatpush3.bf16.msra.mxu1 %v1869_v14 }
 0xc74   : > { %1781 = vmatprep.subr.bf16.mxu1 %v1956_v2 }
 0xc77   : > { %1782 = vmatpush3.bf16.msra.mxu1 %v1870_v27 }
 0xc78   : > { %1783 = vmatprep.subr.bf16.mxu1 %v1956_v2  ;;  %v1388_v2 = vsub.s32 3, %v2155_v39 }
 0xc7a   : > { %v1389_v40 = vrot.slane %v2161_v41, %v1388_v2 }
 0xc7b   : > { %1784 = vmatpush3.bf16.msra.mxu1 %v1871_v28 }
 0xcfe   : > { %v1290_v7 = vpop.xlane.xlu0 %1289 }
 0xcff   : > { %v1292_v8 = vmul.f32 0.03125, %v1290_v7 }
 0xd01   : > { %v1293_v9 = vsub.f32 %v1287_v5, %v1292_v8 }
 0xd03   : > { %v1294_v10 = vmul.f32 %v1293_v9, %v1293_v9 }
 0xd05   : > { %v1295_v11 = vsel %vm482_vm1, %v1294_v10, 0.0 }
 0xd06   : > { %1296 = vadd.xlane.f32.xlu1 %v1295_v11 }
 0xd93   : > { %v1297_v15 = vpop.xlane.xlu1 %1296 }
 0xd94   : > { %v1298_v16 = vmul.f32 0.03125, %v1297_v15 }
 0xd96   : > { %v1299_v17 = vadd.f32 1e-05, %v1298_v16 }
 0xd98   : > { %1888 = vrsqrt.f32 %v1299_v17 }
 0xda2   : > { %v1889_v21 = vpop.eup %1888 }
 0xda3   : > { %v1301_v22 = vmul.f32 %v1889_v21, %v1293_v9 }
 0xda5   : > { %v1306_v24 = vmul.f32 %v1305_v20, %v1301_v22 }
 0xda7   : > { %v1311_v25 = vadd.f32 %v1310_v23, %v1306_v24 }
 0xda9   : > { %v1316_v26 = vpack.c.bf16 %v1311_v25, %v1311_v25 }
 0xdab   : > { %1774 = vmatmul.mubr.msk.bf16.vlgmr.msra.gmra.mrb[24].mxu0 %vm482_vm1, %v1316_v26 }
 0xe7e   : > { %v1370_v31 = vpop.f32.mrb[24].mxu0 }
 0xe7f   : > { %v1371_v32 = vadd.f32 %v1370_v31, %v1320_v30  ;;  %v1775_v33 = vpop.f32.mrb[25].mxu0 }
 0xe80   : > { %v1373_v34 = vpop.f32.mrb[26].mxu0 }
 0xe81   : > { %v1376_v35 = vmax.f32 %v1371_v32, 0.0  ;;  %v1776_v37 = vpop.f32.mrb[27].mxu0 }
 0xe83   : > { %v1385_v38 = vpack.c.bf16 %v1376_v35, %v1376_v35 }
 0xe85   : > { %1786 = vmatmul.mubr.msk.bf16.vlgmr.msra.gmra.mrb[36].mxu1 %vm1414_vm6, %v1385_v38 }
 0xf58   : > { %v1452_v42 = vpop.f32.mrb[36].mxu1 }
 0xf59   : > { %v1453_v43 = vadd.f32 %v1452_v42, %v1389_v40  ;;  %v1787_v44 = vpop.f32.mrb[37].mxu1 }
 0xf5a   : > { %v1455_v45 = vpop.f32.mrb[38].mxu1 }
 0xf5b   : > { %v1788_v56 = vpop.f32.mrb[39].mxu1  ;;  %v1458_v46 = vadd.f32 %v1453_v43, %v1311_v25 }
 0xf5d   : > { %v1459_v48 = vsel %vm482_vm1, %v1458_v46, 0.0 }
 0xf5e   : > { %1460 = vadd.xlane.f32.xlu1 %v1459_v48 }
 0xfeb   : > { %v1461_v49 = vpop.xlane.xlu1 %1460 }
 0xfec   : > { %v1462_v50 = vmul.f32 0.03125, %v1461_v49 }
 0xfee   : > { %v1463_v51 = vsub.f32 %v1458_v46, %v1462_v50 }
 0xff0   : > { %v1464_v52 = vmul.f32 %v1463_v51, %v1463_v51 }
 0xff2   : > { %v1465_v53 = vsel %vm482_vm1, %v1464_v52, 0.0 }
 0xff3   : > { %1466 = vadd.xlane.f32.xlu1 %v1465_v53 }
0x1080   : > { %v1467_v54 = vpop.xlane.xlu1 %1466 }
0x1081   : > { %v1468_v47 = vmul.f32 0.03125, %v1467_v54 }
0x1083   : > { %v1469_v55 = vadd.f32 1e-05, %v1468_v47 }
0x1085   : > { %1890 = vrsqrt.f32 %v1469_v55 }
0x108f   : > { %v1891_v60 = vpop.eup %1890 }
0x1090   : > { %v1471_v61 = vmul.f32 %v1891_v60, %v1463_v51 }
0x1092   : > { %v1476_v63 = vmul.f32 %v1475_v59, %v1471_v61 }
0x1094   : > { %v1481_v0 = vadd.f32 %v1480_v62, %v1476_v63 }
0x1096   : > { %1482 = vst.msk [vmem:[%s309_s12] sm:$0xff] %vm482_vm1, %v1481_v0 }
0x1097   : > { %1905 = shalt.err (!%p1902_p3)
}
0x1098   : > { %s1906_s24 = scalar_lea.hbm %s2320_s13, 128  ;;  %s1910_s26 = scalar_lea.hbm %s2371_s8, 256 }
0x1099   : > { %p1907_p4 = scmp.ne.s32.totalorder %s2320_s13, %s1906_s24  ;;  %p1911_p9 = scmp.lt.u32.totalorder %s2320_s13, %s2371_s8 }
0x109a   : > { %p1912_p10 = scmp.lt.u32.totalorder %s1910_s26, %s1906_s24  ;;  %p1914_p12 = scmp.lt.u32.totalorder %s1906_s24, %s2320_s13 }
0x109b   : > { %p1908_p7 = pnand %p1907_p4, %p2054_p5 }
0x109c   : > { %p1913_p11 = por %p1912_p10, %p1911_p9 }
0x109d   : > { %p1909_p8 = pneg %p1908_p7 }
0x109e   : > { %p1915_p13 = por %p1914_p12, %p1913_p11 }
0x10a0   : > { %p1916_p0 = pnand %p1915_p13, %p1909_p8 }
0x10a2   : > { %1919 = shalt.err (!%p1916_p0)
}
0x10a3   : > { %1790 = dma.vmem_to_hbm [thread:$0]  (%p2054_p5), %s2322_s17, 128, %s2320_s13, %s1484_s21  }
0x10a4 PF: > { %p1796_p1 = scmp.ge.s32.totalorder %s1954_s30, 2  ;;  %s1509_s20 = sand.u32 1, %s1942_s27  }
0x10a5   : > { %s1510_s22 = scalar_lea.sflag [#allocation3], %s1509_s20 }
0x10a6   : > { %p1793_p2 = pnand %p1796_p1, %p2058_p6 }
0x10a8   : > { %1937 = dma.done.wait (!%p1793_p2), %s1510_s22, 128  }
0x10a9   : > { %1939 = vsyncadd (!%p1793_p2), %s1510_s22, 4294967168  ;;  %p18_p3 = scmp.ge.s32.totalorder %s2041_s11, 4   ;;  %s2374_s27 = smov %s1946_s28 }
0x10aa   : > { %s2375_s28 = smov %s1950_s29  ;;  %s2376_s29 = smov %s2052_s14 }
0x10ab   : > { %s2377_s30 = smov %s2041_s11  ;;  %20 = sbr.rel (!%p18_p3) target bundleno = 3 (0x3), region = 90 }
0x10b2   :  { %1515 = vsyncpa [#allocation3], 1 }
0x10b3   :  { %1517 = vsyncpa [#allocation3 + $0x1], 1 }

// kernel: streader_forward.7
= control target key start
LH: loop header
LB: loop body
LE: loop exit
PB: predicated region body
PF: predicated region fallthrough
CT: control target
= control target key end

     0   :  { %13 = vsyncpa [#allocation3], 0  ;;  %s2535_s0 = inlined_call_operand.vmem [shape: bf16[2,16,288], index: 0, kind: input, shape index: {}]   ;;  %s2536_s1 = inlined_call_operand.vmem [shape: f32[2,1,16], index: 1, kind: input, shape index: {}]   ;;  %s2537_s2 = inlined_call_operand.vmem [shape: bf16[288,32], index: 2, kind: input, shape index: {}]   ;;  %s2538_s3 = inlined_call_operand.vmem [shape: bf16[32,96], index: 3, kind: input, shape index: {}]   ;;  %s2539_s4 = inlined_call_operand.vmem [shape: bf16[32,32], index: 4, kind: input, shape index: {}]   ;;  %s2540_s5 = inlined_call_operand.vmem [shape: bf16[32,64], index: 5, kind: input, shape index: {}]   ;;  %s2541_s6 = inlined_call_operand.vmem [shape: bf16[64,32], index: 6, kind: input, shape index: {}]   ;;  %s2542_s7 = inlined_call_operand.vmem [shape: f32[9,96], index: 7, kind: input, shape index: {}]   ;;  %s2543_s8 = inlined_call_operand.hbm [shape: f32[2,16,32], index: 8, kind: output, shape index: {}]  }
   0x1   :  { %15 = vsyncpa [#allocation3 + $0x1], 0  ;;  %s2153_s27 = smov 0   ;;  %s2155_s28 = smov 0  }
   0x2   :  { %s2157_s29 = smov 0   ;;  %s2159_s30 = smov 0  }
   0x3 LB: > { %s2174_s9 = sadd.s32 4294967295, %s2089_s30   ;;  %s1675_s10 = sadd.s32 4294967294, %s2089_s30   ;;  %s2089_s30 = sphi %s2159_s30, %s2549_s30   ;;  %s2085_s29 = sphi %s2157_s29, %s2548_s29   ;;  %s2081_s28 = sphi %s2155_s28, %s2547_s28   ;;  %s2077_s27 = sphi %s2153_s27, %s2546_s27  }
   0x4   : > { %s2178_s11 = sadd.s32 1, %s2089_s30   ;;  %s206_s12 = sadd.s32 1, %s2085_s29 }
   0x5   : > { %s203_s13 = ssub.s32 %s2089_s30, %s2178_s11  ;;  %p216_p0 = scmp.ne.s32.totalorder %s2085_s29, %s2081_s28 }
   0x6   : > { %p204_p1 = scmp.eq.s32.totalorder %s203_s13, 0  ;;  %p217_p2 = scmp.eq.s32.totalorder %s2174_s9, 1 }
   0x7   : > { %p222_p3 = scmp.ne.s32.totalorder %s2081_s28, %s2077_s27  ;;  %p223_p4 = scmp.eq.s32.totalorder %s1675_s10, 1 }
   0x8   : > { %s2189_s14 = scalar_select %p204_p1, %s2085_s29, %s206_s12  }
   0x9   : > { %p2191_p5 = por %p217_p2, %p216_p0  ;;  %p2195_p6 = por %p223_p4, %p222_p3 }
   0xa   : > { %p1678_p7 = scmp.ge.s32.totalorder %s2089_s30, 1  ;;  %p273_p8 = scmp.lt.s32.totalorder %s2089_s30, 3 }
   0xc   : > { %p274_p9 = pnand %p1678_p7, %p273_p8 }
   0xd   : > { %v1957_v0 = vld [vmem:[%s2537_s2 + $0x40] sm:$0xff] (!%p274_p9)   ;;  %v2091_v2 = vmov (!%p274_p9), 0.0   ;;  %v1959_v3 = vld [vmem:[%s2537_s2 + $0x48] sm:$0xff] (!%p274_p9)   ;;  %p310_p10 = scmp.lt.s32.totalorder (!%p274_p9), %s2174_s9, 1  ;;  %vm2092_vm0 = vmmov (!%p274_p9), 0   ;;  %v1961_v5 = vld [vmem:[%s2537_s2 + $0x50] sm:$0xff] (!%p274_p9)   ;;  %v580_v40 = vlaneseq (!%p274_p9) }
   0xe   : > { %277 = sbr.rel (%p274_p9) target bundleno = 4293 (0x10c5), region = 52  ;;  %v1958_v1 = vld [vmem:[%s2537_s2] sm:$0xff] (!%p274_p9)   ;;  %1793 = vmatprep.subr.bf16.mxu1 (!%p274_p9), %v2091_v2  ;;  %1733 = vmatprep.subr.bf16.mxu0 (!%p274_p9), %v1957_v0  ;;  %v1960_v4 = vld [vmem:[%s2537_s2 + $0x8] sm:$0xff] (!%p274_p9)   ;;  %v1962_v6 = vld [vmem:[%s2537_s2 + $0x10] sm:$0xff] (!%p274_p9)   ;;  %vm489_vm1 = vcmask (!%p274_p9), 261120   ;;  %s2093_s17 = smov (!%p274_p9), 96  }
   0xf   : > { %1734 = vmatpush3.bf16.msra.mxu0 (!%p274_p9), %v1958_v1  ;;  %1797 = vmatprep.mubr.msk.bf16.mxu1 (!%p274_p9), %vm2092_vm0, %v2091_v2  ;;  %v1963_v7 = vld [vmem:[%s2537_s2 + $0x58] sm:$0xff] (!%p274_p9)   ;;  %v1965_v9 = vld [vmem:[%s2537_s2 + $0x60] sm:$0xff] (!%p274_p9)   ;;  %v1967_v12 = vld [vmem:[%s2537_s2 + $0x68] sm:$0xff] (!%p274_p9)   ;;  %v2294_v41 = vshrl.u32 (!%p274_p9), %v580_v40, 7  ;;  %vm648_vm2 = vcmask (!%p274_p9), 64512   ;;  %v2094_v55 = vmov (!%p274_p9), 0  }
  0x10   : > { %1735 = vmatprep.subr.bf16.mxu0 (!%p274_p9), %v1959_v3  ;;  %v1964_v8 = vld [vmem:[%s2537_s2 + $0x18] sm:$0xff] (!%p274_p9)   ;;  %v1971_v10 = vld [vmem:[%s2537_s2 + $0x80] sm:$0xff] (!%p274_p9)   ;;  %v1968_v13 = vld [vmem:[%s2537_s2 + $0x28] sm:$0xff] (!%p274_p9)   ;;  %vm707_vm5 = vcmask (!%p274_p9), 130048   ;;  %s2096_s23 = smov (!%p274_p9), 88   ;;  %s2097_s24 = smov (!%p274_p9), 120  }
  0x11   : > { %v1966_v11 = vld [vmem:[%s2537_s2 + $0x20] sm:$0xff] (!%p274_p9)   ;;  %1794 = vmatpush3.bf16.msra.mxu1 (!%p274_p9), %v1971_v10  ;;  %v1969_v14 = vld [vmem:[%s2537_s2 + $0x70] sm:$0xff] (!%p274_p9)   ;;  %v1977_v16 = vld [vmem:[%s2537_s2 + $0x88] sm:$0xff] (!%p274_p9)   ;;  %v582_v42 = vsub.s32 (!%p274_p9), 0, %v2294_v41  ;;  %vm782_vm6 = vcmask (!%p274_p9), 1043456   ;;  %s2100_s10 = smov (!%p274_p9), 112  }
  0x12   : > { %1795 = vmatprep.subr.bf16.mxu1 (!%p274_p9), %v2091_v2  ;;  %v1970_v18 = vld [vmem:[%s2537_s2 + $0x30] sm:$0xff] (!%p274_p9)   ;;  %v1972_v19 = vld [vmem:[%s2537_s2 + $0x78] sm:$0xff] (!%p274_p9)   ;;  %v1979_v22 = vld [vmem:[%s2538_s3] sm:$0xff] (!%p274_p9)   ;;  %s2101_s19 = smov (!%p274_p9), 48   ;;  %s2102_s20 = smov (!%p274_p9), 72   ;;  %vm1503_vm7 = vcmask (!%p274_p9), 523264  }
  0x13   : > { %1736 = vmatpush3.bf16.msra.mxu0 (!%p274_p9), %v1960_v4  ;;  %v1973_v20 = vld [vmem:[%s2537_s2 + $0x38] sm:$0xff] (!%p274_p9)   ;;  %v1980_v23 = vld [vmem:[%s2538_s3 + $0x8] sm:$0xff] (!%p274_p9)   ;;  %v2300_v43 = vld [vmem:[%s2542_s7] sm:$0xff] (!%p274_p9)  ;;  %s307_s26 = sand.u32 (!%p274_p9), 1, %s2081_s28  }
  0x14   : > { %1737 = vmatprep.subr.bf16.mxu0 (!%p274_p9), %v1961_v5  ;;  %v1681_v30 = vld [vmem:[%s2542_s7 + $0x8] ss:$0 sm:$0xff] (!%p274_p9)  ;;  %v583_v44 = vrot.slane (!%p274_p9), %v2300_v43, %v582_v42 }
  0x15   : > { %s2224_s13 = scalar_select %p310_p10, %s2174_s9, 1  ;;  %1796 = vmatpush3.bf16.msra.mxu1 %v1977_v16 }
  0x16   : > { %1801 = vmatprep.subr.bf16.mxu1 %v2091_v2 }
  0x17   : > { %1738 = vmatpush3.bf16.msra.mxu0 %v1962_v6  ;;  %s1901_s21 = smul.u32 24, %s2224_s13  ;;  %s317_s22 = scalar_lea.vmem %s2536_s1, %s2224_s13 }
  0x18   : > { %1739 = vmatprep.subr.bf16.mxu0 %v1963_v7  ;;  %v323_v54 = vld [vmem:[%s317_s22] sm:$0x1]  ;;  %s2095_s13 = smov 64   ;;  %s2103_s22 = smov 104  }
  0x19   : > { %s314_s18 = scalar_lea.vmem %s2535_s0, %s1901_s21  ;;  %vm698_vm3 = vcmp.gt.f32.partialorder %v323_v54, 0.0  ;;  %s2099_s21 = smov 80  }
  0x1a   : > { %v1976_v15 = vld [vmem:[%s314_s18 + $0x4] ss:$12 sps:$4 sm:$0xff]   ;;  %v1978_v17 = vld [vmem:[%s314_s18 + $0x8] ss:$12 sps:$4 sm:$0xff]   ;;  %v1974_v21 = vld [vmem:[%s314_s18] ss:$12 sps:$4 sm:$0xff]  }
  0x1b   : > { %1740 = vmatpush3.bf16.msra.mxu0 %v1964_v8  ;;  %525 = vmatprep.mubr.bf16.mxu0 %v1976_v15  ;;  %v699_v56 = vsel %vm698_vm3, 1, %v2094_v55  ;;  %s2098_s18 = smov 56  }
  0x1c   : > { %1741 = vmatprep.subr.bf16.mxu0 %v1965_v9  ;;  %1798 = vmatmul.mubr.msk.bf16.vlgmr.msra.gmra.mrb[0].mxu1 %vm489_vm1, %v1978_v17  ;;  %v2316_v57 = vrot.slane %v699_v56, %v582_v42 }
  0x1d   : > { %1805 = vmatprep.mubr.msk.bf16.mxu1 %vm2092_vm0, %v2091_v2  ;;  %1802 = vmatpush3.bf16.msra.mxu1 %v1979_v22 }
  0x1e   : > { %1803 = vmatprep.subr.bf16.mxu1 %v2091_v2  ;;  %vm704_vm4 = vcmp.eq.s32.totalorder %v2316_v57, 1  ;;  %v643_v57 = vld [vmem:[%s2539_s4 + $0xc] sm:$0xf] }
  0x1f   : > { %1742 = vmatpush3.bf16.msra.mxu0 %v1966_v11 }
  0x20   : > { %1743 = vmatprep.subr.bf16.mxu0 %v1967_v12 }
  0x21   : > { %1804 = vmatpush3.bf16.msra.mxu1 %v1980_v23 }
  0x22   : > { %1809 = vmatprep.subr.bf16.mxu1 %v2091_v2 }
  0x23   : > { %1744 = vmatpush3.bf16.msra.mxu0 %v1968_v13 }
  0x24   : > { %1745 = vmatprep.subr.bf16.mxu0 %v1969_v14 }
  0x27   : > { %1746 = vmatpush3.bf16.msra.mxu0 %v1970_v18 }
  0x28   : > { %1747 = vmatprep.subr.bf16.mxu0 %v1972_v19 }
  0x2b   : > { %1748 = vmatpush3.bf16.msra.mxu0 %v1973_v20 }
  0x2c   : > { %1821 = vmatprep.subr.bf16.mxu0 %v2091_v2 }
  0x2e   : > { %526 = vmatmul.mubr.bf16.vlgmr.msra.gmra.mrb[0].mxu0 %v1974_v21 }
  0x2f   : > { %1823 = vmatprep.mubr.msk.bf16.mxu0 %vm2092_vm0, %v2091_v2 }
  0xef   : > { %v568_v24 = vpop.f32.mrb[0].mxu1 }
  0xf0   : > { %v1799_v25 = vpop.f32.mrb[1].mxu1 }
  0xf1   : > { %v571_v26 = vpop.f32.mrb[2].mxu1 }
  0xf2   : > { %v1800_v27 = vpop.f32.mrb[3].mxu1 }
 0x101   : > { %v1749_v28 = vpop.f32.mrb[0].mxu0 }
 0x102   : > { %v1750_v29 = vpop.f32.mrb[1].mxu0 }
 0x103   : > { %v1751_v31 = vadd.f32 %v1750_v29, %v1749_v28  ;;  %v1752_v32 = vpop.f32.mrb[2].mxu0 }
 0x104   : > { %v1753_v33 = vpop.f32.mrb[3].mxu0 }
 0x105   : > { %v528_v34 = vadd.f32 %v1751_v31, %v1681_v30  ;;  %v1754_v35 = vadd.f32 %v1753_v33, %v1752_v32 }
 0x107   : > { %v2285_v36 = vadd.f32 %v568_v24, %v528_v34  ;;  %v531_v37 = vadd.f32 %v1754_v35, %v1681_v30 }
 0x109   : > { %v2287_v38 = vadd.f32 %v571_v26, %v531_v37  ;;  %v640_v26 = vld [vmem:[%s2539_s4] sm:$0xf] }
 0x10a   : > { %v784_v27 = vsel %vm782_vm6, %v640_v26, 0 }
 0x10b   : > { %v579_v39 = vpack.c.bf16 %v2287_v38, %v2285_v36  ;;  %1822 = vmatpush3.bf16.msra.mxu0 %v784_v27 }
 0x10c   : > { %1833 = vmatprep.subr.bf16.mxu0 %v2091_v2 }
 0x10d   : > { %1806 = vmatmul.mubr.msk.bf16.vlgmr.msra.gmra.mrb[4].mxu1 %vm489_vm1, %v579_v39 }
 0x10e   : > { %1811 = vmatprep.mubr.msk.bf16.mxu1 %vm2092_vm0, %v2091_v2 }
 0x1e0   : > { %v633_v45 = vpop.f32.mrb[4].mxu1 }
 0x1e1   : > { %v1807_v46 = vpop.f32.mrb[5].mxu1  ;;  %v634_v48 = vadd.f32 %v633_v45, %v583_v44 }
 0x1e2   : > { %v636_v47 = vpop.f32.mrb[6].mxu1 }
 0x1e3   : > { %v637_v49 = vadd.f32 %v636_v47, %v583_v44  ;;  %v1808_v50 = vpop.f32.mrb[7].mxu1 }
 0x1e5   : > { %v2303_v51 = vpack.c.bf16 %v637_v49, %v634_v48 }
 0x1e7   : > { %646 = vrot.lane.b32.xlu0 %v2303_v51, %s2093_s17 }
 0x259   : > { %v647_v52 = vpop.permute.xlu0 %646 }
 0x25a   : > { %v653_v53 = vsel %vm648_vm2, %v647_v52, 0 }
 0x25b   : > { %1810 = vmatpush3.bf16.xpose.msra.mxu1 %v653_v53 }
 0x25c   : > { %1815 = vmatprep.subr.bf16.mxu1 %v2091_v2 }
 0x262   : > { %1812 = vmatmul.mubr.msk.bf16.vlgmr.msra.gmra.mrb[8].mxu1 %vm648_vm2, %v2303_v51 }
 0x263   : > { %1817 = vmatprep.mubr.msk.bf16.mxu1 %vm2092_vm0, %v2091_v2 }
 0x335   : > { %v689_v58 = vpop.f32.mrb[8].mxu1 }
 0x336   : > { %v696_v59 = vmul.f32 0.35355338, %v689_v58  ;;  %v1813_v60 = vpop.f32.mrb[9].mxu1 }
 0x337   : > { %v692_v61 = vpop.f32.mrb[10].mxu1 }
 0x338   : > { %v697_v62 = vmul.f32 0.35355338, %v692_v61  ;;  %v1814_v63 = vpop.f32.mrb[11].mxu1  ;;  %v705_v0 = vsel %vm704_vm4, %v696_v59, -1e+30 }
 0x339   : > { %v708_v1 = vsel %vm707_vm5, %v705_v0, -inf }
 0x33a   : > { %709 = vmax.xlane.f32.xlu0 %v708_v1  ;;  %v706_v3 = vsel %vm704_vm4, %v697_v62, -1e+30 }
 0x33b   : > { %v711_v4 = vsel %vm707_vm5, %v706_v3, -inf }
 0x33c   : > { %712 = vmax.xlane.f32.xlu1 %v711_v4 }
 0x34d   : > { %731 = vrot.lane.b32.xlu1 %v2303_v51, %s2095_s13  ;;  %s2105_s13 = smov [#allocation2]  }
 0x3c7   : > { %v710_v5 = vpop.xlane.xlu0 %709 }
 0x3c8   : > { %v714_v6 = vsub.f32 %v705_v0, %v710_v5 }
 0x3c9   : > { %v713_v7 = vpop.xlane.xlu1 %712 }
 0x3ca   : > { %v716_v8 = vmul.f32 1.442695, %v714_v6  ;;  %v715_v9 = vsub.f32 %v706_v3, %v713_v7 }
 0x3cc   : > { %1987 = vpow2.f32 %v716_v8  ;;  %v718_v10 = vmul.f32 1.442695, %v715_v9 }
 0x3cd   : > { %v732_v11 = vpop.permute.xlu1 %731 }
 0x3ce   : > { %1989 = vpow2.f32 %v718_v10  ;;  %1816 = vmatpush3.bf16.msra.mxu1 %v732_v11  ;;  %v641_v11 = vld [vmem:[%s2539_s4 + $0x4] sm:$0xf] }
 0x3cf   : > { %1827 = vmatprep.subr.bf16.mxu1 %v2091_v2 }
 0x3d6   : > { %v1988_v12 = vpop.eup %1987 }
 0x3d7   : > { %v720_v13 = vsel %vm707_vm5, %v1988_v12, 0.0 }
 0x3d8   : > { %v1990_v14 = vpop.eup %1989  ;;  %721 = vadd.xlane.f32.xlu1 %v720_v13 }
 0x3d9   : > { %v723_v15 = vsel %vm707_vm5, %v1990_v14, 0.0 }
 0x3dc   : > { %724 = vadd.xlane.f32.xlu1 %v723_v15 }
 0x3ed   : > { %835 = vrot.lane.b32.xlu1 %v2303_v51, %s2096_s23  ;;  %s2031_s23 = sshll.u32 %s2105_s13, 4  ;;  %s2032_s23 = int_to_ptr.vmem [resolvable:$false] %s2031_s23 }
 0x3f1   : > { %833 = vrot.lane.b32.xlu1 %v2303_v51, %s2097_s24  ;;  %s2104_s24 = smov 40  }
 0x465   : > { %v722_v16 = vpop.xlane.xlu1 %721 }
 0x466   : > { %1991 = vrcp.f32 %v722_v16 }
 0x469   : > { %v725_v17 = vpop.xlane.xlu1 %724 }
 0x46a   : > { %1993 = vrcp.f32 %v725_v17 }
 0x46d   : > { %v836_v22 = vpop.permute.xlu1 %835 }
 0x46e   : > { %v841_v24 = vsel %vm648_vm2, %v836_v22, 0 }
 0x470   : > { %v1992_v18 = vpop.eup %1991 }
 0x471   : > { %v728_v20 = vmul.f32 %v1992_v18, %v1988_v12  ;;  %v834_v25 = vpop.permute.xlu1 %833  ;;  %v963_v12 = vsel %vm782_vm6, %v641_v11, 0 }
 0x474   : > { %v1994_v19 = vpop.eup %1993 }
 0x475   : > { %v729_v21 = vmul.f32 %v1994_v19, %v1990_v14 }
 0x477   : > { %v730_v23 = vpack.c.bf16 %v729_v21, %v728_v20 }
 0x479   : > { %1818 = vmatmul.mubr.msk.bf16.vlgmr.msra.gmra.mrb[12].mxu1 %vm707_vm5, %v730_v23 }
 0x47a   : > { %1828 = vmatpush3.bf16.xpose.msra.mxu1 %v841_v24  ;;  %1829 = vmatprep.mubr.msk.bf16.mxu1 %vm2092_vm0, %v2091_v2 }
 0x47b   : > { %1839 = vmatprep.subr.bf16.mxu1 %v2091_v2 }
 0x481   : > { %1830 = vmatmul.mubr.msk.bf16.vlgmr.msra.gmra.mrb[16].mxu1 %vm648_vm2, %v834_v25 }
 0x482   : > { %1841 = vmatprep.mubr.msk.bf16.mxu1 %vm2092_vm0, %v2091_v2  ;;  %1840 = vmatpush3.bf16.msra.mxu1 %v963_v12 }
 0x483   : > { %1851 = vmatprep.subr.bf16.mxu1 %v2091_v2 }
 0x54c   : > { %v771_v28 = vpop.f32.mrb[12].mxu1 }
 0x54d   : > { %v1819_v29 = vpop.f32.mrb[13].mxu1 }
 0x54e   : > { %v774_v30 = vpop.f32.mrb[14].mxu1 }
 0x54f   : > { %v778_v31 = vpack.c.bf16 %v774_v30, %v771_v28  ;;  %v1820_v32 = vpop.f32.mrb[15].mxu1 }
 0x551   : > { %1824 = vmatmul.mubr.msk.bf16.vlgmr.msra.gmra.mrb[4].mxu0 %vm648_vm2, %v778_v31 }
 0x552   : > { %1835 = vmatprep.mubr.msk.bf16.mxu0 %vm2092_vm0, %v2091_v2 }
 0x554   : > { %v877_v33 = vpop.f32.mrb[16].mxu1 }
 0x555   : > { %v884_v34 = vmul.f32 0.35355338, %v877_v33  ;;  %v1831_v35 = vpop.f32.mrb[17].mxu1 }
 0x556   : > { %v880_v37 = vpop.f32.mrb[18].mxu1 }
 0x557   : > { %v885_v39 = vmul.f32 0.35355338, %v880_v37  ;;  %v1832_v40 = vpop.f32.mrb[19].mxu1  ;;  %v886_v42 = vsel %vm704_vm4, %v884_v34, -1e+30 }
 0x558   : > { %v888_v44 = vsel %vm707_vm5, %v886_v42, -inf }
 0x559   : > { %889 = vmax.xlane.f32.xlu0 %v888_v44  ;;  %v887_v45 = vsel %vm704_vm4, %v885_v39, -1e+30 }
 0x55a   : > { %v891_v46 = vsel %vm707_vm5, %v887_v45, -inf }
 0x55b   : > { %892 = vmax.xlane.f32.xlu1 %v891_v46 }
 0x56f   : > { %911 = vrot.lane.b32.xlu0 %v2303_v51, %s2098_s18  ;;  %s1679_s18 = sshll.u32 %s307_s26, 4 }
 0x5e6   : > { %v890_v47 = vpop.xlane.xlu0 %889 }
 0x5e7   : > { %v894_v48 = vsub.f32 %v886_v42, %v890_v47  ;;  %v829_v42 = vsub.s32 1, %v2294_v41 }
 0x5e8   : > { %v893_v49 = vpop.xlane.xlu1 %892 }
 0x5e9   : > { %v896_v50 = vmul.f32 1.442695, %v894_v48  ;;  %v895_v52 = vsub.f32 %v887_v45, %v893_v49  ;;  %v830_v44 = vrot.slane %v2300_v43, %v829_v42 }
 0x5ea   : > { %v912_v53 = vpop.permute.xlu0 %911 }
 0x5eb   : > { %1995 = vpow2.f32 %v896_v50  ;;  %v898_v54 = vmul.f32 1.442695, %v895_v52  ;;  %1834 = vmatpush3.bf16.msra.mxu0 %v912_v53 }
 0x5ec   : > { %1845 = vmatprep.subr.bf16.mxu0 %v2091_v2 }
 0x5ed   : > { %1997 = vpow2.f32 %v898_v54 }
 0x5f5   : > { %v1996_v55 = vpop.eup %1995 }
 0x5f6   : > { %v900_v56 = vsel %vm707_vm5, %v1996_v55, 0.0 }
 0x5f7   : > { %v1998_v58 = vpop.eup %1997  ;;  %901 = vadd.xlane.f32.xlu0 %v900_v56 }
 0x5f8   : > { %v903_v59 = vsel %vm707_vm5, %v1998_v58, 0.0 }
 0x5fb   : > { %904 = vadd.xlane.f32.xlu0 %v903_v59 }
 0x611   : > { %1010 = vrot.lane.b32.xlu0 %v2303_v51, %s2099_s21  ;;  %s1732_s21 = sshll.u32 %s2174_s9, 8 }
 0x615   : > { %1008 = vrot.lane.b32.xlu0 %v2303_v51, %s2100_s10  ;;  %s309_s10 = scalar_lea.vmem [#allocation2], %s1679_s18 }
 0x616   : > { %s1604_s12 = sshll.u32 %s309_s10, 4  ;;  %s2491_s12 = int_to_ptr.vmem [resolvable:$true] %s1604_s12 }
 0x617   : > { %s2027_s9 = scalar_lea.vmem %s2491_s12, 256  ;;  %p2034_p0 = scmp.lt.s32.totalorder %s2491_s12, %s2032_s23 }
 0x618   : > { %p2028_p11 = scmp.ne.s32.totalorder %s2491_s12, %s2027_s9 }
 0x61a   : > { %p2029_p12 = pnand %p2028_p11, %p2191_p5 }
 0x61c   : > { %p2030_p13 = pneg %p2029_p12 }
 0x624   : > { %v2359_v60 = vpop.f32.mrb[4].mxu0 }
 0x625   : > { %v1825_v61 = vpop.f32.mrb[5].mxu0  ;;  %v831_v45 = vadd.f32 %v830_v44, %v2359_v60 }
 0x626   : > { %v2361_v62 = vpop.f32.mrb[6].mxu0 }
 0x627   : > { %v1826_v63 = vpop.f32.mrb[7].mxu0  ;;  %v832_v47 = vadd.f32 %v830_v44, %v2361_v62 }
 0x684   : > { %v902_v0 = vpop.xlane.xlu0 %901 }
 0x685   : > { %1999 = vrcp.f32 %v902_v0 }
 0x688   : > { %v905_v1 = vpop.xlane.xlu0 %904 }
 0x689   : > { %2001 = vrcp.f32 %v905_v1  ;;  %v642_v1 = vld [vmem:[%s2539_s4 + $0x8] sm:$0xf] }
 0x68c   : > { %v1011_v7 = vpop.permute.xlu0 %1010 }
 0x68d   : > { %v1016_v9 = vsel %vm648_vm2, %v1011_v7, 0 }
 0x68f   : > { %v2000_v3 = vpop.eup %1999 }
 0x690   : > { %v908_v5 = vmul.f32 %v2000_v3, %v1996_v55  ;;  %v1009_v10 = vpop.permute.xlu0 %1008  ;;  %v1138_v3 = vsel %vm782_vm6, %v642_v1, 0 }
 0x693   : > { %v2002_v4 = vpop.eup %2001 }
 0x694   : > { %v909_v6 = vmul.f32 %v2002_v4, %v1998_v58 }
 0x696   : > { %v910_v8 = vpack.c.bf16 %v909_v6, %v908_v5 }
 0x698   : > { %1836 = vmatmul.mubr.msk.bf16.vlgmr.msra.gmra.mrb[8].mxu0 %vm707_vm5, %v910_v8 }
 0x699   : > { %1846 = vmatpush3.bf16.xpose.msra.mxu0 %v1016_v9  ;;  %1847 = vmatprep.mubr.msk.bf16.mxu0 %vm2092_vm0, %v2091_v2 }
 0x69a   : > { %1857 = vmatprep.subr.bf16.mxu0 %v2091_v2 }
 0x6a0   : > { %1848 = vmatmul.mubr.msk.bf16.vlgmr.msra.gmra.mrb[12].mxu0 %vm648_vm2, %v1009_v10 }
 0x6a1   : > { %1859 = vmatprep.mubr.msk.bf16.mxu0 %vm2092_vm0, %v2091_v2  ;;  %1858 = vmatpush3.bf16.msra.mxu0 %v1138_v3 }
 0x6a2   : > { %1869 = vmatprep.subr.bf16.mxu0 %v2091_v2 }
 0x76b   : > { %v951_v13 = vpop.f32.mrb[8].mxu0 }
 0x76c   : > { %v1837_v14 = vpop.f32.mrb[9].mxu0 }
 0x76d   : > { %v954_v15 = vpop.f32.mrb[10].mxu0 }
 0x76e   : > { %v958_v16 = vpack.c.bf16 %v954_v15, %v951_v13  ;;  %v1838_v17 = vpop.f32.mrb[11].mxu0 }
 0x770   : > { %1842 = vmatmul.mubr.msk.bf16.vlgmr.msra.gmra.mrb[20].mxu1 %vm648_vm2, %v958_v16 }
 0x771   : > { %1853 = vmatprep.mubr.msk.bf16.mxu1 %vm2092_vm0, %v2091_v2 }
 0x773   : > { %v1052_v18 = vpop.f32.mrb[12].mxu0 }
 0x774   : > { %v1059_v19 = vmul.f32 0.35355338, %v1052_v18  ;;  %v1849_v20 = vpop.f32.mrb[13].mxu0 }
 0x775   : > { %v1055_v21 = vpop.f32.mrb[14].mxu0 }
 0x776   : > { %v1060_v22 = vmul.f32 0.35355338, %v1055_v21  ;;  %v1850_v23 = vpop.f32.mrb[15].mxu0  ;;  %v1061_v24 = vsel %vm704_vm4, %v1059_v19, -1e+30 }
 0x777   : > { %v1063_v25 = vsel %vm707_vm5, %v1061_v24, -inf }
 0x778   : > { %1064 = vmax.xlane.f32.xlu1 %v1063_v25  ;;  %v1062_v26 = vsel %vm704_vm4, %v1060_v22, -1e+30 }
 0x779   : > { %v1066_v27 = vsel %vm707_vm5, %v1062_v26, -inf }
 0x77a   : > { %1067 = vmax.xlane.f32.xlu0 %v1066_v27 }
 0x789   : > { %1086 = vrot.lane.b32.xlu1 %v2303_v51, %s2101_s19 }
 0x805   : > { %v1065_v28 = vpop.xlane.xlu1 %1064 }
 0x806   : > { %v1069_v29 = vsub.f32 %v1061_v24, %v1065_v28 }
 0x807   : > { %v1068_v30 = vpop.xlane.xlu0 %1067 }
 0x808   : > { %v1071_v31 = vmul.f32 1.442695, %v1069_v29  ;;  %v1070_v32 = vsub.f32 %v1062_v26, %v1068_v30  ;;  %v1313_v29 = vsel %vm782_vm6, %v643_v57, 0 }
 0x809   : > { %v1087_v33 = vpop.permute.xlu1 %1086 }
 0x80a   : > { %2003 = vpow2.f32 %v1071_v31  ;;  %v1073_v34 = vmul.f32 1.442695, %v1070_v32  ;;  %1852 = vmatpush3.bf16.msra.mxu1 %v1087_v33 }
 0x80b   : > { %1863 = vmatprep.subr.bf16.mxu1 %v2091_v2 }
 0x80c   : > { %2005 = vpow2.f32 %v1073_v34 }
 0x814   : > { %v2004_v35 = vpop.eup %2003 }
 0x815   : > { %v1075_v37 = vsel %vm707_vm5, %v2004_v35, 0.0 }
 0x816   : > { %v2006_v39 = vpop.eup %2005  ;;  %1076 = vadd.xlane.f32.xlu1 %v1075_v37 }
 0x817   : > { %v1078_v40 = vsel %vm707_vm5, %v2006_v39, 0.0 }
 0x81a   : > { %1079 = vadd.xlane.f32.xlu1 %v1078_v40 }
 0x82b   : > { %1185 = vrot.lane.b32.xlu1 %v2303_v51, %s2102_s20  ;;  %s2489_s20 = scalar_lea.hbm %s2543_s8, %s1732_s21 }
 0x82f   : > { %1183 = vrot.lane.b32.xlu1 %v2303_v51, %s2103_s22  ;;  %s2494_s22 = scalar_lea.sflag [#allocation3], %s307_s26 }
 0x843   : > { %v999_v46 = vpop.f32.mrb[20].mxu1 }
 0x844   : > { %v2395_v48 = vadd.f32 %v999_v46, %v831_v45  ;;  %v1843_v49 = vpop.f32.mrb[21].mxu1 }
 0x845   : > { %v1002_v50 = vpop.f32.mrb[22].mxu1 }
 0x846   : > { %v2397_v52 = vadd.f32 %v1002_v50, %v832_v47  ;;  %v1844_v53 = vpop.f32.mrb[23].mxu1 }
 0x8a3   : > { %v1077_v54 = vpop.xlane.xlu1 %1076 }
 0x8a4   : > { %2007 = vrcp.f32 %v1077_v54 }
 0x8a7   : > { %v1080_v55 = vpop.xlane.xlu1 %1079 }
 0x8a8   : > { %2009 = vrcp.f32 %v1080_v55 }
 0x8ab   : > { %v1186_v63 = vpop.permute.xlu1 %1185 }
 0x8ac   : > { %v1191_v0 = vsel %vm648_vm2, %v1186_v63, 0 }
 0x8ae   : > { %v2008_v56 = vpop.eup %2007 }
 0x8af   : > { %v1083_v59 = vmul.f32 %v2008_v56, %v2004_v35  ;;  %v1184_v62 = vpop.permute.xlu1 %1183 }
 0x8b2   : > { %v2010_v58 = vpop.eup %2009 }
 0x8b3   : > { %v1084_v61 = vmul.f32 %v2010_v58, %v2006_v39 }
 0x8b5   : > { %v1085_v60 = vpack.c.bf16 %v1084_v61, %v1083_v59 }
 0x8b7   : > { %1854 = vmatmul.mubr.msk.bf16.vlgmr.msra.gmra.mrb[24].mxu1 %vm707_vm5, %v1085_v60 }
 0x8b8   : > { %1864 = vmatpush3.bf16.xpose.msra.mxu1 %v1191_v0  ;;  %1865 = vmatprep.mubr.msk.bf16.mxu1 %vm2092_vm0, %v2091_v2 }
 0x8b9   : > { %1875 = vmatprep.subr.bf16.mxu1 %v2091_v2 }
 0x8bf   : > { %1866 = vmatmul.mubr.msk.bf16.vlgmr.msra.gmra.mrb[28].mxu1 %vm648_vm2, %v1184_v62 }
 0x8c0   : > { %1877 = vmatprep.mubr.msk.bf16.mxu1 %vm2092_vm0, %v2091_v2  ;;  %1876 = vmatpush3.bf16.msra.mxu1 %v1313_v29 }
 0x8c1   : > { %1889 = vmatprep.subr.bf16.mxu1 %v2091_v2 }
 0x98a   : > { %v1126_v4 = vpop.f32.mrb[24].mxu1 }
 0x98b   : > { %v1855_v5 = vpop.f32.mrb[25].mxu1 }
 0x98c   : > { %v1129_v6 = vpop.f32.mrb[26].mxu1 }
 0x98d   : > { %v1133_v7 = vpack.c.bf16 %v1129_v6, %v1126_v4  ;;  %v1856_v8 = vpop.f32.mrb[27].mxu1 }
 0x98f   : > { %1860 = vmatmul.mubr.msk.bf16.vlgmr.msra.gmra.mrb[16].mxu0 %vm648_vm2, %v1133_v7 }
 0x990   : > { %1871 = vmatprep.mubr.msk.bf16.mxu0 %vm2092_vm0, %v2091_v2 }
 0x992   : > { %v1227_v9 = vpop.f32.mrb[28].mxu1 }
 0x993   : > { %v1234_v10 = vmul.f32 0.35355338, %v1227_v9  ;;  %v1867_v11 = vpop.f32.mrb[29].mxu1 }
 0x994   : > { %v1230_v12 = vpop.f32.mrb[30].mxu1  ;;  %v1983_v11 = vld [vmem:[%s2541_s6] sm:$0xff]  }
 0x995   : > { %v1235_v13 = vmul.f32 0.35355338, %v1230_v12  ;;  %v1868_v14 = vpop.f32.mrb[31].mxu1  ;;  %v1236_v15 = vsel %vm704_vm4, %v1234_v10, -1e+30  ;;  %v1982_v10 = vld [vmem:[%s2540_s5 + $0x8] sm:$0xff]  }
 0x996   : > { %v1238_v16 = vsel %vm707_vm5, %v1236_v15, -inf  ;;  %v1984_v12 = vld [vmem:[%s2541_s6 + $0x8] sm:$0xff]  }
 0x997   : > { %1239 = vmax.xlane.f32.xlu0 %v1238_v16  ;;  %v1237_v17 = vsel %vm704_vm4, %v1235_v13, -1e+30 }
 0x998   : > { %v1241_v18 = vsel %vm707_vm5, %v1237_v17, -inf }
 0x999   : > { %1242 = vmax.xlane.f32.xlu1 %v1241_v18 }
 0xa24   : > { %v1240_v19 = vpop.xlane.xlu0 %1239 }
 0xa25   : > { %v1244_v20 = vsub.f32 %v1236_v15, %v1240_v19  ;;  %v1389_v19 = vsub.s32 4, %v2294_v41 }
 0xa26   : > { %v1243_v21 = vpop.xlane.xlu1 %1242 }
 0xa27   : > { %v1246_v22 = vmul.f32 1.442695, %v1244_v20  ;;  %v1245_v23 = vsub.f32 %v1237_v17, %v1243_v21  ;;  %v1390_v21 = vrot.slane %v2300_v43, %v1389_v19 }
 0xa29   : > { %2011 = vpow2.f32 %v1246_v22  ;;  %v1248_v24 = vmul.f32 1.442695, %v1245_v23  ;;  %v1395_v23 = vsub.s32 5, %v2294_v41 }
 0xa2b   : > { %2013 = vpow2.f32 %v1248_v24 }
 0xa33   : > { %v2012_v25 = vpop.eup %2011 }
 0xa34   : > { %v1250_v26 = vsel %vm707_vm5, %v2012_v25, 0.0 }
 0xa35   : > { %v2014_v27 = vpop.eup %2013  ;;  %1251 = vadd.xlane.f32.xlu0 %v1250_v26 }
 0xa36   : > { %v1253_v28 = vsel %vm707_vm5, %v2014_v27, 0.0 }
 0xa39   : > { %1254 = vadd.xlane.f32.xlu0 %v1253_v28 }
 0xa4f   : > { %1261 = vrot.lane.b32.xlu0 %v2303_v51, %s2104_s24  ;;  %s2033_s24 = scalar_lea.vmem %s2032_s23, 512 }
 0xa50   : > { %p2035_p1 = scmp.lt.s32.totalorder %s2033_s24, %s2027_s9 }
 0xa52   : > { %p2036_p2 = por %p2035_p1, %p2034_p0 }
 0xa54   : > { %p2037_p3 = pnand %p2036_p2, %p2030_p13 }
 0xa62   : > { %v1174_v30 = vpop.f32.mrb[16].mxu0 }
 0xa63   : > { %v1181_v31 = vadd.f32 %v1174_v30, %v2395_v48  ;;  %v1861_v32 = vpop.f32.mrb[17].mxu0 }
 0xa64   : > { %v1177_v33 = vpop.f32.mrb[18].mxu0  ;;  %v1986_v32 = vld [vmem:[%s2541_s6 + $0x18] sm:$0xff]  }
 0xa65   : > { %v1182_v34 = vadd.f32 %v1177_v33, %v2397_v52  ;;  %v1862_v35 = vpop.f32.mrb[19].mxu0  ;;  %v1406_v33 = vsub.s32 2, %v2294_v41 }
 0xac2   : > { %v1252_v37 = vpop.xlane.xlu0 %1251 }
 0xac3   : > { %2015 = vrcp.f32 %v1252_v37 }
 0xac6   : > { %v1255_v51 = vpop.xlane.xlu0 %1254 }
 0xac7   : > { %2017 = vrcp.f32 %v1255_v51 }
 0xaca   : > { %v1262_v39 = vpop.permute.xlu0 %1261 }
 0xacb   : > { %1870 = vmatpush3.bf16.msra.mxu0 %v1262_v39 }
 0xacc   : > { %1881 = vmatprep.subr.bf16.mxu0 %v2091_v2 }
 0xacd   : > { %v2016_v40 = vpop.eup %2015 }
 0xace   : > { %v1258_v44 = vmul.f32 %v2016_v40, %v2012_v25 }
 0xad1   : > { %v2018_v42 = vpop.eup %2017 }
 0xad2   : > { %v1259_v45 = vmul.f32 %v2018_v42, %v2014_v27  ;;  %v1396_v27 = vrot.slane %v2300_v43, %v1395_v23 }
 0xad4   : > { %v1260_v46 = vpack.c.bf16 %v1259_v45, %v1258_v44 }
 0xad6   : > { %1872 = vmatmul.mubr.msk.bf16.vlgmr.msra.gmra.mrb[20].mxu0 %vm707_vm5, %v1260_v46 }
 0xad7   : > { %1885 = vmatprep.mubr.msk.bf16.mxu0 %vm2092_vm0, %v2091_v2 }
 0xba9   : > { %v1301_v47 = vpop.f32.mrb[20].mxu0 }
 0xbaa   : > { %v1873_v48 = vpop.f32.mrb[21].mxu0 }
 0xbab   : > { %v1304_v49 = vpop.f32.mrb[22].mxu0 }
 0xbac   : > { %v1308_v50 = vpack.c.bf16 %v1304_v49, %v1301_v47  ;;  %v1874_v52 = vpop.f32.mrb[23].mxu0 }
 0xbae   : > { %1878 = vmatmul.mubr.msk.bf16.vlgmr.msra.gmra.mrb[32].mxu1 %vm648_vm2, %v1308_v50 }
 0xbaf   : > { %1897 = vmatprep.mubr.msk.bf16.mxu1 %vm2092_vm0, %v2091_v2  ;;  %1890 = vmatpush3.bf16.msra.mxu1 %v1983_v11  ;;  %v1578_v11 = vsub.s32 6, %v2294_v41 }
 0xbb0   : > { %1891 = vmatprep.subr.bf16.mxu1 %v2091_v2 }
 0xbb3   : > { %1892 = vmatpush3.bf16.msra.mxu1 %v1984_v12  ;;  %v1584_v12 = vsub.s32 7, %v2294_v41 }
 0xbb4   : > { %1893 = vmatprep.subr.bf16.mxu1 %v2091_v2 }
 0xc81   : > { %v1349_v53 = vpop.f32.mrb[32].mxu1 }
 0xc82   : > { %v1356_v54 = vadd.f32 %v1349_v53, %v1181_v31  ;;  %v1879_v55 = vpop.f32.mrb[33].mxu1  ;;  %v1985_v31 = vld [vmem:[%s2541_s6 + $0x10] sm:$0xff]  }
 0xc83   : > { %v1352_v56 = vpop.f32.mrb[34].mxu1  ;;  %1894 = vmatpush3.bf16.msra.mxu1 %v1985_v31 }
 0xc84   : > { %v1357_v58 = vadd.f32 %v1352_v56, %v1182_v34  ;;  %v1880_v59 = vpop.f32.mrb[35].mxu1  ;;  %v1358_v61 = vadd.f32 %v1356_v54, %v2285_v36  ;;  %1895 = vmatprep.subr.bf16.mxu1 %v2091_v2  ;;  %v1407_v34 = vrot.slane %v2300_v43, %v1406_v33 }
 0xc86   : > { %v1360_v63 = vsel %vm489_vm1, %v1358_v61, 0.0  ;;  %v1359_v60 = vadd.f32 %v1357_v58, %v2287_v38  ;;  %v1981_v38 = vld [vmem:[%s2540_s5] sm:$0xff]  }
 0xc87   : > { %1361 = vadd.xlane.f32.xlu0 %v1360_v63  ;;  %1882 = vmatpush3.bf16.msra.mxu0 %v1981_v38 }
 0xc88   : > { %v1363_v0 = vsel %vm489_vm1, %v1359_v60, 0.0  ;;  %1883 = vmatprep.subr.bf16.mxu0 %v2091_v2  ;;  %1896 = vmatpush3.bf16.msra.mxu1 %v1986_v32  ;;  %v1477_v2 = vsub.s32 3, %v2294_v41 }
 0xc89   : > { %1364 = vadd.xlane.f32.xlu1 %v1363_v0 }
 0xc8a   : > { %v1478_v47 = vrot.slane %v2300_v43, %v1477_v2 }
 0xc8b   : > { %1884 = vmatpush3.bf16.msra.mxu0 %v1982_v10 }
 0xd14   : > { %v1362_v62 = vpop.xlane.xlu0 %1361 }
 0xd15   : > { %v1367_v1 = vmul.f32 0.03125, %v1362_v62 }
 0xd16   : > { %v1365_v3 = vpop.xlane.xlu1 %1364 }
 0xd17   : > { %v1369_v4 = vsub.f32 %v1358_v61, %v1367_v1  ;;  %v1368_v5 = vmul.f32 0.03125, %v1365_v3 }
 0xd19   : > { %v1370_v6 = vsub.f32 %v1359_v60, %v1368_v5  ;;  %v1371_v7 = vmul.f32 %v1369_v4, %v1369_v4 }
 0xd1b   : > { %v1373_v8 = vsel %vm489_vm1, %v1371_v7, 0.0  ;;  %v1372_v9 = vmul.f32 %v1370_v6, %v1370_v6 }
 0xd1c   : > { %1374 = vadd.xlane.f32.xlu1 %v1373_v8 }
 0xd1d   : > { %v1376_v36 = vsel %vm489_vm1, %v1372_v9, 0.0 }
 0xd20   : > { %1377 = vadd.xlane.f32.xlu1 %v1376_v36 }
 0xda9   : > { %v1375_v13 = vpop.xlane.xlu1 %1374 }
 0xdaa   : > { %v1379_v14 = vmul.f32 0.03125, %v1375_v13  ;;  %v1579_v13 = vrot.slane %v2300_v43, %v1578_v11 }
 0xdac   : > { %v1381_v15 = vadd.f32 1e-05, %v1379_v14 }
 0xdad   : > { %v1378_v16 = vpop.xlane.xlu1 %1377 }
 0xdae   : > { %2019 = vrsqrt.f32 %v1381_v15  ;;  %v1380_v17 = vmul.f32 0.03125, %v1378_v16  ;;  %v1585_v16 = vrot.slane %v2300_v43, %v1584_v12 }
 0xdb0   : > { %v1382_v18 = vadd.f32 1e-05, %v1380_v17 }
 0xdb2   : > { %2021 = vrsqrt.f32 %v1382_v18 }
 0xdb8   : > { %v2020_v20 = vpop.eup %2019 }
 0xdb9   : > { %v1385_v22 = vmul.f32 %v2020_v20, %v1369_v4 }
 0xdbb   : > { %v1391_v25 = vmul.f32 %v1390_v21, %v1385_v22 }
 0xdbc   : > { %v2022_v24 = vpop.eup %2021 }
 0xdbd   : > { %v1386_v26 = vmul.f32 %v2022_v24, %v1370_v6  ;;  %v1397_v57 = vadd.f32 %v1396_v27, %v1391_v25 }
 0xdbf   : > { %v1392_v28 = vmul.f32 %v1390_v21, %v1386_v26 }
 0xdc1   : > { %v1398_v29 = vadd.f32 %v1396_v27, %v1392_v28 }
 0xdc3   : > { %v1403_v30 = vpack.c.bf16 %v1398_v29, %v1397_v57 }
 0xdc5   : > { %1886 = vmatmul.mubr.msk.bf16.vlgmr.msra.gmra.mrb[24].mxu0 %vm489_vm1, %v1403_v30 }
 0xe98   : > { %v1457_v35 = vpop.f32.mrb[24].mxu0 }
 0xe99   : > { %v1458_v37 = vadd.f32 %v1457_v35, %v1407_v34  ;;  %v1887_v51 = vpop.f32.mrb[25].mxu0 }
 0xe9a   : > { %v1460_v39 = vpop.f32.mrb[26].mxu0 }
 0xe9b   : > { %v1461_v40 = vadd.f32 %v1460_v39, %v1407_v34  ;;  %v1888_v42 = vpop.f32.mrb[27].mxu0  ;;  %v1464_v44 = vmax.f32 %v1458_v37, 0.0 }
 0xe9d   : > { %v1465_v45 = vmax.f32 %v1461_v40, 0.0 }
 0xe9f   : > { %v1474_v46 = vpack.c.bf16 %v1465_v45, %v1464_v44 }
 0xea1   : > { %1898 = vmatmul.mubr.msk.bf16.vlgmr.msra.gmra.mrb[36].mxu1 %vm1503_vm7, %v1474_v46 }
 0xf74   : > { %v1541_v48 = vpop.f32.mrb[36].mxu1 }
 0xf75   : > { %v1542_v49 = vadd.f32 %v1541_v48, %v1478_v47  ;;  %v1899_v50 = vpop.f32.mrb[37].mxu1 }
 0xf76   : > { %v1544_v52 = vpop.f32.mrb[38].mxu1 }
 0xf77   : > { %v1545_v53 = vadd.f32 %v1544_v52, %v1478_v47  ;;  %v1900_v54 = vpop.f32.mrb[39].mxu1  ;;  %v1548_v55 = vadd.f32 %v1542_v49, %v1397_v57 }
 0xf79   : > { %v1550_v56 = vsel %vm489_vm1, %v1548_v55, 0.0  ;;  %v1549_v58 = vadd.f32 %v1545_v53, %v1398_v29 }
 0xf7a   : > { %1551 = vadd.xlane.f32.xlu1 %v1550_v56 }
 0xf7b   : > { %v1553_v59 = vsel %vm489_vm1, %v1549_v58, 0.0 }
 0xf7e   : > { %1554 = vadd.xlane.f32.xlu1 %v1553_v59 }
0x1007   : > { %v1552_v61 = vpop.xlane.xlu1 %1551 }
0x1008   : > { %v1556_v63 = vmul.f32 0.03125, %v1552_v61 }
0x100a   : > { %v1558_v60 = vsub.f32 %v1548_v55, %v1556_v63 }
0x100b   : > { %v1555_v0 = vpop.xlane.xlu1 %1554 }
0x100c   : > { %v1557_v62 = vmul.f32 0.03125, %v1555_v0  ;;  %v1560_v1 = vmul.f32 %v1558_v60, %v1558_v60 }
0x100e   : > { %v1559_v3 = vsub.f32 %v1549_v58, %v1557_v62  ;;  %v1562_v4 = vsel %vm489_vm1, %v1560_v1, 0.0 }
0x100f   : > { %1563 = vadd.xlane.f32.xlu1 %v1562_v4 }
0x1010   : > { %v1561_v5 = vmul.f32 %v1559_v3, %v1559_v3 }
0x1012   : > { %v1565_v6 = vsel %vm489_vm1, %v1561_v5, 0.0 }
0x1013   : > { %1566 = vadd.xlane.f32.xlu1 %v1565_v6 }
0x109c   : > { %v1564_v7 = vpop.xlane.xlu1 %1563 }
0x109d   : > { %v1568_v8 = vmul.f32 0.03125, %v1564_v7 }
0x109f   : > { %v1570_v9 = vadd.f32 1e-05, %v1568_v8 }
0x10a0   : > { %v1567_v36 = vpop.xlane.xlu1 %1566 }
0x10a1   : > { %2023 = vrsqrt.f32 %v1570_v9  ;;  %v1569_v38 = vmul.f32 0.03125, %v1567_v36 }
0x10a3   : > { %v1571_v10 = vadd.f32 1e-05, %v1569_v38 }
0x10a5   : > { %2025 = vrsqrt.f32 %v1571_v10 }
0x10ab   : > { %v2024_v14 = vpop.eup %2023 }
0x10ac   : > { %v1574_v15 = vmul.f32 %v2024_v14, %v1558_v60 }
0x10ae   : > { %v1580_v17 = vmul.f32 %v1579_v13, %v1574_v15 }
0x10af   : > { %v2026_v18 = vpop.eup %2025 }
0x10b0   : > { %v1575_v19 = vmul.f32 %v2026_v18, %v1559_v3  ;;  %v1586_v20 = vadd.f32 %v1585_v16, %v1580_v17 }
0x10b2   : > { %v1581_v21 = vmul.f32 %v1579_v13, %v1575_v19  ;;  %1588 = vst.msk [vmem:[%s309_s10] sm:$0xff] %vm489_vm1, %v1586_v20 }
0x10b4   : > { %v1587_v41 = vadd.f32 %v1585_v16, %v1581_v21 }
0x10b6   : > { %1589 = vst.msk [vmem:[%s309_s10 + $0x8] sm:$0xff] %vm489_vm1, %v1587_v41 }
0x10b7   : > { %2040 = shalt.err (!%p2037_p3)
}
0x10b8   : > { %s2041_s25 = scalar_lea.hbm %s2489_s20, 256  ;;  %s2045_s21 = scalar_lea.hbm %s2543_s8, 512 }
0x10b9   : > { %p2042_p4 = scmp.ne.s32.totalorder %s2489_s20, %s2041_s25  ;;  %p2046_p9 = scmp.lt.u32.totalorder %s2489_s20, %s2543_s8 }
0x10ba   : > { %p2047_p10 = scmp.lt.u32.totalorder %s2045_s21, %s2041_s25  ;;  %p2049_p12 = scmp.lt.u32.totalorder %s2041_s25, %s2489_s20 }
0x10bb   : > { %p2043_p7 = pnand %p2042_p4, %p2191_p5 }
0x10bc   : > { %p2048_p11 = por %p2047_p10, %p2046_p9 }
0x10bd   : > { %p2044_p8 = pneg %p2043_p7 }
0x10be   : > { %p2050_p13 = por %p2049_p12, %p2048_p11 }
0x10c0   : > { %p2051_p0 = pnand %p2050_p13, %p2044_p8 }
0x10c2   : > { %2054 = shalt.err (!%p2051_p0)
}
0x10c3   : > { %s2106_s19 = smov 128   ;;  %s2107_s9 = smov 8  }
0x10c4   : > { %1902 = dma.vmem_to_hbm [thread:$0]  (%p2191_p5), %s2491_s12, 256, %s2489_s20, %s2494_s22, %s2106_s19, %s2106_s19, %s2107_s9  }
0x10c5 PF: > { %p1908_p1 = scmp.ge.s32.totalorder %s2089_s30, 2  ;;  %s1619_s13 = sand.u32 1, %s2077_s27  }
0x10c6   : > { %s1620_s23 = scalar_lea.sflag [#allocation3], %s1619_s13 }
0x10c7   : > { %p1905_p2 = pnand %p1908_p1, %p2195_p6 }
0x10c9   : > { %2072 = dma.done.wait (!%p1905_p2), %s1620_s23, 256  }
0x10ca   : > { %2074 = vsyncadd (!%p1905_p2), %s1620_s23, 4294967040  ;;  %p18_p3 = scmp.ge.s32.totalorder %s2178_s11, 4   ;;  %s2546_s27 = smov %s2081_s28 }
0x10cb   : > { %s2547_s28 = smov %s2085_s29  ;;  %s2548_s29 = smov %s2189_s14 }
0x10cc   : > { %s2549_s30 = smov %s2178_s11  ;;  %20 = sbr.rel (!%p18_p3) target bundleno = 3 (0x3), region = 90 }
0x10d3   :  { %1625 = vsyncpa [#allocation3], 1 }
0x10d4   :  { %1627 = vsyncpa [#allocation3 + $0x1], 1 }

// kernel: streader_forward.6
= control target key start
LH: loop header
LB: loop body
LE: loop exit
PB: predicated region body
PF: predicated region fallthrough
CT: control target
= control target key end

     0   :  { %s2549_s28 = smov 0   ;;  %s3011_s0 = inlined_call_operand.vmem [shape: bf16[2,16,32], index: 0, kind: input, shape index: {}]   ;;  %s3012_s1 = inlined_call_operand.vmem [shape: bf16[2,8,32], index: 1, kind: input, shape index: {}]   ;;  %s3013_s2 = inlined_call_operand.vmem [shape: bf16[2,8,32], index: 2, kind: input, shape index: {}]   ;;  %s3014_s3 = inlined_call_operand.vmem [shape: f32[2,1,16], index: 3, kind: input, shape index: {}]   ;;  %s3015_s4 = inlined_call_operand.vmem [shape: f32[2,1,8], index: 4, kind: input, shape index: {}]   ;;  %s3016_s5 = inlined_call_operand.vmem [shape: f32[2,1,8], index: 5, kind: input, shape index: {}]   ;;  %s3017_s6 = inlined_call_operand.vmem [shape: f32[2,16,1], index: 6, kind: input, shape index: {}]   ;;  %s3018_s7 = inlined_call_operand.vmem [shape: f32[2,8,1], index: 7, kind: input, shape index: {}]   ;;  %s3019_s8 = inlined_call_operand.vmem [shape: f32[2,8,1], index: 8, kind: input, shape index: {}]   ;;  %s3020_s9 = inlined_call_operand.vmem [shape: bf16[32,32], index: 9, kind: input, shape index: {}]   ;;  %s3021_s10 = inlined_call_operand.vmem [shape: bf16[32,32], index: 10, kind: input, shape index: {}]   ;;  %s3022_s11 = inlined_call_operand.vmem [shape: bf16[32,32], index: 11, kind: input, shape index: {}]   ;;  %s3023_s12 = inlined_call_operand.vmem [shape: bf16[2,16,288], index: 12, kind: output, shape index: {0}]   ;;  %s3024_s13 = inlined_call_operand.vmem [shape: bf16[2,8,288], index: 13, kind: output, shape index: {1}]   ;;  %s3025_s14 = inlined_call_operand.vmem [shape: bf16[2,8,288], index: 14, kind: output, shape index: {2}]  }
   0x1 LB: > { %s2147_s8 = sadd.s32 4294967295, %s2466_s28   ;;  %p2151_p0 = scmp.ge.s32.totalorder %s2466_s28, 1  ;;  %s2466_s28 = sphi %s2549_s28, %s25_s28  }
   0x2   : > { %p487_p1 = scmp.lt.s32.totalorder %s2466_s28, 3 }
   0x4   : > { %p488_p2 = pnand %p2151_p0, %p487_p1 }
   0x5   : > { %v2417_v0 = vld [vmem:[%s3020_s9] sm:$0xff] (!%p488_p2)   ;;  %v2468_v1 = vmov (!%p488_p2), 0.0   ;;  %v2418_v2 = vld [vmem:[%s3020_s9 + $0x8] sm:$0xff] (!%p488_p2)   ;;  %vm2469_vm0 = vmmov (!%p488_p2), 0   ;;  %p573_p3 = scmp.lt.s32.totalorder (!%p488_p2), %s2147_s8, 1  ;;  %vm658_vm1 = vcmask (!%p488_p2), 261120   ;;  %v755_v18 = vlaneseq (!%p488_p2) }
   0x6   : > { %491 = sbr.rel (%p488_p2) target bundleno = 2981 (0xba5), region = 68  ;;  %2286 = vmatprep.subr.bf16.mxu0 (!%p488_p2), %v2468_v1  ;;  %2294 = vmatprep.subr.bf16.mxu1 (!%p488_p2), %v2468_v1  ;;  %v2470_v8 = vmov (!%p488_p2), 0   ;;  %vm762_vm7 = vcmask (!%p488_p2), 64512   ;;  %vm892_vm9 = vcmask (!%p488_p2), 130048   ;;  %vm830_vm10 = vcmask (!%p488_p2), 1043456  }
   0x7   : > { %2287 = vmatpush3.bf16.msra.mxu0 (!%p488_p2), %v2417_v0  ;;  %2290 = vmatprep.mubr.msk.bf16.mxu0 (!%p488_p2), %vm2469_vm0, %v2468_v1  ;;  %v2618_v20 = vshrl.u32 (!%p488_p2), %v755_v18, 7  ;;  %vm1721_vm11 = vcmask (!%p488_p2), 257024  }
   0x8   : > { %2288 = vmatprep.subr.bf16.mxu0 (!%p488_p2), %v2468_v1  ;;  %2296 = vmatprep.mubr.msk.bf16.mxu1 (!%p488_p2), %vm2469_vm0, %v2468_v1 }
   0x9   : > { %2416 = vset.pattern.permute.xlu0 (!%p488_p2), %v2470_v8  ;;  %v757_v21 = vsub.s32 (!%p488_p2), 0, %v2618_v20 }
   0xb   : > { %2289 = vmatpush3.bf16.msra.mxu0 (!%p488_p2), %v2418_v2 }
   0xc   : > { %2300 = vmatprep.subr.bf16.mxu0 (!%p488_p2), %v2468_v1 }
   0xd   : > { %s3027_s8 = smov (!%p573_p3, %s2147_s8), 1 }
   0xe   : > { %s2217_s17 = sshll.u32 %s3027_s8, 3  ;;  %s2154_s20 = sshll.u32 %s3027_s8, 2 }
   0xf   : > { %s577_s3 = scalar_lea.vmem %s3011_s0, %s2217_s17  ;;  %s581_s23 = scalar_lea.vmem %s3012_s1, %s2154_s20 }
  0x10   : > { %v2580_v3 = vld [vmem:[%s577_s3] sm:$0xf]  ;;  %v2582_v4 = vld [vmem:[%s577_s3 + $0x4] sm:$0xf]  ;;  %s2218_s24 = sshll.u32 %s3027_s8, 4  ;;  %s591_s15 = scalar_lea.vmem %s3015_s4, %s3027_s8 }
  0x11   : > { %v2591_v5 = vcombine.low %v2580_v3, %v2582_v4  ;;  %v2593_v6 = vld [vmem:[%s581_s23] sm:$0xf]  ;;  %s599_s27 = scalar_lea.vmem %s3017_s6, %s2218_s24  ;;  %s2400_s21 = smul.u32 24, %s3027_s8 }
  0x12   : > { %v708_v7 = vsel %vm658_vm1, %v2593_v6, 0  ;;  %v634_v9 = vld [vmem:[%s599_s27] sm:$0xff]  ;;  %v635_v10 = vld [vmem:[%s599_s27 + $0x8] sm:$0xff]  ;;  %s2401_s25 = smul.u32 12, %s3027_s8  ;;  %s585_s16 = scalar_lea.vmem %s3013_s2, %s2154_s20 }
  0x13   : > { %2291 = vmatmul.mubr.msk.bf16.vlgmr.msra.gmra.mrb[0].mxu0 %vm658_vm1, %v2591_v5  ;;  %2295 = vmatpush3.bf16.xpose.msra.mxu1 %v708_v7  ;;  %vm785_vm2 = vcmp.gt.f32.partialorder %v634_v9, 0.0  ;;  %vm786_vm3 = vcmp.gt.f32.partialorder %v635_v10, 0.0  ;;  %v632_v19 = vld [vmem:[%s591_s15] sm:$0x1]  ;;  %s2685_s24 = scalar_lea.vmem %s3023_s12, %s2400_s21  ;;  %s594_s19 = scalar_lea.vmem %s3016_s5, %s3027_s8 }
  0x14   : > { %2306 = vmatprep.subr.bf16.mxu1 %v2468_v1  ;;  %2302 = vmatprep.mubr.msk.bf16.mxu0 %vm2469_vm0, %v2468_v1  ;;  %v787_v11 = vsel %vm785_vm2, 1, %v2470_v8  ;;  %v788_v12 = vsel %vm786_vm3, 1, %v2470_v8  ;;  %vm753_vm4 = vcmp.gt.f32.partialorder %v632_v19, 0.0  ;;  %v2650_v19 = vsel %vm830_vm10, %v2593_v6, 0  ;;  %1722 = vst.msk [vmem:[%s2685_s24] sm:$0xf] %vm1721_vm11, %v2580_v3  ;;  %s2699_s29 = scalar_lea.vmem %s3024_s13, %s2401_s25  ;;  %s2825_s30 = scalar_lea.vmem %s3025_s14, %s2401_s25 }
  0x15   : > { %790 = vperm.xlu0 %2416, %v787_v11   ;;  %v754_v22 = vsel %vm753_vm4, 1, %v2470_v8  ;;  %2301 = vmatpush3.bf16.msra.mxu0 %v2650_v19  ;;  %1723 = vst.msk [vmem:[%s2685_s24 + $0xc] sm:$0xf] %vm1721_vm11, %v2582_v4  ;;  %1833 = vst.msk [vmem:[%s2699_s29] sm:$0xf] %vm1721_vm11, %v2593_v6  ;;  %s2471_s8 = smov 32  }
  0x16   : > { %v758_v24 = vrot.slane %v754_v22, %v757_v21  ;;  %2312 = vmatprep.subr.bf16.mxu0 %v2468_v1  ;;  %s2473_s20 = smov 96   ;;  %vm1750_vm2 = vcmask 781824  }
  0x18   : > { %vm759_vm5 = vcmp.eq.s32.totalorder %v758_v24, 1 }
  0x19   : > { %793 = vperm.xlu0 %2416, %v788_v12  }
  0x94   : > { %v2622_v23 = vpop.permute.xlu0 %790 }
  0x95   : > { %vm795_vm6 = vcmp.eq.s32.totalorder %v2622_v23, 1 }
  0x98   : > { %v2626_v26 = vpop.permute.xlu0 %793 }
  0x99   : > { %vm796_vm8 = vcmp.eq.s32.totalorder %v2626_v26, 1 }
  0xe6   : > { %v696_v13 = vpop.f32.mrb[0].mxu0 }
  0xe7   : > { %v2292_v14 = vpop.f32.mrb[1].mxu0 }
  0xe8   : > { %v699_v15 = vpop.f32.mrb[2].mxu0 }
  0xe9   : > { %v703_v16 = vpack.c.bf16 %v699_v15, %v696_v13  ;;  %v2293_v17 = vpop.f32.mrb[3].mxu0 }
  0xeb   : > { %2297 = vmatmul.mubr.msk.bf16.vlgmr.msra.gmra.mrb[0].mxu1 %vm658_vm1, %v703_v16 }
  0xec   : > { %2307 = vmatpush3.bf16.msra.mxu1 %v2591_v5  ;;  %2308 = vmatprep.mubr.msk.bf16.mxu1 %vm2469_vm0, %v2468_v1 }
  0xed   : > { %2318 = vmatprep.subr.bf16.mxu1 %v2468_v1 }
 0x1be   : > { %v744_v25 = vpop.f32.mrb[0].mxu1 }
 0x1bf   : > { %v751_v27 = vmul.f32 0.17677669, %v744_v25  ;;  %v2298_v28 = vpop.f32.mrb[1].mxu1 }
 0x1c0   : > { %v747_v29 = vpop.f32.mrb[2].mxu1 }
 0x1c1   : > { %v797_v30 = vsel %vm795_vm6, %v751_v27, -1e+30  ;;  %v752_v31 = vmul.f32 0.17677669, %v747_v29  ;;  %v2299_v32 = vpop.f32.mrb[3].mxu1 }
 0x1c2   : > { %v760_v33 = vsel %vm759_vm5, %v751_v27, -1e+30  ;;  %v799_v36 = vsel %vm762_vm7, %v797_v30, -inf }
 0x1c3   : > { %v798_v34 = vsel %vm796_vm8, %v752_v31, -1e+30  ;;  %v761_v35 = vsel %vm759_vm5, %v752_v31, -1e+30  ;;  %v763_v2 = vsel %vm762_vm7, %v760_v33, -inf }
 0x1c4   : > { %v800_v37 = vsel %vm762_vm7, %v798_v34, -inf  ;;  %v766_v38 = vsel %vm762_vm7, %v761_v35, -inf }
 0x1c5   : > { %v801_v39 = vmax.f32 %v799_v36, %v800_v37  ;;  %767 = vmax.xlane.f32.xlu0 %v766_v38  ;;  %v2420_v37 = vld [vmem:[%s3021_s10] sm:$0xff]   ;;  %v2421_v38 = vld [vmem:[%s3021_s10 + $0x8] sm:$0xff]  }
 0x1c7   : > { %v802_v40 = vrot.slane %v801_v39, 4 }
 0x1c9   : > { %v803_v41 = vmax.f32 %v801_v39, %v802_v40 }
 0x1cb   : > { %v804_v42 = vrot.slane %v803_v41, 2 }
 0x1cd   : > { %v805_v43 = vmax.f32 %v803_v41, %v804_v42 }
 0x1cf   : > { %v806_v44 = vrot.slane %v805_v43, 1 }
 0x1d1   : > { %v807_v45 = vmax.f32 %v805_v43, %v806_v44  ;;  %v2717_v44 = vunpack.c.l.bf16 %v2580_v3 }
 0x1d3   : > { %v808_v46 = vsub.f32 %v797_v30, %v807_v45  ;;  %v809_v47 = vsub.f32 %v798_v34, %v807_v45 }
 0x1d5   : > { %v810_v48 = vmul.f32 1.442695, %v808_v46  ;;  %v812_v49 = vmul.f32 1.442695, %v809_v47  ;;  %v2723_v46 = vld [vmem:[%s585_s16] sm:$0xf]  ;;  %v2726_v47 = vunpack.c.l.bf16 %v2582_v4  ;;  %s603_s16 = scalar_lea.vmem %s3018_s7, %s2217_s17 }
 0x1d6   : > { %1888 = vst.msk [vmem:[%s2825_s30] sm:$0xf] %vm1721_vm11, %v2723_v46  ;;  %s2472_s17 = smov 64  }
 0x1d7   : > { %2424 = vpow2.f32 %v810_v48 }
 0x1d8   : > { %2426 = vpow2.f32 %v812_v49 }
 0x1e1   : > { %v2425_v50 = vpop.eup %2424 }
 0x1e2   : > { %v2427_v51 = vpop.eup %2426  ;;  %v814_v52 = vsel %vm762_vm7, %v2425_v50, 0.0 }
 0x1e3   : > { %v815_v53 = vsel %vm762_vm7, %v2427_v51, 0.0 }
 0x1e4   : > { %v816_v54 = vadd.f32 %v815_v53, %v814_v52  ;;  %v2738_v53 = vsel %vm658_vm1, %v2723_v46, 0 }
 0x1e6   : > { %v817_v55 = vrot.slane %v816_v54, 4 }
 0x1e8   : > { %v818_v56 = vadd.f32 %v817_v55, %v816_v54 }
 0x1ea   : > { %v819_v57 = vrot.slane %v818_v56, 2 }
 0x1ec   : > { %v820_v58 = vadd.f32 %v819_v57, %v818_v56 }
 0x1ee   : > { %v821_v59 = vrot.slane %v820_v58, 1 }
 0x1f0   : > { %v822_v60 = vadd.f32 %v821_v59, %v820_v58  ;;  %v2756_v59 = vunpack.c.l.bf16 %v2593_v6 }
 0x1f2   : > { %2428 = vrcp.f32 %v822_v60 }
 0x1fc   : > { %v2429_v61 = vpop.eup %2428 }
 0x1fd   : > { %v824_v62 = vmul.f32 %v2429_v61, %v2425_v50  ;;  %v825_v63 = vmul.f32 %v2429_v61, %v2427_v51 }
 0x1ff   : > { %v874_v0 = vpack.c.bf16 %v825_v63, %v824_v62  ;;  %v633_v63 = vld [vmem:[%s594_s19] sm:$0x1] }
 0x200   : > { %vm1129_vm12 = vcmp.gt.f32.partialorder %v633_v63, 0.0 }
 0x201   : > { %875 = vxpose.xlu1.c.b16.start.end [1/1] (short) (narrow) %v874_v0, 16 }
 0x20e   : > { %764 = vmax.xlane.f32.xlu1 %v763_v2 }
 0x252   : > { %v768_v9 = vpop.xlane.xlu0 %767 }
 0x253   : > { %v770_v10 = vsub.f32 %v761_v35, %v768_v9 }
 0x255   : > { %v773_v13 = vmul.f32 1.442695, %v770_v10 }
 0x267   : > { %v2640_v7 = vpop.trf.xlu1 }
 0x268   : > { %2309 = vmatmul.mubr.msk.bf16.vlgmr.msra.gmra.mrb[4].mxu1 %vm892_vm9, %v2640_v7 }
 0x269   : > { %2320 = vmatprep.mubr.msk.bf16.mxu1 %vm2469_vm0, %v2468_v1 }
 0x29b   : > { %v765_v11 = vpop.xlane.xlu1 %764 }
 0x29c   : > { %v769_v12 = vsub.f32 %v760_v33, %v765_v11 }
 0x29e   : > { %v771_v14 = vmul.f32 1.442695, %v769_v12 }
 0x2a0   : > { %2430 = vpow2.f32 %v771_v14 }
 0x2a1   : > { %2432 = vpow2.f32 %v773_v13 }
 0x2aa   : > { %v2431_v15 = vpop.eup %2430 }
 0x2ab   : > { %v775_v16 = vsel %vm762_vm7, %v2431_v15, 0.0  ;;  %v2433_v17 = vpop.eup %2432 }
 0x2ac   : > { %776 = vadd.xlane.f32.xlu1 %v775_v16  ;;  %v778_v18 = vsel %vm762_vm7, %v2433_v17, 0.0 }
 0x2b0   : > { %779 = vadd.xlane.f32.xlu1 %v778_v18 }
 0x339   : > { %v777_v22 = vpop.xlane.xlu1 %776 }
 0x33a   : > { %2434 = vrcp.f32 %v777_v22 }
 0x33b   : > { %v2654_v24 = vpop.f32.mrb[4].mxu1 }
 0x33c   : > { %v2310_v25 = vpop.f32.mrb[5].mxu1  ;;  %v2658_v31 = vpack.c.bf16 %v2654_v24, %v2654_v24 }
 0x33d   : > { %v780_v27 = vpop.xlane.xlu1 %779  ;;  %v933_v28 = vpop.f32.mrb[6].mxu1 }
 0x33e   : > { %2436 = vrcp.f32 %v780_v27  ;;  %v2311_v29 = vpop.f32.mrb[7].mxu1  ;;  %v938_v36 = vsel %vm830_vm10, %v2658_v31, 0 }
 0x344   : > { %v2435_v30 = vpop.eup %2434 }
 0x345   : > { %v783_v33 = vmul.f32 %v2435_v30, %v2431_v15 }
 0x348   : > { %v2437_v32 = vpop.eup %2436 }
 0x349   : > { %v784_v34 = vmul.f32 %v2437_v32, %v2433_v17 }
 0x34b   : > { %v826_v35 = vpack.c.bf16 %v784_v34, %v783_v33 }
 0x34d   : > { %2303 = vmatmul.mubr.msk.bf16.vlgmr.msra.gmra.mrb[4].mxu0 %vm762_vm7, %v826_v35 }
 0x34e   : > { %2313 = vmatpush3.bf16.msra.mxu0 %v938_v36  ;;  %2314 = vmatprep.mubr.msk.bf16.mxu0 %vm2469_vm0, %v2468_v1 }
 0x34f   : > { %2324 = vmatprep.subr.bf16.mxu0 %v2468_v1 }
 0x355   : > { %2315 = vmatmul.mubr.msk.bf16.vlgmr.msra.gmra.mrb[8].mxu0 %vm762_vm7, %v826_v35 }
 0x356   : > { %2325 = vmatpush3.bf16.msra.mxu0 %v2420_v37  ;;  %2328 = vmatprep.mubr.msk.bf16.mxu0 %vm2469_vm0, %v2468_v1 }
 0x357   : > { %2326 = vmatprep.subr.bf16.mxu0 %v2468_v1 }
 0x35a   : > { %2327 = vmatpush3.bf16.msra.mxu0 %v2421_v38 }
 0x35b   : > { %2338 = vmatprep.subr.bf16.mxu0 %v2468_v1 }
 0x35d   : > { %2329 = vmatmul.mubr.msk.bf16.vlgmr.msra.gmra.mrb[12].mxu0 %vm658_vm1, %v2591_v5 }
 0x35e   : > { %2340 = vmatprep.mubr.msk.bf16.mxu0 %vm2469_vm0, %v2468_v1 }
 0x420   : > { %v2704_v39 = vpop.f32.mrb[4].mxu0 }
 0x421   : > { %v2304_v40 = vpop.f32.mrb[5].mxu0 }
 0x422   : > { %v2706_v41 = vpop.f32.mrb[6].mxu0 }
 0x423   : > { %v981_v42 = vpack.c.bf16 %v2706_v41, %v2704_v39  ;;  %v2305_v43 = vpop.f32.mrb[7].mxu0 }
 0x425   : > { %2319 = vmatpush3.bf16.msra.mxu1 %v981_v42 }
 0x426   : > { %2332 = vmatprep.subr.bf16.mxu1 %v2468_v1 }
 0x428   : > { %v2719_v45 = vpop.f32.mrb[8].mxu0  ;;  %2321 = vmatmul.mubr.msk.bf16.vlgmr.msra.gmra.mrb[8].mxu1 %vm892_vm9, %v2640_v7  ;;  %v1130_v7 = vsel %vm1129_vm12, 1, %v2470_v8 }
 0x429   : > { %v1715_v48 = vmul.f32 %v2719_v45, %v2717_v44  ;;  %v2316_v49 = vpop.f32.mrb[9].mxu0  ;;  %2334 = vmatprep.mubr.msk.bf16.mxu1 %vm2469_vm0, %v2468_v1  ;;  %v2767_v9 = vrot.slane %v1130_v7, %v757_v21 }
 0x42a   : > { %v2732_v3 = vpop.f32.mrb[10].mxu0 }
 0x42b   : > { %v2225_v50 = vpack.c.bf16 %v1715_v48, %v1715_v48  ;;  %v1716_v51 = vmul.f32 %v2732_v3, %v2726_v47  ;;  %v2317_v52 = vpop.f32.mrb[11].mxu0  ;;  %vm1135_vm13 = vcmp.eq.s32.totalorder %v2767_v9, 1 }
 0x42d   : > { %1776 = vst.msk [vmem:[%s2685_s24 + $0x4] sm:$0xf] %vm1721_vm11, %v2225_v50  ;;  %v2226_v4 = vpack.c.bf16 %v1716_v51, %v1716_v51 }
 0x42e   : > { %2333 = vmatpush3.bf16.xpose.msra.mxu1 %v2738_v53 }
 0x42f   : > { %1777 = vst.msk [vmem:[%s2685_s24 + $0x10] sm:$0xf] %vm1721_vm11, %v2226_v4  ;;  %2344 = vmatprep.subr.bf16.mxu1 %v2468_v1 }
 0x430   : > { %v1072_v54 = vpop.f32.mrb[12].mxu0 }
 0x431   : > { %v2330_v55 = vpop.f32.mrb[13].mxu0 }
 0x432   : > { %v1075_v56 = vpop.f32.mrb[14].mxu0 }
 0x433   : > { %v1079_v57 = vpack.c.bf16 %v1075_v56, %v1072_v54  ;;  %v2331_v58 = vpop.f32.mrb[15].mxu0 }
 0x435   : > { %2335 = vmatmul.mubr.msk.bf16.vlgmr.msra.gmra.mrb[12].mxu1 %vm658_vm1, %v1079_v57 }
 0x436   : > { %2345 = vmatpush3.bf16.msra.mxu1 %v2591_v5  ;;  %2346 = vmatprep.mubr.msk.bf16.mxu1 %vm2469_vm0, %v2468_v1 }
 0x437   : > { %2356 = vmatprep.subr.bf16.mxu1 %v2468_v1 }
 0x4fb   : > { %v2758_v60 = vpop.f32.mrb[8].mxu1 }
 0x4fc   : > { %v1830_v61 = vmul.f32 %v2758_v60, %v2756_v59  ;;  %v2322_v62 = vpop.f32.mrb[9].mxu1 }
 0x4fd   : > { %v1019_v5 = vpop.f32.mrb[10].mxu1 }
 0x4fe   : > { %v1857_v0 = vpack.c.bf16 %v1830_v61, %v1830_v61  ;;  %v2323_v2 = vpop.f32.mrb[11].mxu1 }
 0x500   : > { %1858 = vst.msk [vmem:[%s2699_s29 + $0x4] sm:$0xf] %vm1721_vm11, %v1857_v0 }
 0x508   : > { %v1120_v10 = vpop.f32.mrb[12].mxu1 }
 0x509   : > { %v1127_v11 = vmul.f32 0.17677669, %v1120_v10  ;;  %v2336_v12 = vpop.f32.mrb[13].mxu1 }
 0x50a   : > { %v1123_v13 = vpop.f32.mrb[14].mxu1 }
 0x50b   : > { %v1160_v14 = vsel %vm795_vm6, %v1127_v11, -1e+30  ;;  %v1128_v15 = vmul.f32 0.17677669, %v1123_v13  ;;  %v2337_v16 = vpop.f32.mrb[15].mxu1 }
 0x50c   : > { %v1136_v17 = vsel %vm1135_vm13, %v1127_v11, -1e+30  ;;  %v1162_v21 = vsel %vm762_vm7, %v1160_v14, -inf }
 0x50d   : > { %v1161_v18 = vsel %vm796_vm8, %v1128_v15, -1e+30  ;;  %v1138_v20 = vsel %vm762_vm7, %v1136_v17, -inf  ;;  %v1137_v25 = vsel %vm1135_vm13, %v1128_v15, -1e+30 }
 0x50e   : > { %v1163_v22 = vsel %vm762_vm7, %v1161_v18, -inf  ;;  %1139 = vmax.xlane.f32.xlu0 %v1138_v20  ;;  %v1141_v28 = vsel %vm762_vm7, %v1137_v25, -inf }
 0x50f   : > { %v1164_v23 = vmax.f32 %v1162_v21, %v1163_v22 }
 0x511   : > { %v1165_v27 = vrot.slane %v1164_v23, 4 }
 0x512   : > { %1142 = vmax.xlane.f32.xlu0 %v1141_v28 }
 0x513   : > { %v1166_v29 = vmax.f32 %v1164_v23, %v1165_v27 }
 0x515   : > { %v1167_v30 = vrot.slane %v1166_v29, 2 }
 0x517   : > { %v1168_v32 = vmax.f32 %v1166_v29, %v1167_v30 }
 0x519   : > { %v1169_v26 = vrot.slane %v1168_v32, 1 }
 0x51b   : > { %v1170_v33 = vmax.f32 %v1168_v32, %v1169_v26  ;;  %v2422_v32 = vld [vmem:[%s3022_s11] sm:$0xff]   ;;  %v2423_v26 = vld [vmem:[%s3022_s11 + $0x8] sm:$0xff]  }
 0x51d   : > { %v1171_v34 = vsub.f32 %v1160_v14, %v1170_v33  ;;  %v1172_v35 = vsub.f32 %v1161_v18, %v1170_v33  ;;  %v1193_v14 = vsel %vm830_vm10, %v2723_v46, 0 }
 0x51e   : > { %2339 = vmatpush3.bf16.msra.mxu0 %v1193_v14 }
 0x51f   : > { %v1173_v36 = vmul.f32 1.442695, %v1171_v34  ;;  %v1175_v37 = vmul.f32 1.442695, %v1172_v35  ;;  %2350 = vmatprep.subr.bf16.mxu0 %v2468_v1 }
 0x521   : > { %2438 = vpow2.f32 %v1173_v36 }
 0x522   : > { %2440 = vpow2.f32 %v1175_v37 }
 0x52b   : > { %v2439_v38 = vpop.eup %2438 }
 0x52c   : > { %v2441_v40 = vpop.eup %2440  ;;  %v1177_v42 = vsel %vm762_vm7, %v2439_v38, 0.0 }
 0x52d   : > { %v1178_v43 = vsel %vm762_vm7, %v2441_v40, 0.0 }
 0x52e   : > { %v1179_v48 = vadd.f32 %v1178_v43, %v1177_v42 }
 0x530   : > { %v1180_v49 = vrot.slane %v1179_v48, 4 }
 0x532   : > { %v1181_v50 = vadd.f32 %v1180_v49, %v1179_v48 }
 0x534   : > { %v1182_v51 = vrot.slane %v1181_v50, 2 }
 0x536   : > { %v1183_v52 = vadd.f32 %v1182_v51, %v1181_v50 }
 0x538   : > { %v1184_v4 = vrot.slane %v1183_v52, 1 }
 0x53a   : > { %v1185_v54 = vadd.f32 %v1184_v4, %v1183_v52 }
 0x53c   : > { %2442 = vrcp.f32 %v1185_v54 }
 0x546   : > { %v2443_v55 = vpop.eup %2442 }
 0x547   : > { %v1187_v56 = vmul.f32 %v2443_v55, %v2439_v38  ;;  %v1188_v57 = vmul.f32 %v2443_v55, %v2441_v40  ;;  %v2860_v55 = vunpack.c.l.bf16 %v2723_v46 }
 0x549   : > { %v1236_v58 = vpack.c.bf16 %v1188_v57, %v1187_v56 }
 0x54b   : > { %1237 = vxpose.xlu1.c.b16.start.end [1/1] (short) (narrow) %v1236_v58, 16 }
 0x59b   : > { %v1140_v61 = vpop.xlane.xlu0 %1139 }
 0x59c   : > { %v1144_v62 = vsub.f32 %v1136_v17, %v1140_v61 }
 0x59e   : > { %v1146_v63 = vmul.f32 1.442695, %v1144_v62 }
 0x59f   : > { %v1143_v5 = vpop.xlane.xlu0 %1142 }
 0x5a0   : > { %2444 = vpow2.f32 %v1146_v63  ;;  %v1145_v0 = vsub.f32 %v1137_v25, %v1143_v5 }
 0x5a2   : > { %v1148_v2 = vmul.f32 1.442695, %v1145_v0 }
 0x5a4   : > { %2446 = vpow2.f32 %v1148_v2 }
 0x5aa   : > { %v2445_v7 = vpop.eup %2444 }
 0x5ab   : > { %v1150_v10 = vsel %vm762_vm7, %v2445_v7, 0.0 }
 0x5ac   : > { %1151 = vadd.xlane.f32.xlu0 %v1150_v10 }
 0x5ae   : > { %v2447_v11 = vpop.eup %2446 }
 0x5af   : > { %v1153_v12 = vsel %vm762_vm7, %v2447_v11, 0.0 }
 0x5b0   : > { %1154 = vadd.xlane.f32.xlu0 %v1153_v12 }
 0x5b1   : > { %v1245_v13 = vpop.trf.xlu1 }
 0x5b2   : > { %2347 = vmatmul.mubr.msk.bf16.vlgmr.msra.gmra.mrb[16].mxu1 %vm892_vm9, %v1245_v13 }
 0x5b3   : > { %2358 = vmatprep.mubr.msk.bf16.mxu1 %vm2469_vm0, %v2468_v1 }
 0x639   : > { %v1152_v15 = vpop.xlane.xlu0 %1151 }
 0x63a   : > { %2448 = vrcp.f32 %v1152_v15 }
 0x63d   : > { %v1155_v16 = vpop.xlane.xlu0 %1154 }
 0x63e   : > { %2450 = vrcp.f32 %v1155_v16 }
 0x644   : > { %v2449_v17 = vpop.eup %2448 }
 0x645   : > { %v1158_v20 = vmul.f32 %v2449_v17, %v2445_v7 }
 0x648   : > { %v2451_v18 = vpop.eup %2450 }
 0x649   : > { %v1159_v21 = vmul.f32 %v2451_v18, %v2447_v11  ;;  %v636_v11 = vld [vmem:[%s603_s16] sm:$0xff] }
 0x64a   : > { %vm1495_vm14 = vcmp.gt.f32.partialorder %v636_v11, 0.0 }
 0x64b   : > { %v1189_v22 = vpack.c.bf16 %v1159_v21, %v1158_v20  ;;  %v1496_v12 = vsel %vm1495_vm14, 1, %v2470_v8 }
 0x64d   : > { %2341 = vmatmul.mubr.msk.bf16.vlgmr.msra.gmra.mrb[16].mxu0 %vm762_vm7, %v1189_v22 }
 0x64e   : > { %2352 = vmatprep.mubr.msk.bf16.mxu0 %vm2469_vm0, %v2468_v1 }
 0x685   : > { %v2795_v25 = vpop.f32.mrb[16].mxu1 }
 0x686   : > { %v2799_v23 = vpack.c.bf16 %v2795_v25, %v2795_v25  ;;  %v2348_v27 = vpop.f32.mrb[17].mxu1 }
 0x687   : > { %v1293_v28 = vpop.f32.mrb[18].mxu1 }
 0x688   : > { %v2349_v29 = vpop.f32.mrb[19].mxu1  ;;  %v1298_v30 = vsel %vm830_vm10, %v2799_v23, 0 }
 0x689   : > { %2351 = vmatpush3.bf16.msra.mxu0 %v1298_v30 }
 0x68a   : > { %2362 = vmatprep.subr.bf16.mxu0 %v2468_v1 }
 0x68c   : > { %2353 = vmatmul.mubr.msk.bf16.vlgmr.msra.gmra.mrb[20].mxu0 %vm762_vm7, %v1189_v22 }
 0x68d   : > { %2363 = vmatpush3.bf16.msra.mxu0 %v2422_v32  ;;  %2366 = vmatprep.mubr.msk.bf16.mxu0 %vm2469_vm0, %v2468_v1 }
 0x68e   : > { %2364 = vmatprep.subr.bf16.mxu0 %v2468_v1 }
 0x691   : > { %2365 = vmatpush3.bf16.msra.mxu0 %v2423_v26  ;;  %v2219_v26 = vpack.c.bf16 %v2704_v39, %v2704_v39 }
 0x692   : > { %2376 = vmatprep.subr.bf16.mxu0 %v2468_v1 }
 0x694   : > { %2367 = vmatmul.mubr.msk.bf16.vlgmr.msra.gmra.mrb[24].mxu0 %vm658_vm1, %v2593_v6 }
 0x695   : > { %2377 = vmatpush3.bf16.msra.mxu0 %v1193_v14  ;;  %2378 = vmatprep.mubr.msk.bf16.mxu0 %vm2469_vm0, %v2468_v1 }
 0x696   : > { %2388 = vmatprep.subr.bf16.mxu0 %v2468_v1 }
 0x720   : > { %v2830_v33 = vpop.f32.mrb[16].mxu0 }
 0x721   : > { %v2342_v34 = vpop.f32.mrb[17].mxu0 }
 0x722   : > { %v2832_v6 = vpop.f32.mrb[18].mxu0  ;;  %v2220_v34 = vpack.c.bf16 %v2706_v41, %v2706_v41 }
 0x723   : > { %v1341_v35 = vpack.c.bf16 %v2832_v6, %v2830_v33  ;;  %v2343_v36 = vpop.f32.mrb[19].mxu0 }
 0x725   : > { %2357 = vmatpush3.bf16.msra.mxu1 %v1341_v35 }
 0x726   : > { %2370 = vmatprep.subr.bf16.mxu1 %v2468_v1 }
 0x728   : > { %2359 = vmatmul.mubr.msk.bf16.vlgmr.msra.gmra.mrb[20].mxu1 %vm892_vm9, %v1245_v13 }
 0x729   : > { %2372 = vmatprep.mubr.msk.bf16.mxu1 %vm2469_vm0, %v2468_v1 }
 0x72e   : > { %2371 = vmatpush3.bf16.xpose.msra.mxu1 %v2738_v53 }
 0x72f   : > { %2382 = vmatprep.subr.bf16.mxu1 %v2468_v1 }
 0x75f   : > { %v2842_v37 = vpop.f32.mrb[20].mxu0 }
 0x760   : > { %v1719_v38 = vmul.f32 %v2842_v37, %v2717_v44  ;;  %v2354_v40 = vpop.f32.mrb[21].mxu0 }
 0x761   : > { %v2846_v42 = vpop.f32.mrb[22].mxu0 }
 0x762   : > { %v2233_v43 = vpack.c.bf16 %v1719_v38, %v1719_v38  ;;  %v1720_v48 = vmul.f32 %v2846_v42, %v2726_v47  ;;  %v2355_v49 = vpop.f32.mrb[23].mxu0  ;;  %v2227_v38 = vpack.c.bf16 %v2830_v33, %v2830_v33 }
 0x764   : > { %1827 = vst.msk [vmem:[%s2685_s24 + $0x8] sm:$0xf] %vm1721_vm11, %v2233_v43  ;;  %v2234_v50 = vpack.c.bf16 %v1720_v48, %v1720_v48  ;;  %v2228_v48 = vpack.c.bf16 %v2832_v6, %v2832_v6 }
 0x766   : > { %1828 = vst.msk [vmem:[%s2685_s24 + $0x14] sm:$0xf] %vm1721_vm11, %v2234_v50 }
 0x767   : > { %v1432_v53 = vpop.f32.mrb[24].mxu0 }
 0x768   : > { %v1438_v51 = vpack.c.bf16 %v1432_v53, %v1432_v53  ;;  %v2368_v52 = vpop.f32.mrb[25].mxu0 }
 0x769   : > { %v1435_v4 = vpop.f32.mrb[26].mxu0  ;;  %v2221_v52 = vpack.c.bf16 %v2719_v45, %v2719_v45 }
 0x76a   : > { %v2369_v54 = vpop.f32.mrb[27].mxu0  ;;  %2373 = vmatmul.mubr.msk.bf16.vlgmr.msra.gmra.mrb[24].mxu1 %vm658_vm1, %v1438_v51  ;;  %v2229_v4 = vpack.c.bf16 %v2842_v37, %v2842_v37  ;;  %v1717_v37 = vmul.f32 %v2830_v33, %v2717_v44  ;;  %vm1735_vm1 = vcmask 519424  }
 0x76b   : > { %2383 = vmatpush3.bf16.msra.mxu1 %v2650_v19  ;;  %2384 = vmatprep.mubr.msk.bf16.mxu1 %vm2469_vm0, %v2468_v1  ;;  %v2236_v54 = vpack.c.bf16 %v2758_v60, %v2758_v60  ;;  %v1829_v60 = vmul.f32 %v2654_v24, %v2756_v59  ;;  %v2230_v24 = vpack.c.bf16 %v2846_v42, %v2846_v42 }
 0x76c   : > { %2394 = vmatprep.subr.bf16.mxu1 %v2468_v1 }
 0x7fb   : > { %v2862_v56 = vpop.f32.mrb[20].mxu1 }
 0x7fc   : > { %v1885_v57 = vmul.f32 %v2862_v56, %v2860_v55  ;;  %v2360_v58 = vpop.f32.mrb[21].mxu1  ;;  %v2242_v45 = vpack.c.bf16 %v2862_v56, %v2862_v56  ;;  %v2222_v56 = vpack.c.bf16 %v2732_v3, %v2732_v3 }
 0x7fd   : > { %v1379_v61 = vpop.f32.mrb[22].mxu1  ;;  %v1713_v58 = vmul.f32 %v2704_v39, %v2717_v44  ;;  %v2237_v39 = vpack.c.bf16 %v1829_v60, %v1829_v60  ;;  %v1714_v44 = vmul.f32 %v2706_v41, %v2726_v47 }
 0x7fe   : > { %v1912_v62 = vpack.c.bf16 %v1885_v57, %v1885_v57  ;;  %v2361_v63 = vpop.f32.mrb[23].mxu1 }
 0x7ff   : > { %v2231_v63 = vpack.c.bf16 %v1717_v37, %v1717_v37  ;;  %v2224_v33 = vpack.c.bf16 %v1714_v44, %v1714_v44 }
 0x800   : > { %1913 = vst.msk [vmem:[%s2825_s30 + $0x4] sm:$0xf] %vm1721_vm11, %v1912_v62  ;;  %v2223_v62 = vpack.c.bf16 %v1713_v58, %v1713_v58 }
 0x83d   : > { %v1476_v19 = vpop.f32.mrb[24].mxu1 }
 0x83e   : > { %v1482_v5 = vmul.f32 0.17677669, %v1476_v19  ;;  %v2374_v0 = vpop.f32.mrb[25].mxu1 }
 0x83f   : > { %v1479_v2 = vpop.f32.mrb[26].mxu1 }
 0x840   : > { %v2375_v7 = vpop.f32.mrb[27].mxu1  ;;  %v1483_v46 = vsel %vm1135_vm13, %v1482_v5, -1e+30 }
 0x841   : > { %v1484_v10 = vsel %vm762_vm7, %v1483_v46, -inf }
 0x842   : > { %1485 = vmax.xlane.f32.xlu0 %v1484_v10 }
 0x858   : > { %1498 = vperm.xlu0 %2416, %v1496_v12  }
 0x8cf   : > { %v1486_v13 = vpop.xlane.xlu0 %1485 }
 0x8d0   : > { %v1487_v14 = vsub.f32 %v1483_v46, %v1486_v13 }
 0x8d2   : > { %v1488_v15 = vmul.f32 1.442695, %v1487_v14 }
 0x8d4   : > { %2452 = vpow2.f32 %v1488_v15 }
 0x8d7   : > { %v1499_v16 = vpop.permute.xlu0 %1498 }
 0x8d8   : > { %vm1500_vm15 = vcmp.eq.s32.totalorder %v1499_v16, 1 }
 0x8d9   : > { %v1501_v9 = vsel %vm1500_vm15, %v1482_v5, -1e+30 }
 0x8da   : > { %v1502_v17 = vsel %vm762_vm7, %v1501_v9, -inf }
 0x8db   : > { %v1503_v18 = vrot.slane %v1502_v17, 4 }
 0x8dd   : > { %v1504_v20 = vmax.f32 %v1502_v17, %v1503_v18 }
 0x8de   : > { %v2878_v21 = vpop.eup %2452 }
 0x8df   : > { %v1505_v22 = vrot.slane %v1504_v20, 2  ;;  %v1490_v27 = vsel %vm762_vm7, %v2878_v21, 0.0 }
 0x8e0   : > { %1491 = vadd.xlane.f32.xlu1 %v1490_v27 }
 0x8e1   : > { %v1506_v8 = vmax.f32 %v1504_v20, %v1505_v22 }
 0x8e3   : > { %v1507_v28 = vrot.slane %v1506_v8, 1 }
 0x8e5   : > { %v1508_v29 = vmax.f32 %v1506_v8, %v1507_v28 }
 0x8e7   : > { %v1509_v30 = vsub.f32 %v1501_v9, %v1508_v29 }
 0x8e9   : > { %v1510_v32 = vmul.f32 1.442695, %v1509_v30 }
 0x8eb   : > { %2454 = vpow2.f32 %v1510_v32  ;;  %v1884_v32 = vmul.f32 %v2795_v25, %v2860_v55 }
 0x8f1   : > { %1729 = vrot.lane.b32.xlu1 %v2219_v26, %s2471_s8 }
 0x8f5   : > { %v2455_v35 = vpop.eup %2454  ;;  %1731 = vrot.lane.b32.xlu1 %v2220_v34, %s2471_s8 }
 0x8f6   : > { %v1512_v36 = vsel %vm762_vm7, %v2455_v35, 0.0 }
 0x8f7   : > { %v1513_v40 = vrot.slane %v1512_v36, 4 }
 0x8f9   : > { %v1514_v43 = vadd.f32 %v1513_v40, %v1512_v36  ;;  %1783 = vrot.lane.b32.xlu1 %v2227_v38, %s2471_s8 }
 0x8fb   : > { %v1515_v49 = vrot.slane %v1514_v43, 2 }
 0x8fd   : > { %v1516_v50 = vadd.f32 %v1515_v49, %v1514_v43  ;;  %1785 = vrot.lane.b32.xlu1 %v2228_v48, %s2471_s8  ;;  %v2243_v48 = vpack.c.bf16 %v1884_v32, %v1884_v32 }
 0x8ff   : > { %v1517_v53 = vrot.slane %v1516_v50, 1 }
 0x901   : > { %1892 = vrot.lane.b32.xlu1 %v2799_v23, %s2471_s8  ;;  %v1518_v51 = vadd.f32 %v1517_v53, %v1516_v50 }
 0x903   : > { %2456 = vrcp.f32 %v1518_v51 }
 0x905   : > { %1744 = vrot.lane.b32.xlu1 %v2221_v52, %s2472_s17 }
 0x909   : > { %1797 = vrot.lane.b32.xlu1 %v2229_v4, %s2472_s17 }
 0x90d   : > { %v2457_v57 = vpop.eup %2456  ;;  %1845 = vrot.lane.b32.xlu1 %v2236_v54, %s2472_s17 }
 0x90e   : > { %v1520_v23 = vmul.f32 %v2457_v57, %v2455_v35 }
 0x910   : > { %v1565_v61 = vpack.c.bf16 %v1520_v23, %v1520_v23 }
 0x911   : > { %1900 = vrot.lane.b32.xlu1 %v2242_v45, %s2472_s17 }
 0x912   : > { %1566 = vxpose.xlu0.c.b16.start.end [1/1] (short) (narrow) %v1565_v61, 16 }
 0x915   : > { %1759 = vrot.lane.b32.xlu1 %v2223_v62, %s2473_s20 }
 0x919   : > { %1811 = vrot.lane.b32.xlu1 %v2231_v63, %s2473_s20 }
 0x91b   : > { %1837 = vrot.lane.b32.xlu0 %v2658_v31, %s2471_s8  ;;  %v1718_v31 = vmul.f32 %v2832_v6, %v2726_v47 }
 0x91d   : > { %1853 = vrot.lane.b32.xlu1 %v2237_v39, %s2473_s20  ;;  %v2232_v3 = vpack.c.bf16 %v1718_v31, %v1718_v31 }
 0x91f   : > { %1746 = vrot.lane.b32.xlu0 %v2222_v56, %s2472_s17 }
 0x923   : > { %1799 = vrot.lane.b32.xlu0 %v2230_v24, %s2472_s17 }
 0x927   : > { %1761 = vrot.lane.b32.xlu0 %v2224_v33, %s2473_s20 }
 0x92b   : > { %1813 = vrot.lane.b32.xlu0 %v2232_v3, %s2473_s20 }
 0x96d   : > { %v1492_v19 = vpop.xlane.xlu1 %1491 }
 0x96e   : > { %2458 = vrcp.f32 %v1492_v19 }
 0x971   : > { %v1730_v41 = vpop.permute.xlu1 %1729 }
 0x972   : > { %1736 = vst.msk [vmem:[%s2685_s24] sm:$0xf] %vm1735_vm1, %v1730_v41 }
 0x975   : > { %v1732_v42 = vpop.permute.xlu1 %1731 }
 0x976   : > { %1737 = vst.msk [vmem:[%s2685_s24 + $0xc] sm:$0xf] %vm1735_vm1, %v1732_v42 }
 0x978   : > { %v2459_v5 = vpop.eup %2458  ;;  %v1574_v47 = vpop.trf.xlu0 }
 0x979   : > { %v1494_v6 = vmul.f32 %v2459_v5, %v2878_v21  ;;  %v1784_v0 = vpop.permute.xlu1 %1783  ;;  %2385 = vmatmul.mubr.msk.bf16.vlgmr.msra.gmra.mrb[28].mxu1 %vm762_vm7, %v1574_v47 }
 0x97a   : > { %1789 = vst.msk [vmem:[%s2685_s24 + $0x4] sm:$0xf] %vm1735_vm1, %v1784_v0  ;;  %2396 = vmatprep.mubr.msk.bf16.mxu1 %vm2469_vm0, %v2468_v1 }
 0x97b   : > { %v1521_v2 = vpack.c.bf16 %v1494_v6, %v1494_v6 }
 0x97d   : > { %2379 = vmatmul.mubr.msk.bf16.vlgmr.msra.gmra.mrb[28].mxu0 %vm762_vm7, %v1521_v2  ;;  %v1786_v7 = vpop.permute.xlu1 %1785 }
 0x97e   : > { %1790 = vst.msk [vmem:[%s2685_s24 + $0x10] sm:$0xf] %vm1735_vm1, %v1786_v7  ;;  %2390 = vmatprep.mubr.msk.bf16.mxu0 %vm2469_vm0, %v2468_v1  ;;  %vm1765_vm0 = vcmask 1044224  }
 0x981   : > { %v1893_v46 = vpop.permute.xlu1 %1892 }
 0x982   : > { %1895 = vst.msk [vmem:[%s2825_s30] sm:$0xf] %vm1735_vm1, %v1893_v46 }
 0x985   : > { %v1745_v10 = vpop.permute.xlu1 %1744 }
 0x986   : > { %1751 = vst.msk [vmem:[%s2685_s24] sm:$0xf] %vm1750_vm2, %v1745_v10 }
 0x989   : > { %v1798_v11 = vpop.permute.xlu1 %1797 }
 0x98a   : > { %1803 = vst.msk [vmem:[%s2685_s24 + $0x4] sm:$0xf] %vm1750_vm2, %v1798_v11 }
 0x98d   : > { %v1846_v12 = vpop.permute.xlu1 %1845  ;;  %v1838_v13 = vpop.permute.xlu0 %1837 }
 0x98e   : > { %1840 = vst.msk [vmem:[%s2699_s29] sm:$0xf] %vm1735_vm1, %v1838_v13 }
 0x98f   : > { %1848 = vst.msk [vmem:[%s2699_s29] sm:$0xf] %vm1750_vm2, %v1846_v12 }
 0x991   : > { %v1901_v1 = vpop.permute.xlu1 %1900  ;;  %v1747_v14 = vpop.permute.xlu0 %1746 }
 0x992   : > { %1903 = vst.msk [vmem:[%s2825_s30] sm:$0xf] %vm1750_vm2, %v1901_v1  ;;  %1752 = vst.msk [vmem:[%s2685_s24 + $0xc] sm:$0xf] %vm1750_vm2, %v1747_v14 }
 0x995   : > { %v1800_v15 = vpop.permute.xlu0 %1799  ;;  %v1760_v16 = vpop.permute.xlu1 %1759 }
 0x996   : > { %1804 = vst.msk [vmem:[%s2685_s24 + $0x10] sm:$0xf] %vm1750_vm2, %v1800_v15 }
 0x997   : > { %1766 = vst.msk [vmem:[%s2685_s24] sm:$0xf] %vm1765_vm0, %v1760_v16 }
 0x999   : > { %v1762_v9 = vpop.permute.xlu0 %1761  ;;  %v1812_v17 = vpop.permute.xlu1 %1811 }
 0x99a   : > { %1767 = vst.msk [vmem:[%s2685_s24 + $0xc] sm:$0xf] %vm1765_vm0, %v1762_v9  ;;  %1817 = vst.msk [vmem:[%s2685_s24 + $0x4] sm:$0xf] %vm1765_vm0, %v1812_v17 }
 0x99d   : > { %v1814_v18 = vpop.permute.xlu0 %1813  ;;  %v1854_v20 = vpop.permute.xlu1 %1853 }
 0x99e   : > { %1818 = vst.msk [vmem:[%s2685_s24 + $0x10] sm:$0xf] %vm1765_vm0, %v1814_v18  ;;  %1856 = vst.msk [vmem:[%s2699_s29] sm:$0xf] %vm1765_vm0, %v1854_v20 }
 0xa4c   : > { %v1619_v21 = vpop.f32.mrb[28].mxu1 }
 0xa4d   : > { %v1625_v22 = vpack.c.bf16 %v1619_v21, %v1619_v21  ;;  %v2386_v27 = vpop.f32.mrb[29].mxu1  ;;  %v1886_v45 = vmul.f32 %v1619_v21, %v2860_v55 }
 0xa4e   : > { %v1622_v8 = vpop.f32.mrb[30].mxu1 }
 0xa4f   : > { %1917 = vrot.lane.b32.xlu0 %v1625_v22, %s2471_s8  ;;  %v2387_v28 = vpop.f32.mrb[31].mxu1  ;;  %v1627_v29 = vsel %vm830_vm10, %v1625_v22, 0  ;;  %v2246_v39 = vpack.c.bf16 %v1886_v45, %v1886_v45 }
 0xa50   : > { %v1559_v30 = vpop.f32.mrb[28].mxu0  ;;  %2389 = vmatpush3.bf16.msra.mxu0 %v1627_v29 }
 0xa51   : > { %v1669_v26 = vpack.c.bf16 %v1559_v30, %v1559_v30  ;;  %v1831_v34 = vmul.f32 %v1559_v30, %v2756_v59  ;;  %v2380_v35 = vpop.f32.mrb[29].mxu0 }
 0xa52   : > { %v1562_v36 = vpop.f32.mrb[30].mxu0 }
 0xa53   : > { %v2240_v38 = vpack.c.bf16 %v1831_v34, %v1831_v34  ;;  %v2381_v40 = vpop.f32.mrb[31].mxu0  ;;  %2391 = vmatmul.mubr.msk.bf16.vlgmr.msra.gmra.mrb[32].mxu0 %vm762_vm7, %v1521_v2  ;;  %1862 = vrot.lane.b32.xlu1 %v1669_v26, %s2471_s8  ;;  %v1671_v43 = vsel %vm830_vm10, %v1669_v26, 0 }
 0xa54   : > { %2395 = vmatpush3.bf16.msra.mxu1 %v1671_v43 }
 0xa55   : > { %1878 = vrot.lane.b32.xlu0 %v2240_v38, %s2473_s20 }
 0xa57   : > { %2397 = vmatmul.mubr.msk.bf16.vlgmr.msra.gmra.mrb[32].mxu1 %vm762_vm7, %v1574_v47  ;;  %1908 = vrot.lane.b32.xlu1 %v2243_v48, %s2473_s20 }
 0xac1   : > { %v1918_v25 = vpop.permute.xlu0 %1917 }
 0xac2   : > { %1920 = vst.msk [vmem:[%s2825_s30 + $0x4] sm:$0xf] %vm1735_vm1, %v1918_v25 }
 0xac5   : > { %v1863_v49 = vpop.permute.xlu1 %1862 }
 0xac6   : > { %1865 = vst.msk [vmem:[%s2699_s29 + $0x4] sm:$0xf] %vm1735_vm1, %v1863_v49 }
 0xac7   : > { %v1879_v56 = vpop.permute.xlu0 %1878 }
 0xac9   : > { %v1909_v50 = vpop.permute.xlu1 %1908 }
 0xaca   : > { %1911 = vst.msk [vmem:[%s2825_s30] sm:$0xf] %vm1765_vm0, %v1909_v50 }
 0xb26   : > { %v1663_v53 = vpop.f32.mrb[32].mxu0 }
 0xb27   : > { %v1832_v51 = vmul.f32 %v1663_v53, %v2756_v59  ;;  %v2239_v52 = vpack.c.bf16 %v1663_v53, %v1663_v53  ;;  %v2392_v4 = vpop.f32.mrb[33].mxu0 }
 0xb28   : > { %v1666_v54 = vpop.f32.mrb[34].mxu0 }
 0xb29   : > { %v1882_v57 = vpack.c.bf16 %v1832_v51, %v1832_v51  ;;  %1870 = vrot.lane.b32.xlu0 %v2239_v52, %s2472_s17  ;;  %v2393_v23 = vpop.f32.mrb[35].mxu0 }
 0xb2a   : > { %v1707_v58 = vpop.f32.mrb[32].mxu1 }
 0xb2b   : > { %1883 = vst.msk [vmem:[%s2699_s29 + $0x8] sm:$0xf] %vm1721_vm11, %v1882_v57  ;;  %v1887_v61 = vmul.f32 %v1707_v58, %v2860_v55  ;;  %v2245_v37 = vpack.c.bf16 %v1707_v58, %v1707_v58  ;;  %v2398_v59 = vpop.f32.mrb[33].mxu1 }
 0xb2c   : > { %v1710_v62 = vpop.f32.mrb[34].mxu1 }
 0xb2d   : > { %v1937_v60 = vpack.c.bf16 %v1887_v61, %v1887_v61  ;;  %v2399_v63 = vpop.f32.mrb[35].mxu1  ;;  %1925 = vrot.lane.b32.xlu0 %v2245_v37, %s2472_s17 }
 0xb2f   : > { %1938 = vst.msk [vmem:[%s2825_s30 + $0x8] sm:$0xf] %vm1721_vm11, %v1937_v60 }
 0xb31   : > { %1933 = vrot.lane.b32.xlu0 %v2246_v39, %s2473_s20 }
 0xb9b   : > { %v1871_v44 = vpop.permute.xlu0 %1870 }
 0xb9c   : > { %1873 = vst.msk [vmem:[%s2699_s29 + $0x4] sm:$0xf] %vm1750_vm2, %v1871_v44 }
 0xb9d   : > { %1881 = vst.msk [vmem:[%s2699_s29 + $0x4] sm:$0xf] %vm1765_vm0, %v1879_v56 }
 0xb9f   : > { %v1926_v55 = vpop.permute.xlu0 %1925 }
 0xba0   : > { %1928 = vst.msk [vmem:[%s2825_s30 + $0x4] sm:$0xf] %vm1750_vm2, %v1926_v55 }
 0xba3   : > { %v1934_v24 = vpop.permute.xlu0 %1933 }
 0xba4   : > { %1936 = vst.msk [vmem:[%s2825_s30 + $0x4] sm:$0xf] %vm1765_vm0, %v1934_v24 }
 0xba5 PF: > { %s25_s28 = sadd.s32 1, %s2466_s28  }
 0xba6   : > { %p22_p4 = scmp.ge.s32.totalorder %s25_s28, 4  }
 0xba8   :  { %24 = sbr.rel (!%p22_p4) target bundleno = 1 (0x1), region = 146 }

</bundles_post_ra>
